<compile_context>
chip_gen: v7x
topology: tpu7x:2x2x1
jax: 0.10.0
libtpu: 0.0.40
codegen_flags: <defaults>
</compile_context>

<pallas_src>
import functools

import jax
import jax.numpy as jnp
from jax.experimental import pallas as pl
from jax.experimental.pallas import tpu as pltpu

INPUT_DIM = 784
HIDDEN_DIM = 400
LATENT_DIM = 20
LATENT_PAD = 128              # latent dim padded to a full lane group
HEADS_DIM = 2 * LATENT_PAD    # fused (mu || logvar) head width


def _round_up(x, m):
    return (x + m - 1) // m * m


def vae_kernel(
    x_ref, eps_ref,
    w_e1_ref, b_e1_ref, w_e2_ref, b_e2_ref,
    w_hd_ref, b_hd_ref,
    w_d1_ref, b_d1_ref, w_d2_ref, b_d2_ref, w_d3_ref, b_d3_ref,
    recon_ref, heads_ref,
):
    x = x_ref[...]

    # --- encoder: Linear -> ReLU -> Linear -> ReLU ---
    h = jnp.dot(x, w_e1_ref[...], preferred_element_type=jnp.float32) + b_e1_ref[...]
    h = jnp.maximum(h, 0.0)
    h = jnp.dot(h, w_e2_ref[...], preferred_element_type=jnp.float32) + b_e2_ref[...]
    h = jnp.maximum(h, 0.0)

    # --- fused mu / logvar heads (single lane-dense N=256 matmul) ---
    heads = jnp.dot(h, w_hd_ref[...], preferred_element_type=jnp.float32) + b_hd_ref[...]
    heads_ref[...] = heads.astype(heads_ref.dtype)

    mu_pad = heads[:, :LATENT_PAD]        # lanes [20:128) are exact zeros
    lv_pad = heads[:, LATENT_PAD:]        # lanes [20:128) are exact zeros

    # --- reparameterize: z = mu + eps * exp(0.5 * logvar) ---
    # padding lanes: mu=0, logvar=0 -> std=1, eps=0 -> z=0; and w_d1 has zero
    # rows there, so padding contributes exactly nothing downstream.
    z = mu_pad + eps_ref[...] * jnp.exp(0.5 * lv_pad)

    # --- decoder: Linear -> ReLU -> Linear -> ReLU -> Linear -> Sigmoid ---
    d = jnp.dot(z, w_d1_ref[...], preferred_element_type=jnp.float32) + b_d1_ref[...]
    d = jnp.maximum(d, 0.0)
    d = jnp.dot(d, w_d2_ref[...], preferred_element_type=jnp.float32) + b_d2_ref[...]
    d = jnp.maximum(d, 0.0)
    logits = jnp.dot(d, w_d3_ref[...], preferred_element_type=jnp.float32) + b_d3_ref[...]
    recon_ref[...] = jax.nn.sigmoid(logits).astype(recon_ref.dtype)


def pack_params(params):
    """Fuse mu/logvar heads into one lane-padded weight and pad w_d1's K dim."""
    (w_e1, b_e1, w_e2, b_e2,
     w_mu, b_mu, w_lv, b_lv,
     w_d1, b_d1, w_d2, b_d2, w_d3, b_d3) = params

    w_hd = jnp.zeros((HIDDEN_DIM, HEADS_DIM), jnp.float32)
    w_hd = w_hd.at[:, :LATENT_DIM].set(w_mu)
    w_hd = w_hd.at[:, LATENT_PAD:LATENT_PAD + LATENT_DIM].set(w_lv)
    b_hd = jnp.zeros((1, HEADS_DIM), jnp.float32)
    b_hd = b_hd.at[:, :LATENT_DIM].set(b_mu)
    b_hd = b_hd.at[:, LATENT_PAD:LATENT_PAD + LATENT_DIM].set(b_lv)

    w_d1_pad = jnp.zeros((LATENT_PAD, HIDDEN_DIM), jnp.float32)
    w_d1_pad = w_d1_pad.at[:LATENT_DIM, :].set(w_d1)

    return (w_e1, b_e1, w_e2, b_e2, w_hd, b_hd,
            w_d1_pad, b_d1, w_d2, b_d2, w_d3, b_d3)


@functools.partial(jax.jit, static_argnames=("block_b",))
def vae_forward(x, eps, params, block_b=256):
    B = x.shape[0]
    kparams = pack_params(params)

    # lane-pad eps to 128 (zeros in the padding lanes)
    eps_pad = jnp.zeros((B, LATENT_PAD), jnp.float32).at[:, :LATENT_DIM].set(eps)

    # batch tile: multiple of 8 sublanes; pad the batch up to a tile multiple
    TB = min(block_b, _round_up(B, 8))
    Bp = _round_up(B, TB)
    if Bp != B:
        pad = Bp - B
        x = jnp.pad(x, ((0, pad), (0, 0)))
        eps_pad = jnp.pad(eps_pad, ((0, pad), (0, 0)))

    grid = (Bp // TB,)

    def batch_spec(feat):
        return pl.BlockSpec((TB, feat), lambda i: (i, 0))

    def const_spec(p):
        # constant block index -> weights DMA'd once, stay VMEM-resident
        return pl.BlockSpec(p.shape, lambda i: (0, 0))

    in_specs = [batch_spec(INPUT_DIM), batch_spec(LATENT_PAD)]
    in_specs += [const_spec(p) for p in kparams]

    out_shapes = (
        jax.ShapeDtypeStruct((Bp, INPUT_DIM), jnp.float32),   # recon (padded B)
        jax.ShapeDtypeStruct((Bp, HEADS_DIM), jnp.float32),   # fused mu||logvar
    )
    out_specs = (batch_spec(INPUT_DIM), batch_spec(HEADS_DIM))

    recon_p, heads_p = pl.pallas_call(
        vae_kernel,
        grid=grid,
        in_specs=in_specs,
        out_specs=out_specs,
        out_shape=out_shapes,
        compiler_params=pltpu.CompilerParams(
            dimension_semantics=("parallel",),      # shard batch tiles on v7x's 2 TCs
            vmem_limit_bytes=40 << 20,              # headroom vs v7x's 64 MiB VMEM
        ),
    )(x, eps_pad, *kparams)

    recon = recon_p[:B]
    mu = heads_p[:B, :LATENT_DIM]
    logvar = heads_p[:B, LATENT_PAD:LATENT_PAD + LATENT_DIM]
    return recon, mu, logvar


def init_linear(key, fan_in, fan_out):
    """PyTorch nn.Linear default init (uniform +/- 1/sqrt(fan_in)),
    stored transposed as (in, out) for x @ W."""
    kw, kb = jax.random.split(key)
    bound = 1.0 / jnp.sqrt(fan_in)
    w = jax.random.uniform(kw, (fan_in, fan_out), jnp.float32, -bound, bound)
    b = jax.random.uniform(kb, (1, fan_out), jnp.float32, -bound, bound)
    return w, b


def init_params(key):
    keys = jax.random.split(key, 7)
    w_e1, b_e1 = init_linear(keys[0], INPUT_DIM, HIDDEN_DIM)
    w_e2, b_e2 = init_linear(keys[1], HIDDEN_DIM, HIDDEN_DIM)
    w_mu, b_mu = init_linear(keys[2], HIDDEN_DIM, LATENT_DIM)
    w_lv, b_lv = init_linear(keys[3], HIDDEN_DIM, LATENT_DIM)
    w_d1, b_d1 = init_linear(keys[4], LATENT_DIM, HIDDEN_DIM)
    w_d2, b_d2 = init_linear(keys[5], HIDDEN_DIM, HIDDEN_DIM)
    w_d3, b_d3 = init_linear(keys[6], HIDDEN_DIM, INPUT_DIM)
    return (
        w_e1, b_e1, w_e2, b_e2,
        w_mu, b_mu, w_lv, b_lv,
        w_d1, b_d1, w_d2, b_d2, w_d3, b_d3,
    )


def vae_reference(x, eps, params):
    """Pure-JAX reference (unfused, unpadded) for correctness checking."""
    (w_e1, b_e1, w_e2, b_e2,
     w_mu, b_mu, w_lv, b_lv,
     w_d1, b_d1, w_d2, b_d2, w_d3, b_d3) = params
    h = jnp.maximum(x @ w_e1 + b_e1, 0.0)
    h = jnp.maximum(h @ w_e2 + b_e2, 0.0)
    mu = h @ w_mu + b_mu
    logvar = h @ w_lv + b_lv
    z = mu + eps * jnp.exp(0.5 * logvar)
    d = jnp.maximum(z @ w_d1 + b_d1, 0.0)
    d = jnp.maximum(d @ w_d2 + b_d2, 0.0)
    recon = jax.nn.sigmoid(d @ w_d3 + b_d3)
    return recon, mu, logvar


if __name__ == "__main__":
    key = jax.random.PRNGKey(0)
    k_x, k_eps, k_params = jax.random.split(key, 3)

    # Small demo batch; block_b=32 exercises a multi-step batch grid with
    # VMEM-resident weights.  (For real workloads use block_b=256+ on v6e/v7x.)
    B = 64
    x = jax.random.uniform(k_x, (B, INPUT_DIM), jnp.float32)        # "images" in [0,1)
    eps = jax.random.normal(k_eps, (B, LATENT_DIM), jnp.float32)    # reparam noise
    params = init_params(k_params)

    # TODO(synk): eps is sampled host-side with a deterministic PRNGKey instead
    # of torch.randn_like inside forward (in-kernel pltpu.prng would be non-
    # reproducible against the pure-JAX reference).
    recon, mu, logvar = vae_forward(x, eps, params, block_b=32)
    jax.block_until_ready((recon, mu, logvar))

    # sanity check against pure-JAX reference
    r_ref, mu_ref, lv_ref = vae_reference(x, eps, params)
    assert recon.shape == (B, INPUT_DIM)
    assert mu.shape == (B, LATENT_DIM) and logvar.shape == (B, LATENT_DIM)
    assert jnp.allclose(recon, r_ref, atol=1e-5), "recon mismatch"
    assert jnp.allclose(mu, mu_ref, atol=1e-5), "mu mismatch"
    assert jnp.allclose(logvar, lv_ref, atol=1e-5), "logvar mismatch"

    print("KERNEL_OK")
</pallas_src>

<mosaic_0001>
module attributes {stable_mosaic.version = 11 : i64} {
  func.func @vae_kernel(%arg0: i32, %arg1: memref<32x784xf32, #tpu.memory_space<vmem>>, %arg2: memref<32x128xf32, #tpu.memory_space<vmem>>, %arg3: memref<784x400xf32, #tpu.memory_space<vmem>>, %arg4: memref<1x400xf32, #tpu.memory_space<vmem>>, %arg5: memref<400x400xf32, #tpu.memory_space<vmem>>, %arg6: memref<1x400xf32, #tpu.memory_space<vmem>>, %arg7: memref<400x256xf32, #tpu.memory_space<vmem>>, %arg8: memref<1x256xf32, #tpu.memory_space<vmem>>, %arg9: memref<128x400xf32, #tpu.memory_space<vmem>>, %arg10: memref<1x400xf32, #tpu.memory_space<vmem>>, %arg11: memref<400x400xf32, #tpu.memory_space<vmem>>, %arg12: memref<1x400xf32, #tpu.memory_space<vmem>>, %arg13: memref<400x784xf32, #tpu.memory_space<vmem>>, %arg14: memref<1x784xf32, #tpu.memory_space<vmem>>, %arg15: memref<32x784xf32, #tpu.memory_space<vmem>>, %arg16: memref<32x256xf32, #tpu.memory_space<vmem>>) attributes {dimension_semantics = [#tpu.dimension_semantics<parallel>], iteration_bounds = array<i64: 2>, scalar_prefetch = 0 : i64, scratch_operands = 0 : i64, tpu.core_type = #tpu.core_type<tc>, window_params = [{transform_indices = @transform_0, window_bounds = array<i64: 32, 784>}, {transform_indices = @transform_1, window_bounds = array<i64: 32, 128>}, {pipeline_mode = #tpu.pipeline_mode<synchronous>, transform_indices = @transform_2, window_bounds = array<i64: 784, 400>}, {pipeline_mode = #tpu.pipeline_mode<synchronous>, transform_indices = @transform_3, window_bounds = array<i64: 1, 400>}, {pipeline_mode = #tpu.pipeline_mode<synchronous>, transform_indices = @transform_4, window_bounds = array<i64: 400, 400>}, {pipeline_mode = #tpu.pipeline_mode<synchronous>, transform_indices = @transform_5, window_bounds = array<i64: 1, 400>}, {pipeline_mode = #tpu.pipeline_mode<synchronous>, transform_indices = @transform_6, window_bounds = array<i64: 400, 256>}, {pipeline_mode = #tpu.pipeline_mode<synchronous>, transform_indices = @transform_7, window_bounds = array<i64: 1, 256>}, {pipeline_mode = #tpu.pipeline_mode<synchronous>, transform_indices = @transform_8, window_bounds = array<i64: 128, 400>}, {pipeline_mode = #tpu.pipeline_mode<synchronous>, transform_indices = @transform_9, window_bounds = array<i64: 1, 400>}, {pipeline_mode = #tpu.pipeline_mode<synchronous>, transform_indices = @transform_10, window_bounds = array<i64: 400, 400>}, {pipeline_mode = #tpu.pipeline_mode<synchronous>, transform_indices = @transform_11, window_bounds = array<i64: 1, 400>}, {pipeline_mode = #tpu.pipeline_mode<synchronous>, transform_indices = @transform_12, window_bounds = array<i64: 400, 784>}, {pipeline_mode = #tpu.pipeline_mode<synchronous>, transform_indices = @transform_13, window_bounds = array<i64: 1, 784>}, {transform_indices = @transform_14, window_bounds = array<i64: 32, 784>}, {transform_indices = @transform_15, window_bounds = array<i64: 32, 256>}]} {
    %c0 = arith.constant 0 : index
    %c0_0 = arith.constant 0 : index
    %0 = vector.load %arg1[%c0, %c0_0] : memref<32x784xf32, #tpu.memory_space<vmem>>, vector<32x784xf32>
    %c0_1 = arith.constant 0 : index
    %c0_2 = arith.constant 0 : index
    %1 = vector.load %arg3[%c0_1, %c0_2] : memref<784x400xf32, #tpu.memory_space<vmem>>, vector<784x400xf32>
    %cst = arith.constant dense<0.000000e+00> : vector<32x400xf32>
    %2 = tpu.matmul %0, %1, %cst {dimension_numbers = #tpu.dot_dimension_numbers<[1], [0], [0], [1], [0, 0, 1, 1], [], []>} : vector<32x784xf32>, vector<784x400xf32>, vector<32x400xf32> -> vector<32x400xf32>
    %c0_3 = arith.constant 0 : index
    %c0_4 = arith.constant 0 : index
    %3 = vector.load %arg4[%c0_3, %c0_4] : memref<1x400xf32, #tpu.memory_space<vmem>>, vector<1x400xf32>
    %4 = vector.broadcast %3 : vector<1x400xf32> to vector<32x400xf32>
    %5 = arith.addf %2, %4 : vector<32x400xf32>
    %cst_5 = arith.constant 0.000000e+00 : f32
    %6 = vector.broadcast %cst_5 : f32 to vector<32x400xf32>
    %7 = arith.maximumf %5, %6 : vector<32x400xf32>
    %c0_6 = arith.constant 0 : index
    %c0_7 = arith.constant 0 : index
    %8 = vector.load %arg5[%c0_6, %c0_7] : memref<400x400xf32, #tpu.memory_space<vmem>>, vector<400x400xf32>
    %cst_8 = arith.constant dense<0.000000e+00> : vector<32x400xf32>
    %9 = tpu.matmul %7, %8, %cst_8 {dimension_numbers = #tpu.dot_dimension_numbers<[1], [0], [0], [1], [0, 0, 1, 1], [], []>} : vector<32x400xf32>, vector<400x400xf32>, vector<32x400xf32> -> vector<32x400xf32>
    %c0_9 = arith.constant 0 : index
    %c0_10 = arith.constant 0 : index
    %10 = vector.load %arg6[%c0_9, %c0_10] : memref<1x400xf32, #tpu.memory_space<vmem>>, vector<1x400xf32>
    %11 = vector.broadcast %10 : vector<1x400xf32> to vector<32x400xf32>
    %12 = arith.addf %9, %11 : vector<32x400xf32>
    %cst_11 = arith.constant 0.000000e+00 : f32
    %13 = vector.broadcast %cst_11 : f32 to vector<32x400xf32>
    %14 = arith.maximumf %12, %13 : vector<32x400xf32>
    %c0_12 = arith.constant 0 : index
    %c0_13 = arith.constant 0 : index
    %15 = vector.load %arg7[%c0_12, %c0_13] : memref<400x256xf32, #tpu.memory_space<vmem>>, vector<400x256xf32>
    %cst_14 = arith.constant dense<0.000000e+00> : vector<32x256xf32>
    %16 = tpu.matmul %14, %15, %cst_14 {dimension_numbers = #tpu.dot_dimension_numbers<[1], [0], [0], [1], [0, 0, 1, 1], [], []>} : vector<32x400xf32>, vector<400x256xf32>, vector<32x256xf32> -> vector<32x256xf32>
    %c0_15 = arith.constant 0 : index
    %c0_16 = arith.constant 0 : index
    %17 = vector.load %arg8[%c0_15, %c0_16] : memref<1x256xf32, #tpu.memory_space<vmem>>, vector<1x256xf32>
    %18 = vector.broadcast %17 : vector<1x256xf32> to vector<32x256xf32>
    %19 = arith.addf %16, %18 : vector<32x256xf32>
    %c0_17 = arith.constant 0 : index
    %c0_18 = arith.constant 0 : index
    %20 = vector.load %arg16[%c0_17, %c0_18] : memref<32x256xf32, #tpu.memory_space<vmem>>, vector<32x256xf32>
    tpu.vector_store %arg16[%c0_17, %c0_18], %19 {strides = array<i32>} : memref<32x256xf32, #tpu.memory_space<vmem>>, vector<32x256xf32>,
    %21 = vector.extract_strided_slice %19 {offsets = [0, 0], sizes = [32, 128], strides = [1, 1]} : vector<32x256xf32> to vector<32x128xf32>
    %22 = vector.extract_strided_slice %19 {offsets = [0, 128], sizes = [32, 128], strides = [1, 1]} : vector<32x256xf32> to vector<32x128xf32>
    %c0_19 = arith.constant 0 : index
    %c0_20 = arith.constant 0 : index
    %23 = vector.load %arg2[%c0_19, %c0_20] : memref<32x128xf32, #tpu.memory_space<vmem>>, vector<32x128xf32>
    %cst_21 = arith.constant 5.000000e-01 : f32
    %24 = vector.broadcast %cst_21 : f32 to vector<32x128xf32>
    %25 = arith.mulf %24, %22 : vector<32x128xf32>
    %26 = math.exp %25 : vector<32x128xf32>
    %27 = arith.mulf %23, %26 : vector<32x128xf32>
    %28 = arith.addf %21, %27 : vector<32x128xf32>
    %c0_22 = arith.constant 0 : index
    %c0_23 = arith.constant 0 : index
    %29 = vector.load %arg9[%c0_22, %c0_23] : memref<128x400xf32, #tpu.memory_space<vmem>>, vector<128x400xf32>
    %cst_24 = arith.constant dense<0.000000e+00> : vector<32x400xf32>
    %30 = tpu.matmul %28, %29, %cst_24 {dimension_numbers = #tpu.dot_dimension_numbers<[1], [0], [0], [1], [0, 0, 1, 1], [], []>} : vector<32x128xf32>, vector<128x400xf32>, vector<32x400xf32> -> vector<32x400xf32>
    %c0_25 = arith.constant 0 : index
    %c0_26 = arith.constant 0 : index
    %31 = vector.load %arg10[%c0_25, %c0_26] : memref<1x400xf32, #tpu.memory_space<vmem>>, vector<1x400xf32>
    %32 = vector.broadcast %31 : vector<1x400xf32> to vector<32x400xf32>
    %33 = arith.addf %30, %32 : vector<32x400xf32>
    %cst_27 = arith.constant 0.000000e+00 : f32
    %34 = vector.broadcast %cst_27 : f32 to vector<32x400xf32>
    %35 = arith.maximumf %33, %34 : vector<32x400xf32>
    %c0_28 = arith.constant 0 : index
    %c0_29 = arith.constant 0 : index
    %36 = vector.load %arg11[%c0_28, %c0_29] : memref<400x400xf32, #tpu.memory_space<vmem>>, vector<400x400xf32>
    %cst_30 = arith.constant dense<0.000000e+00> : vector<32x400xf32>
    %37 = tpu.matmul %35, %36, %cst_30 {dimension_numbers = #tpu.dot_dimension_numbers<[1], [0], [0], [1], [0, 0, 1, 1], [], []>} : vector<32x400xf32>, vector<400x400xf32>, vector<32x400xf32> -> vector<32x400xf32>
    %c0_31 = arith.constant 0 : index
    %c0_32 = arith.constant 0 : index
    %38 = vector.load %arg12[%c0_31, %c0_32] : memref<1x400xf32, #tpu.memory_space<vmem>>, vector<1x400xf32>
    %39 = vector.broadcast %38 : vector<1x400xf32> to vector<32x400xf32>
    %40 = arith.addf %37, %39 : vector<32x400xf32>
    %cst_33 = arith.constant 0.000000e+00 : f32
    %41 = vector.broadcast %cst_33 : f32 to vector<32x400xf32>
    %42 = arith.maximumf %40, %41 : vector<32x400xf32>
    %c0_34 = arith.constant 0 : index
    %c0_35 = arith.constant 0 : index
    %43 = vector.load %arg13[%c0_34, %c0_35] : memref<400x784xf32, #tpu.memory_space<vmem>>, vector<400x784xf32>
    %cst_36 = arith.constant dense<0.000000e+00> : vector<32x784xf32>
    %44 = tpu.matmul %42, %43, %cst_36 {dimension_numbers = #tpu.dot_dimension_numbers<[1], [0], [0], [1], [0, 0, 1, 1], [], []>} : vector<32x400xf32>, vector<400x784xf32>, vector<32x784xf32> -> vector<32x784xf32>
    %c0_37 = arith.constant 0 : index
    %c0_38 = arith.constant 0 : index
    %45 = vector.load %arg14[%c0_37, %c0_38] : memref<1x784xf32, #tpu.memory_space<vmem>>, vector<1x784xf32>
    %46 = vector.broadcast %45 : vector<1x784xf32> to vector<32x784xf32>
    %47 = arith.addf %44, %46 : vector<32x784xf32>
    %48 = arith.negf %47 : vector<32x784xf32>
    %49 = math.exp %48 : vector<32x784xf32>
    %cst_39 = arith.constant 1.000000e+00 : f32
    %50 = vector.broadcast %cst_39 : f32 to vector<32x784xf32>
    %51 = arith.addf %50, %49 : vector<32x784xf32>
    %52 = arith.divf %50, %51 : vector<32x784xf32>
    %c0_40 = arith.constant 0 : index
    %c0_41 = arith.constant 0 : index
    %53 = vector.load %arg15[%c0_40, %c0_41] : memref<32x784xf32, #tpu.memory_space<vmem>>, vector<32x784xf32>
    tpu.vector_store %arg15[%c0_40, %c0_41], %52 {strides = array<i32>} : memref<32x784xf32, #tpu.memory_space<vmem>>, vector<32x784xf32>,
    return
  }
  func.func @transform_0(%arg0: i32) -> (i32, i32) {
    %c0_i32 = arith.constant 0 : i32
    %c0_i32_0 = arith.constant 0 : i32
    return %arg0, %c0_i32 : i32, i32
  }
  func.func @transform_1(%arg0: i32) -> (i32, i32) {
    %c0_i32 = arith.constant 0 : i32
    %c0_i32_0 = arith.constant 0 : i32
    return %arg0, %c0_i32 : i32, i32
  }
  func.func @transform_2(%arg0: i32) -> (i32, i32) {
    %c0_i32 = arith.constant 0 : i32
    %c0_i32_0 = arith.constant 0 : i32
    %c0_i32_1 = arith.constant 0 : i32
    return %c0_i32, %c0_i32_0 : i32, i32
  }
  func.func @transform_3(%arg0: i32) -> (i32, i32) {
    %c0_i32 = arith.constant 0 : i32
    %c0_i32_0 = arith.constant 0 : i32
    %c0_i32_1 = arith.constant 0 : i32
    return %c0_i32, %c0_i32_0 : i32, i32
  }
  func.func @transform_4(%arg0: i32) -> (i32, i32) {
    %c0_i32 = arith.constant 0 : i32
    %c0_i32_0 = arith.constant 0 : i32
    %c0_i32_1 = arith.constant 0 : i32
    return %c0_i32, %c0_i32_0 : i32, i32
  }
  func.func @transform_5(%arg0: i32) -> (i32, i32) {
    %c0_i32 = arith.constant 0 : i32
    %c0_i32_0 = arith.constant 0 : i32
    %c0_i32_1 = arith.constant 0 : i32
    return %c0_i32, %c0_i32_0 : i32, i32
  }
  func.func @transform_6(%arg0: i32) -> (i32, i32) {
    %c0_i32 = arith.constant 0 : i32
    %c0_i32_0 = arith.constant 0 : i32
    %c0_i32_1 = arith.constant 0 : i32
    return %c0_i32, %c0_i32_0 : i32, i32
  }
  func.func @transform_7(%arg0: i32) -> (i32, i32) {
    %c0_i32 = arith.constant 0 : i32
    %c0_i32_0 = arith.constant 0 : i32
    %c0_i32_1 = arith.constant 0 : i32
    return %c0_i32, %c0_i32_0 : i32, i32
  }
  func.func @transform_8(%arg0: i32) -> (i32, i32) {
    %c0_i32 = arith.constant 0 : i32
    %c0_i32_0 = arith.constant 0 : i32
    %c0_i32_1 = arith.constant 0 : i32
    return %c0_i32, %c0_i32_0 : i32, i32
  }
  func.func @transform_9(%arg0: i32) -> (i32, i32) {
    %c0_i32 = arith.constant 0 : i32
    %c0_i32_0 = arith.constant 0 : i32
    %c0_i32_1 = arith.constant 0 : i32
    return %c0_i32, %c0_i32_0 : i32, i32
  }
  func.func @transform_10(%arg0: i32) -> (i32, i32) {
    %c0_i32 = arith.constant 0 : i32
    %c0_i32_0 = arith.constant 0 : i32
    %c0_i32_1 = arith.constant 0 : i32
    return %c0_i32, %c0_i32_0 : i32, i32
  }
  func.func @transform_11(%arg0: i32) -> (i32, i32) {
    %c0_i32 = arith.constant 0 : i32
    %c0_i32_0 = arith.constant 0 : i32
    %c0_i32_1 = arith.constant 0 : i32
    return %c0_i32, %c0_i32_0 : i32, i32
  }
  func.func @transform_12(%arg0: i32) -> (i32, i32) {
    %c0_i32 = arith.constant 0 : i32
    %c0_i32_0 = arith.constant 0 : i32
    %c0_i32_1 = arith.constant 0 : i32
    return %c0_i32, %c0_i32_0 : i32, i32
  }
  func.func @transform_13(%arg0: i32) -> (i32, i32) {
    %c0_i32 = arith.constant 0 : i32
    %c0_i32_0 = arith.constant 0 : i32
    %c0_i32_1 = arith.constant 0 : i32
    return %c0_i32, %c0_i32_0 : i32, i32
  }
  func.func @transform_14(%arg0: i32) -> (i32, i32) {
    %c0_i32 = arith.constant 0 : i32
    %c0_i32_0 = arith.constant 0 : i32
    return %arg0, %c0_i32 : i32, i32
  }
  func.func @transform_15(%arg0: i32) -> (i32, i32) {
    %c0_i32 = arith.constant 0 : i32
    %c0_i32_0 = arith.constant 0 : i32
    return %arg0, %c0_i32 : i32, i32
  }
}

</mosaic_0001>

<bundles_post_ra>
// kernel: vae_forward.1
= control target key start
LH: loop header
LB: loop body
LE: loop exit
PB: predicated region body
PF: predicated region fallthrough
CT: control target
= control target key end

     0   :  { %s11481_s0 = inlined_call_operand.vmem [shape: f32[64,784], index: 0, kind: input, shape index: {}]   ;;  %s11482_s1 = inlined_call_operand.vmem [shape: f32[64,128], index: 1, kind: input, shape index: {}]   ;;  %s11483_s2 = inlined_call_operand.vmem [shape: f32[784,400], index: 2, kind: input, shape index: {}]   ;;  %s11484_s3 = inlined_call_operand.vmem [shape: f32[1,400], index: 3, kind: input, shape index: {}]   ;;  %s11485_s4 = inlined_call_operand.vmem [shape: f32[400,400], index: 4, kind: input, shape index: {}]   ;;  %s11486_s5 = inlined_call_operand.vmem [shape: f32[1,400], index: 5, kind: input, shape index: {}]   ;;  %s11487_s6 = inlined_call_operand.vmem [shape: f32[400,256], index: 6, kind: input, shape index: {}]   ;;  %s11488_s7 = inlined_call_operand.vmem [shape: f32[1,256], index: 7, kind: input, shape index: {}]   ;;  %s11489_s8 = inlined_call_operand.vmem [shape: f32[128,400], index: 8, kind: input, shape index: {}]   ;;  %s11490_s9 = inlined_call_operand.vmem [shape: f32[1,400], index: 9, kind: input, shape index: {}]   ;;  %s11491_s10 = inlined_call_operand.vmem [shape: f32[400,400], index: 10, kind: input, shape index: {}]   ;;  %s11492_s11 = inlined_call_operand.vmem [shape: f32[1,400], index: 11, kind: input, shape index: {}]   ;;  %s11493_s12 = inlined_call_operand.vmem [shape: f32[400,784], index: 12, kind: input, shape index: {}]   ;;  %s11494_s13 = inlined_call_operand.vmem [shape: f32[1,784], index: 13, kind: input, shape index: {}]   ;;  %s11495_s14 = inlined_call_operand.hbm [shape: f32[64,784], index: 14, kind: output, shape index: {0}]   ;;  %s11496_s15 = inlined_call_operand.vmem [shape: f32[64,256], index: 15, kind: output, shape index: {1}]  }
   0x1   :  { %11506 = sst [smem:[#allocation12_spill]] %s11495_s14 }
   0x2   :  { %21 = vsyncpa [#allocation3], 0 }
   0x3   :  { %23 = vsyncpa [#allocation3 + $0x1], 0  ;;  %s6925_s18 = smov 0   ;;  %s6927_s19 = smov 0  }
   0x4   :  { %s6929_s20 = smov 0   ;;  %s6931_s21 = smov 0  }
   0x5 LB: > { %11507 = sst [smem:[#allocation5_spill]] %s6826_s18  ;;  %s6946_s22 = sadd.s32 4294967295, %s6838_s21   ;;  %s6838_s21 = sphi %s6931_s21, %s11522_s21   ;;  %s6834_s20 = sphi %s6929_s20, %s11524_s20   ;;  %s6830_s19 = sphi %s6927_s19, %s11526_s19   ;;  %s6826_s18 = sphi %s6925_s18, %s11525_s18  }
   0x6   : > { %11508 = sst [smem:[#allocation6_spill]] %s6834_s20  ;;  %s4970_s23 = sadd.s32 4294967294, %s6838_s21  }
   0x7   : > { %11509 = sst [smem:[#allocation7_spill]] %s6838_s21  ;;  %s6950_s24 = sadd.s32 1, %s6838_s21  }
   0x8   : > { %11510 = sst [smem:[#allocation8_spill]] %s6950_s24  ;;  %s340_s25 = sadd.s32 1, %s6834_s20 }
   0x9   : > { %s337_s26 = ssub.s32 %s6838_s21, %s6950_s24  ;;  %p350_p0 = scmp.ne.s32.totalorder %s6834_s20, %s6830_s19 }
   0xa   : > { %p338_p1 = scmp.eq.s32.totalorder %s337_s26, 0  ;;  %p351_p2 = scmp.eq.s32.totalorder %s6946_s22, 1 }
   0xb   : > { %p356_p3 = scmp.ne.s32.totalorder %s6830_s19, %s6826_s18  ;;  %p357_p4 = scmp.eq.s32.totalorder %s4970_s23, 1 }
   0xc   : > { %s6961_s27 = scalar_select %p338_p1, %s6834_s20, %s340_s25  }
   0xd   : > { %p6963_p5 = por %p351_p2, %p350_p0  ;;  %p6967_p6 = por %p357_p4, %p356_p3 }
   0xe   : > { %11511 = sst [smem:[#allocation9_spill]] %s6961_s27  ;;  %p4973_p7 = scmp.ge.s32.totalorder %s6838_s21, 1 }
   0xf   : > { %s11512_s28 = scalar_select %p6963_p5, 1, 0 }
  0x10   : > { %s11514_s29 = scalar_select %p6967_p6, 1, 0 }
  0x11   : > { %11513 = sst [smem:[#allocation10_spill]] %s11512_s28  ;;  %p456_p8 = scmp.lt.s32.totalorder %s6838_s21, 3 }
  0x12   : > { %11515 = sst [smem:[#allocation11_spill]] %s11514_s29 }
  0x13   : > { %p457_p9 = pnand %p4973_p7, %p456_p8 }
  0x14   : > { %v566_v0 = vld [vmem:[%s11483_s2 + $0x8] sm:$0xff] (!%p457_p9)  ;;  %v568_v2 = vld [vmem:[%s11483_s2 + $0x18] sm:$0xff] (!%p457_p9)  ;;  %v565_v5 = vld [vmem:[%s11483_s2] sm:$0xff] (!%p457_p9)  ;;  %s4974_s20 = sshll.u32 (!%p457_p9), %s6946_s22, 2  ;;  %vm979_vm0 = vcmask (!%p457_p9), 130048   ;;  %s505_s24 = sand.u32 (!%p457_p9), 1, %s6830_s19  }
  0x15   : > { %460 = sbr.rel (%p457_p9) target bundleno = 1854 (0x73e), region = 76  ;;  %v570_v1 = vld [vmem:[%s11483_s2 + $0x28] sm:$0xff] (!%p457_p9)  ;;  %v572_v4 = vld [vmem:[%s11483_s2 + $0x38] sm:$0xff] (!%p457_p9)  ;;  %v569_v6 = vld [vmem:[%s11483_s2 + $0x20] sm:$0xff] (!%p457_p9)  ;;  %p7180_p10 = scmp.lt.s32.totalorder (!%p457_p9), %s4974_s20, 7 }
  0x16   : > { %v5103_v3 = vpack.c.bf16 (!%p457_p9), %v570_v1, %v566_v0  ;;  %v5299_v7 = vpack.c.bf16 (!%p457_p9), %v572_v4, %v568_v2  ;;  %v5105_v8 = vpack.c.bf16 (!%p457_p9), %v569_v6, %v565_v5  ;;  %v567_v9 = vld [vmem:[%s11483_s2 + $0x10] sm:$0xff] (!%p457_p9)  ;;  %v574_v11 = vld [vmem:[%s11483_s2 + $0x48] sm:$0xff] (!%p457_p9)  ;;  %v576_v14 = vld [vmem:[%s11483_s2 + $0x58] sm:$0xff] (!%p457_p9)  ;;  %s6610_s18 = smul.u32 (!%p457_p9), 224, %s505_s24  ;;  %s11440_s28 = scalar_lea.sflag (!%p457_p9), [#allocation3], %s505_s24 }
  0x17   : > { %v571_v10 = vld [vmem:[%s11483_s2 + $0x30] sm:$0xff] (!%p457_p9)  ;;  %v578_v13 = vld [vmem:[%s11483_s2 + $0x68] sm:$0xff] (!%p457_p9)  ;;  %v580_v15 = vld [vmem:[%s11483_s2 + $0x78] sm:$0xff] (!%p457_p9)  ;;  %s6612_s30 = smul.u32 (!%p457_p9), 3584, %s6946_s22  ;;  %s6842_s22 = smov (!%p457_p9), [#allocation2]  }
  0x18   : > { %5104 = vmatprep.subr.bf16.mxu0 (!%p457_p9), %v5103_v3  ;;  %v5301_v12 = vpack.c.bf16 (!%p457_p9), %v571_v10, %v567_v9  ;;  %5300 = vmatprep.subr.bf16.mxu1 (!%p457_p9), %v5299_v7  ;;  %v5107_v16 = vpack.c.bf16 (!%p457_p9), %v578_v13, %v574_v11  ;;  %v5303_v17 = vpack.c.bf16 (!%p457_p9), %v580_v15, %v576_v14  ;;  %v573_v18 = vld [vmem:[%s11483_s2 + $0x40] sm:$0xff] (!%p457_p9)  ;;  %v575_v20 = vld [vmem:[%s11483_s2 + $0x50] sm:$0xff] (!%p457_p9)  ;;  %v582_v23 = vld [vmem:[%s11483_s2 + $0x88] sm:$0xff] (!%p457_p9) }
  0x19   : > { %5106 = vmatpush1.bf16.msra.mxu0 (!%p457_p9), %v5105_v8  ;;  %v577_v19 = vld [vmem:[%s11483_s2 + $0x60] sm:$0xff] (!%p457_p9)  ;;  %v579_v22 = vld [vmem:[%s11483_s2 + $0x70] sm:$0xff] (!%p457_p9)  ;;  %v586_v24 = vld [vmem:[%s11483_s2 + $0xa8] sm:$0xff] (!%p457_p9) }
  0x1a   : > { %5302 = vmatpush1.bf16.msra.mxu1 (!%p457_p9), %v5301_v12  ;;  %v5109_v21 = vpack.c.bf16 (!%p457_p9), %v577_v19, %v573_v18  ;;  %5108 = vmatprep.subr.bf16.mxu0 (!%p457_p9), %v5107_v16  ;;  %v5305_v25 = vpack.c.bf16 (!%p457_p9), %v579_v22, %v575_v20  ;;  %v5111_v26 = vpack.c.bf16 (!%p457_p9), %v586_v24, %v582_v23  ;;  %v584_v27 = vld [vmem:[%s11483_s2 + $0x98] sm:$0xff] (!%p457_p9)  ;;  %v581_v29 = vld [vmem:[%s11483_s2 + $0x80] sm:$0xff] (!%p457_p9)  ;;  %v583_v32 = vld [vmem:[%s11483_s2 + $0x90] sm:$0xff] (!%p457_p9) }
  0x1b   : > { %5304 = vmatprep.subr.bf16.mxu1 (!%p457_p9), %v5303_v17  ;;  %v588_v28 = vld [vmem:[%s11483_s2 + $0xb8] sm:$0xff] (!%p457_p9)  ;;  %v585_v31 = vld [vmem:[%s11483_s2 + $0xa0] sm:$0xff] (!%p457_p9)  ;;  %v587_v33 = vld [vmem:[%s11483_s2 + $0xb0] sm:$0xff] (!%p457_p9) }
  0x1c   : > { %v5307_v30 = vpack.c.bf16 %v588_v28, %v584_v27  ;;  %v5113_v34 = vpack.c.bf16 %v585_v31, %v581_v29  ;;  %v590_v35 = vld [vmem:[%s11483_s2 + $0xc8] sm:$0xff]  ;;  %v592_v37 = vld [vmem:[%s11483_s2 + $0xd8] sm:$0xff]  ;;  %v5309_v38 = vpack.c.bf16 %v587_v33, %v583_v32  ;;  %v589_v41 = vld [vmem:[%s11483_s2 + $0xc0] sm:$0xff]  ;;  %s11528_s20 = smov (!%p7180_p10, %s4974_s20), 7 }
  0x1d   : > { %5110 = vmatpush1.bf16.msra.mxu0 %v5109_v21  ;;  %v594_v36 = vld [vmem:[%s11483_s2 + $0xe8] sm:$0xff]  ;;  %v596_v40 = vld [vmem:[%s11483_s2 + $0xf8] sm:$0xff]  ;;  %v593_v42 = vld [vmem:[%s11483_s2 + $0xe0] sm:$0xff]  ;;  %s6611_s16 = smul.u32 56, %s11528_s20  ;;  %s5058_s14 = sshll.u32 %s11528_s20, 4 }
  0x1e   : > { %5306 = vmatpush1.bf16.msra.mxu1 %v5305_v25  ;;  %5112 = vmatprep.subr.bf16.mxu0 %v5111_v26  ;;  %v5115_v39 = vpack.c.bf16 %v594_v36, %v590_v35  ;;  %v5311_v43 = vpack.c.bf16 %v596_v40, %v592_v37  ;;  %v591_v44 = vld [vmem:[%s11483_s2 + $0xd0] sm:$0xff]  ;;  %v598_v46 = vld [vmem:[%s11483_s2 + $0x108] sm:$0xff]  ;;  %v600_v48 = vld [vmem:[%s11483_s2 + $0x118] sm:$0xff]  ;;  %v5117_v50 = vpack.c.bf16 %v593_v42, %v589_v41  ;;  %s9525_s25 = scalar_lea.vmem %s11496_s15, %s5058_s14  ;;  %s4977_s27 = sshll.u32 %s11528_s20, 3 }
  0x1f   : > { %5308 = vmatprep.subr.bf16.mxu1 %v5307_v30  ;;  %v595_v45 = vld [vmem:[%s11483_s2 + $0xf0] sm:$0xff]  ;;  %v602_v47 = vld [vmem:[%s11483_s2 + $0x128] sm:$0xff]  ;;  %v604_v49 = vld [vmem:[%s11483_s2 + $0x138] sm:$0xff]  ;;  %s7266_s29 = scalar_lea.vmem %s11481_s0, %s6611_s16  ;;  %s9537_s26 = scalar_lea.vmem %s11482_s1, %s4977_s27 }
  0x20   : > { %v5313_v51 = vpack.c.bf16 %v595_v45, %v591_v44  ;;  %v5119_v52 = vpack.c.bf16 %v602_v47, %v598_v46  ;;  %v597_v53 = vld [vmem:[%s11483_s2 + $0x100] sm:$0xff]  ;;  %v599_v55 = vld [vmem:[%s11483_s2 + $0x110] sm:$0xff]  ;;  %v5315_v56 = vpack.c.bf16 %v604_v49, %v600_v48  ;;  %v606_v58 = vld [vmem:[%s11483_s2 + $0x148] sm:$0xff]  ;;  %s11389_s20 = scalar_lea.vmem [#allocation2], %s6610_s18 }
  0x21   : > { %5114 = vmatpush1.bf16.msra.mxu0 %v5113_v34  ;;  %v601_v54 = vld [vmem:[%s11483_s2 + $0x120] sm:$0xff]  ;;  %v603_v57 = vld [vmem:[%s11483_s2 + $0x130] sm:$0xff]  ;;  %v610_v59 = vld [vmem:[%s11483_s2 + $0x168] sm:$0xff]  ;;  %s4866_s21 = sshll.u32 %s11389_s20, 4  ;;  %s11430_s21 = int_to_ptr.vmem [resolvable:$true] %s4866_s21 }
  0x22   : > { %5310 = vmatpush1.bf16.msra.mxu1 %v5309_v38  ;;  %5116 = vmatprep.subr.bf16.mxu0 %v5115_v39  ;;  %v608_v60 = vld [vmem:[%s11483_s2 + $0x158] sm:$0xff]  ;;  %v5121_v62 = vpack.c.bf16 %v601_v54, %v597_v53  ;;  %v5317_v63 = vpack.c.bf16 %v603_v57, %v599_v55  ;;  %v5123_v0 = vpack.c.bf16 %v610_v59, %v606_v58  ;;  %v605_v1 = vld [vmem:[%s11483_s2 + $0x140] sm:$0xff]  ;;  %v607_v3 = vld [vmem:[%s11483_s2 + $0x150] sm:$0xff]  ;;  %s6776_s16 = scalar_lea.vmem %s11430_s21, 3584 }
  0x23   : > { %5312 = vmatprep.subr.bf16.mxu1 %v5311_v43  ;;  %v612_v61 = vld [vmem:[%s11483_s2 + $0x178] sm:$0xff]  ;;  %v609_v2 = vld [vmem:[%s11483_s2 + $0x160] sm:$0xff]  ;;  %v611_v5 = vld [vmem:[%s11483_s2 + $0x170] sm:$0xff]  ;;  %p6777_p11 = scmp.ne.s32.totalorder %s11430_s21, %s6776_s16 }
  0x24   : > { %v5319_v4 = vpack.c.bf16 %v612_v61, %v608_v60  ;;  %v614_v6 = vld [vmem:[%s11483_s2 + $0x188] sm:$0xff]  ;;  %v616_v8 = vld [vmem:[%s11483_s2 + $0x198] sm:$0xff]  ;;  %v5125_v10 = vpack.c.bf16 %v609_v2, %v605_v1  ;;  %v5321_v11 = vpack.c.bf16 %v611_v5, %v607_v3  ;;  %v613_v13 = vld [vmem:[%s11483_s2 + $0x180] sm:$0xff] }
  0x25   : > { %5118 = vmatpush1.bf16.msra.mxu0 %v5117_v50  ;;  %v618_v7 = vld [vmem:[%s11483_s2 + $0x1a8] sm:$0xff]  ;;  %v620_v9 = vld [vmem:[%s11483_s2 + $0x1b8] sm:$0xff]  ;;  %v617_v14 = vld [vmem:[%s11483_s2 + $0x1a0] sm:$0xff]  ;;  %p6778_p12 = pnand %p6777_p11, %p6963_p5 }
  0x26   : > { %5314 = vmatpush1.bf16.msra.mxu1 %v5313_v51  ;;  %5120 = vmatprep.subr.bf16.mxu0 %v5119_v52  ;;  %v5127_v12 = vpack.c.bf16 %v618_v7, %v614_v6  ;;  %v615_v15 = vld [vmem:[%s11483_s2 + $0x190] sm:$0xff]  ;;  %v5323_v16 = vpack.c.bf16 %v620_v9, %v616_v8  ;;  %v622_v18 = vld [vmem:[%s11483_s2 + $0x1c8] sm:$0xff]  ;;  %v624_v20 = vld [vmem:[%s11483_s2 + $0x1d8] sm:$0xff]  ;;  %v5129_v22 = vpack.c.bf16 %v617_v14, %v613_v13 }
  0x27   : > { %5316 = vmatprep.subr.bf16.mxu1 %v5315_v56  ;;  %v619_v17 = vld [vmem:[%s11483_s2 + $0x1b0] sm:$0xff]  ;;  %v626_v19 = vld [vmem:[%s11483_s2 + $0x1e8] sm:$0xff]  ;;  %v628_v21 = vld [vmem:[%s11483_s2 + $0x1f8] sm:$0xff]  ;;  %p6779_p13 = pneg %p6778_p12 }
  0x28   : > { %v5325_v23 = vpack.c.bf16 %v619_v17, %v615_v15  ;;  %v5131_v24 = vpack.c.bf16 %v626_v19, %v622_v18  ;;  %v621_v25 = vld [vmem:[%s11483_s2 + $0x1c0] sm:$0xff]  ;;  %v623_v27 = vld [vmem:[%s11483_s2 + $0x1d0] sm:$0xff]  ;;  %v5327_v28 = vpack.c.bf16 %v628_v21, %v624_v20  ;;  %v630_v30 = vld [vmem:[%s11483_s2 + $0x208] sm:$0xff] }
  0x29   : > { %5122 = vmatpush1.bf16.msra.mxu0 %v5121_v62  ;;  %v625_v26 = vld [vmem:[%s11483_s2 + $0x1e0] sm:$0xff]  ;;  %v627_v29 = vld [vmem:[%s11483_s2 + $0x1f0] sm:$0xff]  ;;  %v634_v31 = vld [vmem:[%s11483_s2 + $0x228] sm:$0xff] }
  0x2a   : > { %5318 = vmatpush1.bf16.msra.mxu1 %v5317_v63  ;;  %5124 = vmatprep.subr.bf16.mxu0 %v5123_v0  ;;  %v632_v32 = vld [vmem:[%s11483_s2 + $0x218] sm:$0xff]  ;;  %v5133_v34 = vpack.c.bf16 %v625_v26, %v621_v25  ;;  %v5329_v35 = vpack.c.bf16 %v627_v29, %v623_v27  ;;  %v5135_v36 = vpack.c.bf16 %v634_v31, %v630_v30  ;;  %v629_v37 = vld [vmem:[%s11483_s2 + $0x200] sm:$0xff]  ;;  %v631_v39 = vld [vmem:[%s11483_s2 + $0x210] sm:$0xff] }
  0x2b   : > { %5320 = vmatprep.subr.bf16.mxu1 %v5319_v4  ;;  %v636_v33 = vld [vmem:[%s11483_s2 + $0x238] sm:$0xff]  ;;  %v633_v38 = vld [vmem:[%s11483_s2 + $0x220] sm:$0xff]  ;;  %v635_v41 = vld [vmem:[%s11483_s2 + $0x230] sm:$0xff] }
  0x2c   : > { %v5331_v40 = vpack.c.bf16 %v636_v33, %v632_v32  ;;  %v638_v42 = vld [vmem:[%s11483_s2 + $0x248] sm:$0xff]  ;;  %v640_v44 = vld [vmem:[%s11483_s2 + $0x258] sm:$0xff]  ;;  %v5137_v46 = vpack.c.bf16 %v633_v38, %v629_v37  ;;  %v5333_v47 = vpack.c.bf16 %v635_v41, %v631_v39  ;;  %v637_v49 = vld [vmem:[%s11483_s2 + $0x240] sm:$0xff] }
  0x2d   : > { %5126 = vmatpush1.bf16.msra.mxu0 %v5125_v10  ;;  %v642_v43 = vld [vmem:[%s11483_s2 + $0x268] sm:$0xff]  ;;  %v644_v45 = vld [vmem:[%s11483_s2 + $0x278] sm:$0xff]  ;;  %v641_v50 = vld [vmem:[%s11483_s2 + $0x260] sm:$0xff] }
  0x2e   : > { %5322 = vmatpush1.bf16.msra.mxu1 %v5321_v11  ;;  %5128 = vmatprep.subr.bf16.mxu0 %v5127_v12  ;;  %v5139_v48 = vpack.c.bf16 %v642_v43, %v638_v42  ;;  %v639_v51 = vld [vmem:[%s11483_s2 + $0x250] sm:$0xff]  ;;  %v5335_v52 = vpack.c.bf16 %v644_v45, %v640_v44  ;;  %v646_v54 = vld [vmem:[%s11483_s2 + $0x288] sm:$0xff]  ;;  %v648_v56 = vld [vmem:[%s11483_s2 + $0x298] sm:$0xff]  ;;  %v5141_v58 = vpack.c.bf16 %v641_v50, %v637_v49 }
  0x2f   : > { %5324 = vmatprep.subr.bf16.mxu1 %v5323_v16  ;;  %v643_v53 = vld [vmem:[%s11483_s2 + $0x270] sm:$0xff]  ;;  %v650_v55 = vld [vmem:[%s11483_s2 + $0x2a8] sm:$0xff]  ;;  %v652_v57 = vld [vmem:[%s11483_s2 + $0x2b8] sm:$0xff] }
  0x30   : > { %v5337_v59 = vpack.c.bf16 %v643_v53, %v639_v51  ;;  %v5143_v60 = vpack.c.bf16 %v650_v55, %v646_v54  ;;  %v645_v61 = vld [vmem:[%s11483_s2 + $0x280] sm:$0xff]  ;;  %v647_v63 = vld [vmem:[%s11483_s2 + $0x290] sm:$0xff]  ;;  %v5339_v0 = vpack.c.bf16 %v652_v57, %v648_v56  ;;  %v654_v2 = vld [vmem:[%s11483_s2 + $0x2c8] sm:$0xff] }
  0x31   : > { %5130 = vmatpush1.bf16.msra.mxu0 %v5129_v22  ;;  %v649_v62 = vld [vmem:[%s11483_s2 + $0x2a0] sm:$0xff]  ;;  %v651_v1 = vld [vmem:[%s11483_s2 + $0x2b0] sm:$0xff]  ;;  %v658_v3 = vld [vmem:[%s11483_s2 + $0x2e8] sm:$0xff] }
  0x32   : > { %5326 = vmatpush1.bf16.msra.mxu1 %v5325_v23  ;;  %5132 = vmatprep.subr.bf16.mxu0 %v5131_v24  ;;  %v656_v4 = vld [vmem:[%s11483_s2 + $0x2d8] sm:$0xff]  ;;  %v5145_v6 = vpack.c.bf16 %v649_v62, %v645_v61  ;;  %v653_v7 = vld [vmem:[%s11483_s2 + $0x2c0] sm:$0xff]  ;;  %v5341_v8 = vpack.c.bf16 %v651_v1, %v647_v63  ;;  %v5147_v9 = vpack.c.bf16 %v658_v3, %v654_v2  ;;  %v655_v11 = vld [vmem:[%s11483_s2 + $0x2d0] sm:$0xff] }
  0x33   : > { %5328 = vmatprep.subr.bf16.mxu1 %v5327_v28  ;;  %v660_v5 = vld [vmem:[%s11483_s2 + $0x2f8] sm:$0xff]  ;;  %v657_v10 = vld [vmem:[%s11483_s2 + $0x2e0] sm:$0xff]  ;;  %v659_v12 = vld [vmem:[%s11483_s2 + $0x2f0] sm:$0xff] }
  0x34   : > { %v5343_v13 = vpack.c.bf16 %v660_v5, %v656_v4  ;;  %v662_v14 = vld [vmem:[%s11483_s2 + $0x308] sm:$0xff]  ;;  %v664_v17 = vld [vmem:[%s11483_s2 + $0x318] sm:$0xff]  ;;  %v5149_v19 = vpack.c.bf16 %v657_v10, %v653_v7  ;;  %v5345_v20 = vpack.c.bf16 %v659_v12, %v655_v11  ;;  %v661_v22 = vld [vmem:[%s11483_s2 + $0x300] sm:$0xff] }
  0x35   : > { %5134 = vmatpush1.bf16.msra.mxu0 %v5133_v34  ;;  %v666_v15 = vld [vmem:[%s11483_s2 + $0x328] sm:$0xff]  ;;  %v668_v18 = vld [vmem:[%s11483_s2 + $0x338] sm:$0xff]  ;;  %v665_v23 = vld [vmem:[%s11483_s2 + $0x320] sm:$0xff] }
  0x36   : > { %5330 = vmatpush1.bf16.msra.mxu1 %v5329_v35  ;;  %5136 = vmatprep.subr.bf16.mxu0 %v5135_v36  ;;  %v538_v16 = vld [vmem:[%s7266_s29 + $0x8] sm:$0xff]  ;;  %v5151_v21 = vpack.c.bf16 %v666_v15, %v662_v14  ;;  %v663_v24 = vld [vmem:[%s11483_s2 + $0x310] sm:$0xff]  ;;  %v5347_v25 = vpack.c.bf16 %v668_v18, %v664_v17  ;;  %v672_v29 = vld [vmem:[%s11483_s2 + $0x358] sm:$0xff]  ;;  %v5153_v31 = vpack.c.bf16 %v665_v23, %v661_v22 }
  0x37   : > { %5332 = vmatprep.subr.bf16.mxu1 %v5331_v40  ;;  %1056 = vmatprep.mubr.f32.mxu0 %v538_v16  ;;  %v667_v26 = vld [vmem:[%s11483_s2 + $0x330] sm:$0xff]  ;;  %v670_v27 = vld [vmem:[%s11483_s2 + $0x348] sm:$0xff]  ;;  %v676_v30 = vld [vmem:[%s11483_s2 + $0x378] sm:$0xff] }
  0x38   : > { %1412 = vmatprep.mubr.f32.mxu1 %v538_v16  ;;  %v674_v28 = vld [vmem:[%s11483_s2 + $0x368] sm:$0xff]  ;;  %v5349_v32 = vpack.c.bf16 %v667_v26, %v663_v24  ;;  %v669_v34 = vld [vmem:[%s11483_s2 + $0x340] sm:$0xff]  ;;  %v671_v36 = vld [vmem:[%s11483_s2 + $0x350] sm:$0xff]  ;;  %v5351_v37 = vpack.c.bf16 %v676_v30, %v672_v29 }
  0x39   : > { %5138 = vmatpush1.bf16.msra.mxu0 %v5137_v46  ;;  %v5155_v33 = vpack.c.bf16 %v674_v28, %v670_v27  ;;  %v673_v35 = vld [vmem:[%s11483_s2 + $0x360] sm:$0xff]  ;;  %v675_v38 = vld [vmem:[%s11483_s2 + $0x370] sm:$0xff]  ;;  %v678_v39 = vld [vmem:[%s11483_s2 + $0x388] sm:$0xff] }
  0x3a   : > { %5334 = vmatpush1.bf16.msra.mxu1 %v5333_v47  ;;  %5140 = vmatprep.subr.bf16.mxu0 %v5139_v48  ;;  %v682_v40 = vld [vmem:[%s11483_s2 + $0x3a8] sm:$0xff]  ;;  %v680_v41 = vld [vmem:[%s11483_s2 + $0x398] sm:$0xff]  ;;  %v5157_v43 = vpack.c.bf16 %v673_v35, %v669_v34  ;;  %v5353_v44 = vpack.c.bf16 %v675_v38, %v671_v36  ;;  %v677_v46 = vld [vmem:[%s11483_s2 + $0x380] sm:$0xff] }
  0x3b   : > { %5336 = vmatprep.subr.bf16.mxu1 %v5335_v52  ;;  %v684_v42 = vld [vmem:[%s11483_s2 + $0x3b8] sm:$0xff]  ;;  %v5159_v45 = vpack.c.bf16 %v682_v40, %v678_v39  ;;  %v681_v47 = vld [vmem:[%s11483_s2 + $0x3a0] sm:$0xff]  ;;  %v679_v48 = vld [vmem:[%s11483_s2 + $0x390] sm:$0xff] }
  0x3c   : > { %v5355_v49 = vpack.c.bf16 %v684_v42, %v680_v41  ;;  %v683_v50 = vld [vmem:[%s11483_s2 + $0x3b0] sm:$0xff]  ;;  %v686_v51 = vld [vmem:[%s11483_s2 + $0x3c8] sm:$0xff]  ;;  %v688_v53 = vld [vmem:[%s11483_s2 + $0x3d8] sm:$0xff]  ;;  %v5161_v55 = vpack.c.bf16 %v681_v47, %v677_v46 }
  0x3d   : > { %5142 = vmatpush1.bf16.msra.mxu0 %v5141_v58  ;;  %v690_v52 = vld [vmem:[%s11483_s2 + $0x3e8] sm:$0xff]  ;;  %v692_v54 = vld [vmem:[%s11483_s2 + $0x3f8] sm:$0xff]  ;;  %v5357_v56 = vpack.c.bf16 %v683_v50, %v679_v48  ;;  %v685_v58 = vld [vmem:[%s11483_s2 + $0x3c0] sm:$0xff] }
  0x3e   : > { %5338 = vmatpush1.bf16.msra.mxu1 %v5337_v59  ;;  %5144 = vmatprep.subr.bf16.mxu0 %v5143_v60  ;;  %v5163_v57 = vpack.c.bf16 %v690_v52, %v686_v51  ;;  %v689_v59 = vld [vmem:[%s11483_s2 + $0x3e0] sm:$0xff]  ;;  %v687_v60 = vld [vmem:[%s11483_s2 + $0x3d0] sm:$0xff]  ;;  %v5359_v61 = vpack.c.bf16 %v692_v54, %v688_v53  ;;  %v694_v63 = vld [vmem:[%s11483_s2 + $0x408] sm:$0xff] }
  0x3f   : > { %5340 = vmatprep.subr.bf16.mxu1 %v5339_v0  ;;  %v691_v62 = vld [vmem:[%s11483_s2 + $0x3f0] sm:$0xff]  ;;  %v698_v0 = vld [vmem:[%s11483_s2 + $0x428] sm:$0xff]  ;;  %v696_v1 = vld [vmem:[%s11483_s2 + $0x418] sm:$0xff]  ;;  %v5165_v3 = vpack.c.bf16 %v689_v59, %v685_v58 }
  0x40   : > { %v700_v2 = vld [vmem:[%s11483_s2 + $0x438] sm:$0xff]  ;;  %v5361_v4 = vpack.c.bf16 %v691_v62, %v687_v60  ;;  %v5167_v5 = vpack.c.bf16 %v698_v0, %v694_v63  ;;  %v697_v7 = vld [vmem:[%s11483_s2 + $0x420] sm:$0xff]  ;;  %v699_v10 = vld [vmem:[%s11483_s2 + $0x430] sm:$0xff] }
  0x41   : > { %5146 = vmatpush1.bf16.msra.mxu0 %v5145_v6  ;;  %v693_v6 = vld [vmem:[%s11483_s2 + $0x400] sm:$0xff]  ;;  %v702_v11 = vld [vmem:[%s11483_s2 + $0x448] sm:$0xff]  ;;  %v708_v14 = vld [vmem:[%s11483_s2 + $0x478] sm:$0xff] }
  0x42   : > { %5342 = vmatpush1.bf16.msra.mxu1 %v5341_v8  ;;  %5148 = vmatprep.subr.bf16.mxu0 %v5147_v9  ;;  %v695_v8 = vld [vmem:[%s11483_s2 + $0x410] sm:$0xff]  ;;  %v5363_v9 = vpack.c.bf16 %v700_v2, %v696_v1  ;;  %v706_v12 = vld [vmem:[%s11483_s2 + $0x468] sm:$0xff]  ;;  %v537_v15 = vld [vmem:[%s7266_s29] sm:$0xff]  ;;  %v5169_v16 = vpack.c.bf16 %v697_v7, %v693_v6 }
  0x43   : > { %5344 = vmatprep.subr.bf16.mxu1 %v5343_v13  ;;  %v704_v13 = vld [vmem:[%s11483_s2 + $0x458] sm:$0xff]  ;;  %v5365_v17 = vpack.c.bf16 %v699_v10, %v695_v8  ;;  %v5171_v18 = vpack.c.bf16 %v706_v12, %v702_v11  ;;  %v707_v23 = vld [vmem:[%s11483_s2 + $0x470] sm:$0xff]  ;;  %v710_v24 = vld [vmem:[%s11483_s2 + $0x488] sm:$0xff] }
  0x44   : > { %v5367_v22 = vpack.c.bf16 %v708_v14, %v704_v13  ;;  %v712_v26 = vld [vmem:[%s11483_s2 + $0x498] sm:$0xff]  ;;  %v715_v35 = vld [vmem:[%s11483_s2 + $0x4b0] sm:$0xff]  ;;  %v718_v36 = vld [vmem:[%s11483_s2 + $0x4c8] sm:$0xff] }
  0x45   : > { %5150 = vmatpush1.bf16.msra.mxu0 %v5149_v19  ;;  %v701_v19 = vld [vmem:[%s11483_s2 + $0x440] sm:$0xff]  ;;  %v716_v27 = vld [vmem:[%s11483_s2 + $0x4b8] sm:$0xff]  ;;  %v723_v47 = vld [vmem:[%s11483_s2 + $0x4f0] sm:$0xff] }
  0x46   : > { %5346 = vmatpush1.bf16.msra.mxu1 %v5345_v20  ;;  %5152 = vmatprep.subr.bf16.mxu0 %v5151_v21  ;;  %v705_v20 = vld [vmem:[%s11483_s2 + $0x460] sm:$0xff]  ;;  %v703_v21 = vld [vmem:[%s11483_s2 + $0x450] sm:$0xff]  ;;  %v5371_v34 = vpack.c.bf16 %v716_v27, %v712_v26  ;;  %v720_v38 = vld [vmem:[%s11483_s2 + $0x4d8] sm:$0xff] }
  0x47   : > { %5348 = vmatprep.subr.bf16.mxu1 %v5347_v25  ;;  %v714_v25 = vld [vmem:[%s11483_s2 + $0x4a8] sm:$0xff]  ;;  %v5173_v28 = vpack.c.bf16 %v705_v20, %v701_v19  ;;  %v5369_v29 = vpack.c.bf16 %v707_v23, %v703_v21  ;;  %v724_v39 = vld [vmem:[%s11483_s2 + $0x4f8] sm:$0xff]  ;;  %v725_v53 = vld [vmem:[%s11483_s2 + $0x500] sm:$0xff] }
  0x48   : > { %v5175_v30 = vpack.c.bf16 %v714_v25, %v710_v24  ;;  %v5375_v46 = vpack.c.bf16 %v724_v39, %v720_v38  ;;  %v726_v48 = vld [vmem:[%s11483_s2 + $0x508] sm:$0xff]  ;;  %v728_v50 = vld [vmem:[%s11483_s2 + $0x518] sm:$0xff]  ;;  %v731_v58 = vld [vmem:[%s11483_s2 + $0x530] sm:$0xff] }
  0x49   : > { %5154 = vmatpush1.bf16.msra.mxu0 %v5153_v31  ;;  %v709_v31 = vld [vmem:[%s11483_s2 + $0x480] sm:$0xff]  ;;  %v732_v51 = vld [vmem:[%s11483_s2 + $0x538] sm:$0xff]  ;;  %v734_v60 = vld [vmem:[%s11483_s2 + $0x548] sm:$0xff] }
  0x4a   : > { %5350 = vmatpush1.bf16.msra.mxu1 %v5349_v32  ;;  %5156 = vmatprep.subr.bf16.mxu0 %v5155_v33  ;;  %v713_v32 = vld [vmem:[%s11483_s2 + $0x4a0] sm:$0xff]  ;;  %v711_v33 = vld [vmem:[%s11483_s2 + $0x490] sm:$0xff]  ;;  %v5379_v59 = vpack.c.bf16 %v732_v51, %v728_v50  ;;  %v736_v63 = vld [vmem:[%s11483_s2 + $0x558] sm:$0xff] }
  0x4b   : > { %5352 = vmatprep.subr.bf16.mxu1 %v5351_v37  ;;  %v722_v37 = vld [vmem:[%s11483_s2 + $0x4e8] sm:$0xff]  ;;  %v5177_v40 = vpack.c.bf16 %v713_v32, %v709_v31  ;;  %v5373_v41 = vpack.c.bf16 %v715_v35, %v711_v33  ;;  %v545_v62 = vld [vmem:[%s7266_s29 + $0x40] sm:$0xff]  ;;  %v740_v0 = vld [vmem:[%s11483_s2 + $0x578] sm:$0xff] }
  0x4c   : > { %v5179_v42 = vpack.c.bf16 %v722_v37, %v718_v36  ;;  %v544_v1 = vld [vmem:[%s7266_s29 + $0x38] sm:$0xff]  ;;  %v737_v6 = vld [vmem:[%s11483_s2 + $0x560] sm:$0xff]  ;;  %v735_v7 = vld [vmem:[%s11483_s2 + $0x550] sm:$0xff] }
  0x4d   : > { %5158 = vmatpush1.bf16.msra.mxu0 %v5157_v43  ;;  %v717_v43 = vld [vmem:[%s11483_s2 + $0x4c0] sm:$0xff]  ;;  %v552_v8 = vld [vmem:[%s7266_s29 + $0x78] sm:$0xff]  ;;  %v739_v10 = vld [vmem:[%s11483_s2 + $0x570] sm:$0xff] }
  0x4e   : > { %5354 = vmatpush1.bf16.msra.mxu1 %v5353_v44  ;;  %5160 = vmatprep.subr.bf16.mxu0 %v5159_v45  ;;  %v721_v44 = vld [vmem:[%s11483_s2 + $0x4e0] sm:$0xff]  ;;  %v719_v45 = vld [vmem:[%s11483_s2 + $0x4d0] sm:$0xff]  ;;  %v742_v11 = vld [vmem:[%s11483_s2 + $0x588] sm:$0xff]  ;;  %v5385_v19 = vpack.c.bf16 %v739_v10, %v735_v7 }
  0x4f   : > { %5356 = vmatprep.subr.bf16.mxu1 %v5355_v49  ;;  %v730_v49 = vld [vmem:[%s11483_s2 + $0x528] sm:$0xff]  ;;  %v5181_v52 = vpack.c.bf16 %v721_v44, %v717_v43  ;;  %v5377_v54 = vpack.c.bf16 %v723_v47, %v719_v45  ;;  %v744_v13 = vld [vmem:[%s11483_s2 + $0x598] sm:$0xff]  ;;  %v745_v21 = vld [vmem:[%s11483_s2 + $0x5a0] sm:$0xff] }
  0x50   : > { %v746_v12 = vld [vmem:[%s11483_s2 + $0x5a8] sm:$0xff]  ;;  %v748_v14 = vld [vmem:[%s11483_s2 + $0x5b8] sm:$0xff]  ;;  %v747_v23 = vld [vmem:[%s11483_s2 + $0x5b0] sm:$0xff] }
  0x51   : > { %5162 = vmatpush1.bf16.msra.mxu0 %v5161_v55  ;;  %v5183_v55 = vpack.c.bf16 %v730_v49, %v726_v48  ;;  %v5191_v20 = vpack.c.bf16 %v746_v12, %v742_v11  ;;  %v5387_v24 = vpack.c.bf16 %v748_v14, %v744_v13  ;;  %v750_v25 = vld [vmem:[%s11483_s2 + $0x5c8] sm:$0xff]  ;;  %v540_v31 = vld [vmem:[%s7266_s29 + $0x18] sm:$0xff]  ;;  %v753_v35 = vld [vmem:[%s11483_s2 + $0x5e0] sm:$0xff] }
  0x52   : > { %5358 = vmatpush1.bf16.msra.mxu1 %v5357_v56  ;;  %5164 = vmatprep.subr.bf16.mxu0 %v5163_v57  ;;  %v729_v56 = vld [vmem:[%s11483_s2 + $0x520] sm:$0xff]  ;;  %v727_v57 = vld [vmem:[%s11483_s2 + $0x510] sm:$0xff]  ;;  %v754_v26 = vld [vmem:[%s11483_s2 + $0x5e8] sm:$0xff] }
  0x53   : > { %5360 = vmatprep.subr.bf16.mxu1 %v5359_v61  ;;  %v738_v61 = vld [vmem:[%s11483_s2 + $0x568] sm:$0xff]  ;;  %v5185_v2 = vpack.c.bf16 %v729_v56, %v725_v53  ;;  %v5195_v33 = vpack.c.bf16 %v754_v26, %v750_v25  ;;  %v751_v36 = vld [vmem:[%s11483_s2 + $0x5d0] sm:$0xff]  ;;  %v761_v47 = vld [vmem:[%s11483_s2 + $0x620] sm:$0xff] }
  0x54   : > { %v558_v27 = vld [vmem:[%s7266_s29 + $0xa8] sm:$0xff]  ;;  %v755_v38 = vld [vmem:[%s11483_s2 + $0x5f0] sm:$0xff]  ;;  %v768_v53 = vld [vmem:[%s11483_s2 + $0x658] sm:$0xff] }
  0x55   : > { %5166 = vmatpush1.bf16.msra.mxu0 %v5165_v3  ;;  %v733_v3 = vld [vmem:[%s11483_s2 + $0x540] sm:$0xff]  ;;  %v758_v39 = vld [vmem:[%s11483_s2 + $0x608] sm:$0xff]  ;;  %v5393_v44 = vpack.c.bf16 %v755_v38, %v751_v36  ;;  %v759_v48 = vld [vmem:[%s11483_s2 + $0x610] sm:$0xff] }
  0x56   : > { %5362 = vmatpush1.bf16.msra.mxu1 %v5361_v4  ;;  %5168 = vmatprep.subr.bf16.mxu0 %v5167_v5  ;;  %v5381_v4 = vpack.c.bf16 %v731_v58, %v727_v57  ;;  %v5187_v5 = vpack.c.bf16 %v738_v61, %v734_v60  ;;  %v763_v50 = vld [vmem:[%s11483_s2 + $0x630] sm:$0xff]  ;;  %v766_v51 = vld [vmem:[%s11483_s2 + $0x648] sm:$0xff]  ;;  %v765_v58 = vld [vmem:[%s11483_s2 + $0x640] sm:$0xff] }
  0x57   : > { %5364 = vmatprep.subr.bf16.mxu1 %v5363_v9  ;;  %v5383_v9 = vpack.c.bf16 %v740_v0, %v736_v63  ;;  %v5397_v56 = vpack.c.bf16 %v763_v50, %v759_v48  ;;  %v767_v60 = vld [vmem:[%s11483_s2 + $0x650] sm:$0xff]  ;;  %v774_v63 = vld [vmem:[%s11483_s2 + $0x688] sm:$0xff]  ;;  %v777_v7 = vld [vmem:[%s11483_s2 + $0x6a0] sm:$0xff] }
  0x58   : > { %1057 = vmatmul.mubr.f32.vlgmr.msra.gmra.mrb[0].mxu0 %v537_v15  ;;  %v778_v0 = vld [vmem:[%s11483_s2 + $0x6a8] sm:$0xff]  ;;  %v779_v10 = vld [vmem:[%s11483_s2 + $0x6b0] sm:$0xff]  ;;  %v784_v13 = vld [vmem:[%s11483_s2 + $0x6d8] sm:$0xff] }
  0x59   : > { %5170 = vmatpush1.bf16.msra.mxu0 %v5169_v16  ;;  %1413 = vmatmul.mubr.f32.vlgmr.msra.gmra.mrb[0].mxu1 %v537_v15  ;;  %v551_v15 = vld [vmem:[%s7266_s29 + $0x70] sm:$0xff]  ;;  %v5189_v16 = vpack.c.bf16 %v737_v6, %v733_v3  ;;  %v773_v6 = vld [vmem:[%s11483_s2 + $0x680] sm:$0xff]  ;;  %v782_v11 = vld [vmem:[%s11483_s2 + $0x6c8] sm:$0xff] }
  0x5a   : > { %5366 = vmatpush1.bf16.msra.mxu1 %v5365_v17  ;;  %5172 = vmatprep.subr.bf16.mxu0 %v5171_v18  ;;  %v741_v17 = vld [vmem:[%s11483_s2 + $0x580] sm:$0xff]  ;;  %v559_v18 = vld [vmem:[%s7266_s29 + $0xb0] sm:$0xff]  ;;  %v786_v12 = vld [vmem:[%s11483_s2 + $0x6e8] sm:$0xff] }
  0x5b   : > { %5368 = vmatprep.subr.bf16.mxu1 %v5367_v22  ;;  %1062 = vmatprep.mubr.f32.mxu0 %v545_v62  ;;  %v743_v22 = vld [vmem:[%s11483_s2 + $0x590] sm:$0xff]  ;;  %v788_v14 = vld [vmem:[%s11483_s2 + $0x6f8] sm:$0xff]  ;;  %v802_v36 = vld [vmem:[%s11483_s2 + $0x768] sm:$0xff] }
  0x5c   : > { %1418 = vmatprep.mubr.f32.mxu1 %v545_v62  ;;  %1063 = vmatmul.mubr.f32.gmra.mrb[2].mxu0 %v544_v1  ;;  %v5389_v32 = vpack.c.bf16 %v747_v23, %v743_v22  ;;  %v771_v62 = vld [vmem:[%s11483_s2 + $0x670] sm:$0xff]  ;;  %v790_v23 = vld [vmem:[%s11483_s2 + $0x708] sm:$0xff]  ;;  %v792_v25 = vld [vmem:[%s11483_s2 + $0x718] sm:$0xff] }
  0x5d   : > { %5174 = vmatpush1.bf16.msra.mxu0 %v5173_v28  ;;  %1419 = vmatmul.mubr.f32.gmra.mrb[2].mxu1 %v544_v1  ;;  %v752_v28 = vld [vmem:[%s11483_s2 + $0x5d8] sm:$0xff]  ;;  %v787_v22 = vld [vmem:[%s11483_s2 + $0x6f0] sm:$0xff]  ;;  %v810_v48 = vld [vmem:[%s11483_s2 + $0x7a8] sm:$0xff] }
  0x5e   : > { %5370 = vmatpush1.bf16.msra.mxu1 %v5369_v29  ;;  %5176 = vmatprep.subr.bf16.mxu0 %v5175_v30  ;;  %v756_v29 = vld [vmem:[%s11483_s2 + $0x5f8] sm:$0xff]  ;;  %v5193_v30 = vpack.c.bf16 %v745_v21, %v741_v17  ;;  %v5211_v17 = vpack.c.bf16 %v786_v12, %v782_v11  ;;  %v5407_v21 = vpack.c.bf16 %v788_v14, %v784_v13  ;;  %v821_v14 = vld [vmem:[%s11483_s2 + $0x800] sm:$0xff] }
  0x5f   : > { %5372 = vmatprep.subr.bf16.mxu1 %v5371_v34  ;;  %1068 = vmatprep.mubr.f32.mxu0 %v552_v8  ;;  %v749_v34 = vld [vmem:[%s11483_s2 + $0x5c0] sm:$0xff]  ;;  %v5391_v37 = vpack.c.bf16 %v756_v29, %v752_v28  ;;  %v776_v1 = vld [vmem:[%s11483_s2 + $0x698] sm:$0xff] }
  0x60   : > { %1424 = vmatprep.mubr.f32.mxu1 %v552_v8  ;;  %1069 = vmatmul.mubr.f32.gmra.mrb[4].mxu0 %v551_v15  ;;  %v5197_v43 = vpack.c.bf16 %v753_v35, %v749_v34  ;;  %v775_v8 = vld [vmem:[%s11483_s2 + $0x690] sm:$0xff]  ;;  %v796_v26 = vld [vmem:[%s11483_s2 + $0x738] sm:$0xff]  ;;  %v798_v35 = vld [vmem:[%s11483_s2 + $0x748] sm:$0xff] }
  0x61   : > { %5178 = vmatpush1.bf16.msra.mxu0 %v5177_v40  ;;  %1425 = vmatmul.mubr.f32.gmra.mrb[4].mxu1 %v551_v15  ;;  %v762_v40 = vld [vmem:[%s11483_s2 + $0x628] sm:$0xff]  ;;  %v5209_v15 = vpack.c.bf16 %v777_v7, %v773_v6  ;;  %v795_v34 = vld [vmem:[%s11483_s2 + $0x730] sm:$0xff]  ;;  %v804_v38 = vld [vmem:[%s11483_s2 + $0x778] sm:$0xff] }
  0x62   : > { %5374 = vmatpush1.bf16.msra.mxu1 %v5373_v41  ;;  %5180 = vmatprep.subr.bf16.mxu0 %v5179_v42  ;;  %v760_v41 = vld [vmem:[%s11483_s2 + $0x618] sm:$0xff]  ;;  %v5199_v45 = vpack.c.bf16 %v762_v40, %v758_v39  ;;  %v819_v6 = vld [vmem:[%s11483_s2 + $0x7f0] sm:$0xff]  ;;  %v822_v7 = vld [vmem:[%s11483_s2 + $0x808] sm:$0xff] }
  0x63   : > { %5376 = vmatprep.subr.bf16.mxu1 %v5375_v46  ;;  %1074 = vmatprep.mubr.f32.mxu0 %v559_v18  ;;  %v764_v42 = vld [vmem:[%s11483_s2 + $0x638] sm:$0xff]  ;;  %v757_v46 = vld [vmem:[%s11483_s2 + $0x600] sm:$0xff] }
  0x64   : > { %1430 = vmatprep.mubr.f32.mxu1 %v559_v18  ;;  %1075 = vmatmul.mubr.f32.gmra.mrb[6].mxu0 %v558_v27  ;;  %v5395_v49 = vpack.c.bf16 %v764_v42, %v760_v41  ;;  %v781_v18 = vld [vmem:[%s11483_s2 + $0x6c0] sm:$0xff]  ;;  %v5219_v41 = vpack.c.bf16 %v802_v36, %v798_v35  ;;  %v812_v50 = vld [vmem:[%s11483_s2 + $0x7b8] sm:$0xff]  ;;  %v547_v36 = vld [vmem:[%s7266_s29 + $0x50] sm:$0xff] }
  0x65   : > { %5182 = vmatpush1.bf16.msra.mxu0 %v5181_v52  ;;  %1431 = vmatmul.mubr.f32.gmra.mrb[6].mxu1 %v558_v27  ;;  %v770_v52 = vld [vmem:[%s11483_s2 + $0x668] sm:$0xff]  ;;  %v797_v42 = vld [vmem:[%s11483_s2 + $0x740] sm:$0xff]  ;;  %v844_v35 = vld [vmem:[%s11483_s2 + $0x8b8] sm:$0xff] }
  0x66   : > { %5378 = vmatpush1.bf16.msra.mxu1 %v5377_v54  ;;  %5184 = vmatprep.subr.bf16.mxu0 %v5183_v55  ;;  %v772_v54 = vld [vmem:[%s11483_s2 + $0x678] sm:$0xff]  ;;  %v5201_v55 = vpack.c.bf16 %v761_v47, %v757_v46  ;;  %v5203_v57 = vpack.c.bf16 %v770_v52, %v766_v51  ;;  %v803_v46 = vld [vmem:[%s11483_s2 + $0x770] sm:$0xff]  ;;  %v806_v47 = vld [vmem:[%s11483_s2 + $0x788] sm:$0xff] }
  0x67   : > { %5380 = vmatprep.subr.bf16.mxu1 %v5379_v59  ;;  %1145 = vmatprep.mubr.f32.mxu0 %v540_v31  ;;  %v769_v59 = vld [vmem:[%s11483_s2 + $0x660] sm:$0xff]  ;;  %v5399_v61 = vpack.c.bf16 %v772_v54, %v768_v53  ;;  %v5223_v53 = vpack.c.bf16 %v810_v48, %v806_v47  ;;  %v850_v47 = vld [vmem:[%s11483_s2 + $0x8e8] sm:$0xff]  ;;  %v848_v48 = vld [vmem:[%s11483_s2 + $0x8d8] sm:$0xff] }
  0x68   : > { %1501 = vmatprep.mubr.f32.mxu1 %v540_v31  ;;  %v5205_v3 = vpack.c.bf16 %v769_v59, %v765_v58  ;;  %v793_v31 = vld [vmem:[%s11483_s2 + $0x720] sm:$0xff]  ;;  %v811_v58 = vld [vmem:[%s11483_s2 + $0x7b0] sm:$0xff]  ;;  %v814_v59 = vld [vmem:[%s11483_s2 + $0x7c8] sm:$0xff] }
  0x69   : > { %5186 = vmatpush1.bf16.msra.mxu0 %v5185_v2  ;;  %v780_v2 = vld [vmem:[%s11483_s2 + $0x6b8] sm:$0xff]  ;;  %v805_v54 = vld [vmem:[%s11483_s2 + $0x780] sm:$0xff] }
  0x6a   : > { %5382 = vmatpush1.bf16.msra.mxu1 %v5381_v4  ;;  %5188 = vmatprep.subr.bf16.mxu0 %v5187_v5  ;;  %v5401_v4 = vpack.c.bf16 %v771_v62, %v767_v60  ;;  %v5207_v5 = vpack.c.bf16 %v778_v0, %v774_v63  ;;  %v818_v60 = vld [vmem:[%s11483_s2 + $0x7e8] sm:$0xff]  ;;  %v820_v62 = vld [vmem:[%s11483_s2 + $0x7f8] sm:$0xff] }
  0x6b   : > { %5384 = vmatprep.subr.bf16.mxu1 %v5383_v9  ;;  %v5403_v9 = vpack.c.bf16 %v780_v2, %v776_v1  ;;  %v5227_v1 = vpack.c.bf16 %v818_v60, %v814_v59  ;;  %v813_v2 = vld [vmem:[%s11483_s2 + $0x7c0] sm:$0xff]  ;;  %v851_v59 = vld [vmem:[%s11483_s2 + $0x8f0] sm:$0xff]  ;;  %v854_v60 = vld [vmem:[%s11483_s2 + $0x908] sm:$0xff] }
  0x6d   : > { %5190 = vmatpush1.bf16.msra.mxu0 %v5189_v16  ;;  %v5405_v16 = vpack.c.bf16 %v779_v10, %v775_v8  ;;  %v826_v8 = vld [vmem:[%s11483_s2 + $0x828] sm:$0xff]  ;;  %v828_v10 = vld [vmem:[%s11483_s2 + $0x838] sm:$0xff] }
  0x6e   : > { %5386 = vmatpush1.bf16.msra.mxu1 %v5385_v19  ;;  %5192 = vmatprep.subr.bf16.mxu0 %v5191_v20  ;;  %v785_v19 = vld [vmem:[%s11483_s2 + $0x6e0] sm:$0xff]  ;;  %v783_v20 = vld [vmem:[%s11483_s2 + $0x6d0] sm:$0xff]  ;;  %v5231_v13 = vpack.c.bf16 %v826_v8, %v822_v7 }
  0x6f   : > { %5388 = vmatprep.subr.bf16.mxu1 %v5387_v24  ;;  %v794_v24 = vld [vmem:[%s11483_s2 + $0x728] sm:$0xff]  ;;  %v5213_v27 = vpack.c.bf16 %v785_v19, %v781_v18  ;;  %v5409_v28 = vpack.c.bf16 %v787_v22, %v783_v20  ;;  %v827_v18 = vld [vmem:[%s11483_s2 + $0x830] sm:$0xff]  ;;  %v836_v22 = vld [vmem:[%s11483_s2 + $0x878] sm:$0xff] }
  0x70   : > { %v5215_v29 = vpack.c.bf16 %v794_v24, %v790_v23  ;;  %v830_v19 = vld [vmem:[%s11483_s2 + $0x848] sm:$0xff]  ;;  %v539_v23 = vld [vmem:[%s7266_s29 + $0x10] sm:$0xff] }
  0x71   : > { %5194 = vmatpush1.bf16.msra.mxu0 %v5193_v30  ;;  %v789_v30 = vld [vmem:[%s11483_s2 + $0x700] sm:$0xff]  ;;  %v834_v20 = vld [vmem:[%s11483_s2 + $0x868] sm:$0xff]  ;;  %v855_v7 = vld [vmem:[%s11483_s2 + $0x910] sm:$0xff] }
  0x72   : > { %5390 = vmatpush1.bf16.msra.mxu1 %v5389_v32  ;;  %5196 = vmatprep.subr.bf16.mxu0 %v5195_v33  ;;  %v791_v32 = vld [vmem:[%s11483_s2 + $0x710] sm:$0xff]  ;;  %v5411_v33 = vpack.c.bf16 %v796_v26, %v792_v25  ;;  %v5217_v39 = vpack.c.bf16 %v793_v31, %v789_v30  ;;  %v5235_v26 = vpack.c.bf16 %v834_v20, %v830_v19  ;;  %v865_v19 = vld [vmem:[%s11483_s2 + $0x960] sm:$0xff] }
  0x73   : > { %5392 = vmatprep.subr.bf16.mxu1 %v5391_v37  ;;  %v800_v37 = vld [vmem:[%s11483_s2 + $0x758] sm:$0xff]  ;;  %v5413_v40 = vpack.c.bf16 %v795_v34, %v791_v32  ;;  %v835_v31 = vld [vmem:[%s11483_s2 + $0x870] sm:$0xff]  ;;  %v838_v32 = vld [vmem:[%s11483_s2 + $0x888] sm:$0xff] }
  0x74   : > { %v840_v34 = vld [vmem:[%s11483_s2 + $0x898] sm:$0xff]  ;;  %v863_v20 = vld [vmem:[%s11483_s2 + $0x950] sm:$0xff] }
  0x75   : > { %5198 = vmatpush1.bf16.msra.mxu0 %v5197_v43  ;;  %v801_v43 = vld [vmem:[%s11483_s2 + $0x760] sm:$0xff] }
  0x76   : > { %5394 = vmatpush1.bf16.msra.mxu1 %v5393_v44  ;;  %5200 = vmatprep.subr.bf16.mxu0 %v5199_v45  ;;  %v799_v44 = vld [vmem:[%s11483_s2 + $0x750] sm:$0xff]  ;;  %v5415_v45 = vpack.c.bf16 %v804_v38, %v800_v37  ;;  %v5221_v51 = vpack.c.bf16 %v801_v43, %v797_v42  ;;  %v546_v38 = vld [vmem:[%s7266_s29 + $0x48] sm:$0xff]  ;;  %v841_v42 = vld [vmem:[%s11483_s2 + $0x8a0] sm:$0xff] }
  0x77   : > { %5396 = vmatprep.subr.bf16.mxu1 %v5395_v49  ;;  %v808_v49 = vld [vmem:[%s11483_s2 + $0x798] sm:$0xff]  ;;  %v5417_v52 = vpack.c.bf16 %v803_v46, %v799_v44  ;;  %v839_v43 = vld [vmem:[%s11483_s2 + $0x890] sm:$0xff]  ;;  %v5435_v44 = vpack.c.bf16 %v844_v35, %v840_v34  ;;  %v846_v46 = vld [vmem:[%s11483_s2 + $0x8c8] sm:$0xff] }
  0x78   : > { %v875_v34 = vld [vmem:[%s11483_s2 + $0x9b0] sm:$0xff]  ;;  %v878_v35 = vld [vmem:[%s11483_s2 + $0x9c8] sm:$0xff] }
  0x79   : > { %5202 = vmatpush1.bf16.msra.mxu0 %v5201_v55  ;;  %v809_v55 = vld [vmem:[%s11483_s2 + $0x7a0] sm:$0xff] }
  0x7a   : > { %5398 = vmatpush1.bf16.msra.mxu1 %v5397_v56  ;;  %5204 = vmatprep.subr.bf16.mxu0 %v5203_v57  ;;  %v807_v56 = vld [vmem:[%s11483_s2 + $0x790] sm:$0xff]  ;;  %v5419_v57 = vpack.c.bf16 %v812_v50, %v808_v49  ;;  %v5225_v63 = vpack.c.bf16 %v809_v55, %v805_v54  ;;  %v852_v49 = vld [vmem:[%s11483_s2 + $0x8f8] sm:$0xff]  ;;  %v554_v50 = vld [vmem:[%s7266_s29 + $0x88] sm:$0xff]  ;;  %v5243_v54 = vpack.c.bf16 %v850_v47, %v846_v46 }
  0x7b   : > { %5400 = vmatprep.subr.bf16.mxu1 %v5399_v61  ;;  %v816_v61 = vld [vmem:[%s11483_s2 + $0x7d8] sm:$0xff]  ;;  %v5421_v0 = vpack.c.bf16 %v811_v58, %v807_v56  ;;  %v845_v55 = vld [vmem:[%s11483_s2 + $0x8c0] sm:$0xff]  ;;  %v5439_v58 = vpack.c.bf16 %v852_v49, %v848_v48  ;;  %v883_v46 = vld [vmem:[%s11483_s2 + $0x9f0] sm:$0xff] }
  0x7c   : > { %v849_v56 = vld [vmem:[%s11483_s2 + $0x8e0] sm:$0xff]  ;;  %v886_v47 = vld [vmem:[%s11483_s2 + $0xa08] sm:$0xff]  ;;  %v888_v49 = vld [vmem:[%s11483_s2 + $0xa18] sm:$0xff] }
  0x7d   : > { %5206 = vmatpush1.bf16.msra.mxu0 %v5205_v3  ;;  %v817_v3 = vld [vmem:[%s11483_s2 + $0x7e0] sm:$0xff]  ;;  %v890_v48 = vld [vmem:[%s11483_s2 + $0xa28] sm:$0xff] }
  0x7e   : > { %5402 = vmatpush1.bf16.msra.mxu1 %v5401_v4  ;;  %5208 = vmatprep.subr.bf16.mxu0 %v5207_v5  ;;  %v815_v4 = vld [vmem:[%s11483_s2 + $0x7d0] sm:$0xff]  ;;  %v5423_v5 = vpack.c.bf16 %v820_v62, %v816_v61  ;;  %v5229_v11 = vpack.c.bf16 %v817_v3, %v813_v2  ;;  %v858_v61 = vld [vmem:[%s11483_s2 + $0x928] sm:$0xff]  ;;  %v856_v62 = vld [vmem:[%s11483_s2 + $0x918] sm:$0xff] }
  0x7f   : > { %5404 = vmatprep.subr.bf16.mxu1 %v5403_v9  ;;  %v824_v9 = vld [vmem:[%s11483_s2 + $0x818] sm:$0xff]  ;;  %v5425_v12 = vpack.c.bf16 %v819_v6, %v815_v4  ;;  %v5247_v4 = vpack.c.bf16 %v858_v61, %v854_v60  ;;  %v857_v6 = vld [vmem:[%s11483_s2 + $0x920] sm:$0xff]  ;;  %v898_v60 = vld [vmem:[%s11483_s2 + $0xa68] sm:$0xff] }
  0x80   : > { %v560_v2 = vld [vmem:[%s7266_s29 + $0xb8] sm:$0xff] }
  0x81   : > { %5210 = vmatpush1.bf16.msra.mxu0 %v5209_v15  ;;  %v825_v15 = vld [vmem:[%s11483_s2 + $0x820] sm:$0xff]  ;;  %v896_v61 = vld [vmem:[%s11483_s2 + $0xa58] sm:$0xff] }
  0x82   : > { %5406 = vmatpush1.bf16.msra.mxu1 %v5405_v16  ;;  %5212 = vmatprep.subr.bf16.mxu0 %v5211_v17  ;;  %v823_v16 = vld [vmem:[%s11483_s2 + $0x810] sm:$0xff]  ;;  %v5427_v17 = vpack.c.bf16 %v828_v10, %v824_v9  ;;  %v5233_v24 = vpack.c.bf16 %v825_v15, %v821_v14  ;;  %v862_v10 = vld [vmem:[%s11483_s2 + $0x948] sm:$0xff] }
  0x83   : > { %5408 = vmatprep.subr.bf16.mxu1 %v5407_v21  ;;  %v832_v21 = vld [vmem:[%s11483_s2 + $0x858] sm:$0xff]  ;;  %v5429_v25 = vpack.c.bf16 %v827_v18, %v823_v16  ;;  %v859_v9 = vld [vmem:[%s11483_s2 + $0x930] sm:$0xff]  ;;  %v542_v14 = vld [vmem:[%s7266_s29 + $0x28] sm:$0xff] }
  0x84   : > { %v5431_v30 = vpack.c.bf16 %v836_v22, %v832_v21  ;;  %v5445_v16 = vpack.c.bf16 %v859_v9, %v855_v7  ;;  %v861_v18 = vld [vmem:[%s11483_s2 + $0x940] sm:$0xff]  ;;  %v867_v22 = vld [vmem:[%s11483_s2 + $0x970] sm:$0xff]  ;;  %v902_v7 = vld [vmem:[%s11483_s2 + $0xa88] sm:$0xff] }
  0x85   : > { %5214 = vmatpush1.bf16.msra.mxu0 %v5213_v27  ;;  %v829_v27 = vld [vmem:[%s11483_s2 + $0x840] sm:$0xff]  ;;  %v904_v9 = vld [vmem:[%s11483_s2 + $0xa98] sm:$0xff] }
  0x86   : > { %5410 = vmatpush1.bf16.msra.mxu1 %v5409_v28  ;;  %5216 = vmatprep.subr.bf16.mxu0 %v5215_v29  ;;  %v833_v28 = vld [vmem:[%s11483_s2 + $0x860] sm:$0xff]  ;;  %v831_v29 = vld [vmem:[%s11483_s2 + $0x850] sm:$0xff] }
  0x87   : > { %5412 = vmatprep.subr.bf16.mxu1 %v5411_v33  ;;  %v842_v33 = vld [vmem:[%s11483_s2 + $0x8a8] sm:$0xff]  ;;  %v5237_v37 = vpack.c.bf16 %v833_v28, %v829_v27  ;;  %v5253_v27 = vpack.c.bf16 %v865_v19, %v861_v18  ;;  %v5449_v28 = vpack.c.bf16 %v867_v22, %v863_v20  ;;  %v907_v18 = vld [vmem:[%s11483_s2 + $0xab0] sm:$0xff]  ;;  %v916_v22 = vld [vmem:[%s11483_s2 + $0xaf8] sm:$0xff] }
  0x88   : > { %v910_v19 = vld [vmem:[%s11483_s2 + $0xac8] sm:$0xff] }
  0x89   : > { %5218 = vmatpush1.bf16.msra.mxu0 %v5217_v39  ;;  %v5433_v39 = vpack.c.bf16 %v835_v31, %v831_v29  ;;  %v873_v31 = vld [vmem:[%s11483_s2 + $0x9a0] sm:$0xff]  ;;  %v914_v20 = vld [vmem:[%s11483_s2 + $0xae8] sm:$0xff] }
  0x8a   : > { %5414 = vmatpush1.bf16.msra.mxu1 %v5413_v40  ;;  %5220 = vmatprep.subr.bf16.mxu0 %v5219_v41  ;;  %v5239_v40 = vpack.c.bf16 %v842_v33, %v838_v32  ;;  %v837_v41 = vld [vmem:[%s11483_s2 + $0x880] sm:$0xff]  ;;  %v871_v32 = vld [vmem:[%s11483_s2 + $0x990] sm:$0xff] }
  0x8b   : > { %5416 = vmatprep.subr.bf16.mxu1 %v5415_v45  ;;  %v843_v45 = vld [vmem:[%s11483_s2 + $0x8b0] sm:$0xff] }
  0x8d   : > { %5222 = vmatpush1.bf16.msra.mxu0 %v5221_v51  ;;  %v5241_v51 = vpack.c.bf16 %v841_v42, %v837_v41  ;;  %v877_v42 = vld [vmem:[%s11483_s2 + $0x9c0] sm:$0xff] }
  0x8e   : > { %5418 = vmatpush1.bf16.msra.mxu1 %v5417_v52  ;;  %5224 = vmatprep.subr.bf16.mxu0 %v5223_v53  ;;  %v553_v52 = vld [vmem:[%s7266_s29 + $0x80] sm:$0xff]  ;;  %v5437_v53 = vpack.c.bf16 %v843_v45, %v839_v43 }
  0x8f   : > { %5420 = vmatprep.subr.bf16.mxu1 %v5419_v57  ;;  %v847_v57 = vld [vmem:[%s11483_s2 + $0x8d0] sm:$0xff]  ;;  %v881_v43 = vld [vmem:[%s11483_s2 + $0x9e0] sm:$0xff] }
  0x90   : > { %v5441_v3 = vpack.c.bf16 %v851_v59, %v847_v57  ;;  %v894_v59 = vld [vmem:[%s11483_s2 + $0xa48] sm:$0xff] }
  0x91   : > { %5226 = vmatpush1.bf16.msra.mxu0 %v5225_v63  ;;  %v860_v63 = vld [vmem:[%s11483_s2 + $0x938] sm:$0xff] }
  0x92   : > { %5422 = vmatpush1.bf16.msra.mxu1 %v5421_v0  ;;  %5228 = vmatprep.subr.bf16.mxu0 %v5227_v1  ;;  %v561_v0 = vld [vmem:[%s7266_s29 + $0xc0] sm:$0xff]  ;;  %v5245_v1 = vpack.c.bf16 %v849_v56, %v845_v55  ;;  %v5443_v8 = vpack.c.bf16 %v860_v63, %v856_v62  ;;  %v887_v56 = vld [vmem:[%s11483_s2 + $0xa10] sm:$0xff]  ;;  %v900_v62 = vld [vmem:[%s11483_s2 + $0xa78] sm:$0xff] }
  0x93   : > { %5424 = vmatprep.subr.bf16.mxu1 %v5423_v5  ;;  %v853_v5 = vld [vmem:[%s11483_s2 + $0x900] sm:$0xff] }
  0x94   : > { %v5249_v15 = vpack.c.bf16 %v857_v6, %v853_v5  ;;  %v889_v55 = vld [vmem:[%s11483_s2 + $0xa20] sm:$0xff]  ;;  %v5463_v5 = vpack.c.bf16 %v900_v62, %v896_v61  ;;  %v899_v6 = vld [vmem:[%s11483_s2 + $0xa70] sm:$0xff] }
  0x95   : > { %5230 = vmatpush1.bf16.msra.mxu0 %v5229_v11  ;;  %v866_v11 = vld [vmem:[%s11483_s2 + $0x968] sm:$0xff]  ;;  %v933_v62 = vld [vmem:[%s11483_s2 + $0xb80] sm:$0xff] }
  0x96   : > { %5426 = vmatpush1.bf16.msra.mxu1 %v5425_v12  ;;  %5232 = vmatprep.subr.bf16.mxu0 %v5231_v13  ;;  %v864_v12 = vld [vmem:[%s11483_s2 + $0x958] sm:$0xff] }
  0x97   : > { %5428 = vmatprep.subr.bf16.mxu1 %v5427_v17  ;;  %v868_v13 = vld [vmem:[%s11483_s2 + $0x978] sm:$0xff]  ;;  %v5251_v17 = vpack.c.bf16 %v866_v11, %v862_v10 }
  0x98   : > { %1146 = vmatmul.mubr.f32.vlgmr.msra.gmra.mrb[0].mxu0 %v539_v23  ;;  %v5447_v21 = vpack.c.bf16 %v868_v13, %v864_v12  ;;  %v908_v10 = vld [vmem:[%s11483_s2 + $0xab8] sm:$0xff] }
  0x99   : > { %5234 = vmatpush1.bf16.msra.mxu0 %v5233_v24  ;;  %1502 = vmatmul.mubr.f32.vlgmr.msra.gmra.mrb[0].mxu1 %v539_v23  ;;  %v870_v23 = vld [vmem:[%s11483_s2 + $0x988] sm:$0xff] }
  0x9a   : > { %5430 = vmatpush1.bf16.msra.mxu1 %v5429_v25  ;;  %5236 = vmatprep.subr.bf16.mxu0 %v5235_v26  ;;  %v874_v24 = vld [vmem:[%s11483_s2 + $0x9a8] sm:$0xff]  ;;  %v872_v25 = vld [vmem:[%s11483_s2 + $0x998] sm:$0xff] }
  0x9b   : > { %5432 = vmatprep.subr.bf16.mxu1 %v5431_v30  ;;  %1151 = vmatprep.mubr.f32.mxu0 %v547_v36  ;;  %v876_v26 = vld [vmem:[%s11483_s2 + $0x9b8] sm:$0xff]  ;;  %v5255_v29 = vpack.c.bf16 %v874_v24, %v870_v23  ;;  %v869_v30 = vld [vmem:[%s11483_s2 + $0x980] sm:$0xff] }
  0x9c   : > { %1507 = vmatprep.mubr.f32.mxu1 %v547_v36  ;;  %1152 = vmatmul.mubr.f32.gmra.mrb[2].mxu0 %v546_v38  ;;  %v5451_v33 = vpack.c.bf16 %v876_v26, %v872_v25  ;;  %v882_v36 = vld [vmem:[%s11483_s2 + $0x9e8] sm:$0xff]  ;;  %v5275_v25 = vpack.c.bf16 %v914_v20, %v910_v19  ;;  %v909_v26 = vld [vmem:[%s11483_s2 + $0xac0] sm:$0xff] }
  0x9d   : > { %5238 = vmatpush1.bf16.msra.mxu0 %v5237_v37  ;;  %1508 = vmatmul.mubr.f32.gmra.mrb[2].mxu1 %v546_v38  ;;  %v880_v37 = vld [vmem:[%s11483_s2 + $0x9d8] sm:$0xff]  ;;  %v5259_v41 = vpack.c.bf16 %v882_v36, %v878_v35 }
  0x9e   : > { %5434 = vmatpush1.bf16.msra.mxu1 %v5433_v39  ;;  %5240 = vmatprep.subr.bf16.mxu0 %v5239_v40  ;;  %v884_v38 = vld [vmem:[%s11483_s2 + $0x9f8] sm:$0xff]  ;;  %v5257_v39 = vpack.c.bf16 %v873_v31, %v869_v30  ;;  %v5453_v40 = vpack.c.bf16 %v875_v34, %v871_v32  ;;  %v915_v30 = vld [vmem:[%s11483_s2 + $0xaf0] sm:$0xff]  ;;  %v918_v31 = vld [vmem:[%s11483_s2 + $0xb08] sm:$0xff] }
  0x9f   : > { %5436 = vmatprep.subr.bf16.mxu1 %v5435_v44  ;;  %1157 = vmatprep.mubr.f32.mxu0 %v554_v50  ;;  %v879_v44 = vld [vmem:[%s11483_s2 + $0x9d0] sm:$0xff]  ;;  %v5455_v45 = vpack.c.bf16 %v884_v38, %v880_v37  ;;  %v922_v32 = vld [vmem:[%s11483_s2 + $0xb28] sm:$0xff]  ;;  %v924_v34 = vld [vmem:[%s11483_s2 + $0xb38] sm:$0xff] }
  0xa0   : > { %1513 = vmatprep.mubr.f32.mxu1 %v554_v50  ;;  %1158 = vmatmul.mubr.f32.gmra.mrb[4].mxu0 %v553_v52  ;;  %v892_v50 = vld [vmem:[%s11483_s2 + $0xa38] sm:$0xff]  ;;  %v5279_v37 = vpack.c.bf16 %v922_v32, %v918_v31  ;;  %v917_v38 = vld [vmem:[%s11483_s2 + $0xb00] sm:$0xff] }
  0xa1   : > { %5242 = vmatpush1.bf16.msra.mxu0 %v5241_v51  ;;  %1514 = vmatmul.mubr.f32.gmra.mrb[4].mxu1 %v553_v52  ;;  %v5261_v51 = vpack.c.bf16 %v881_v43, %v877_v42  ;;  %v5457_v52 = vpack.c.bf16 %v883_v46, %v879_v44  ;;  %v5459_v57 = vpack.c.bf16 %v892_v50, %v888_v49  ;;  %v923_v42 = vld [vmem:[%s11483_s2 + $0xb30] sm:$0xff]  ;;  %v926_v43 = vld [vmem:[%s11483_s2 + $0xb48] sm:$0xff]  ;;  %v932_v46 = vld [vmem:[%s11483_s2 + $0xb78] sm:$0xff] }
  0xa2   : > { %5438 = vmatpush1.bf16.msra.mxu1 %v5437_v53  ;;  %5244 = vmatprep.subr.bf16.mxu0 %v5243_v54  ;;  %v5263_v53 = vpack.c.bf16 %v890_v48, %v886_v47  ;;  %v885_v54 = vld [vmem:[%s11483_s2 + $0xa00] sm:$0xff]  ;;  %v930_v44 = vld [vmem:[%s11483_s2 + $0xb68] sm:$0xff]  ;;  %v1723_v31 = vld [vmem:[%s11485_s4 + $0x18] sm:$0xff] }
  0xa3   : > { %5440 = vmatprep.subr.bf16.mxu1 %v5439_v58  ;;  %1163 = vmatprep.mubr.f32.mxu0 %v561_v0  ;;  %v891_v58 = vld [vmem:[%s11483_s2 + $0xa30] sm:$0xff]  ;;  %v5265_v63 = vpack.c.bf16 %v889_v55, %v885_v54  ;;  %v5283_v49 = vpack.c.bf16 %v930_v44, %v926_v43  ;;  %v925_v50 = vld [vmem:[%s11483_s2 + $0xb40] sm:$0xff]  ;;  %v934_v55 = vld [vmem:[%s11483_s2 + $0xb88] sm:$0xff] }
  0xa4   : > { %1519 = vmatprep.mubr.f32.mxu1 %v561_v0  ;;  %1164 = vmatmul.mubr.f32.gmra.mrb[6].mxu0 %v560_v2  ;;  %v5461_v0 = vpack.c.bf16 %v891_v58, %v887_v56  ;;  %v931_v54 = vld [vmem:[%s11483_s2 + $0xb70] sm:$0xff]  ;;  %v938_v56 = vld [vmem:[%s11483_s2 + $0xba8] sm:$0xff]  ;;  %v940_v58 = vld [vmem:[%s11483_s2 + $0xbb8] sm:$0xff] }
  0xa5   : > { %5246 = vmatpush1.bf16.msra.mxu0 %v5245_v1  ;;  %1520 = vmatmul.mubr.f32.gmra.mrb[6].mxu1 %v560_v2  ;;  %v5267_v1 = vpack.c.bf16 %v898_v60, %v894_v59  ;;  %v893_v2 = vld [vmem:[%s11483_s2 + $0xa40] sm:$0xff]  ;;  %v5287_v61 = vpack.c.bf16 %v938_v56, %v934_v55  ;;  %v1727_v32 = vld [vmem:[%s11485_s4 + $0x38] sm:$0xff]  ;;  %v1722_v44 = vld [vmem:[%s11485_s4 + $0x10] sm:$0xff] }
  0xa6   : > { %5442 = vmatpush1.bf16.msra.mxu1 %v5441_v3  ;;  %5248 = vmatprep.subr.bf16.mxu0 %v5247_v4  ;;  %v897_v3 = vld [vmem:[%s11483_s2 + $0xa60] sm:$0xff]  ;;  %v895_v4 = vld [vmem:[%s11483_s2 + $0xa50] sm:$0xff] }
  0xa7   : > { %5444 = vmatprep.subr.bf16.mxu1 %v5443_v8  ;;  %1234 = vmatprep.mubr.f32.mxu0 %v542_v14  ;;  %v906_v8 = vld [vmem:[%s11483_s2 + $0xaa8] sm:$0xff]  ;;  %v5269_v11 = vpack.c.bf16 %v897_v3, %v893_v2  ;;  %v5465_v12 = vpack.c.bf16 %v899_v6, %v895_v4  ;;  %v939_v2 = vld [vmem:[%s11483_s2 + $0xbb0] sm:$0xff]  ;;  %v948_v6 = vld [vmem:[%s11483_s2 + $0xbf8] sm:$0xff] }
  0xa8   : > { %1590 = vmatprep.mubr.f32.mxu1 %v542_v14  ;;  %v5271_v13 = vpack.c.bf16 %v906_v8, %v902_v7  ;;  %v901_v14 = vld [vmem:[%s11483_s2 + $0xa80] sm:$0xff]  ;;  %v942_v3 = vld [vmem:[%s11483_s2 + $0xbc8] sm:$0xff] }
  0xa9   : > { %5250 = vmatpush1.bf16.msra.mxu0 %v5249_v15  ;;  %v905_v15 = vld [vmem:[%s11483_s2 + $0xaa0] sm:$0xff]  ;;  %v946_v4 = vld [vmem:[%s11483_s2 + $0xbe8] sm:$0xff] }
  0xaa   : > { %5446 = vmatpush1.bf16.msra.mxu1 %v5445_v16  ;;  %5252 = vmatprep.subr.bf16.mxu0 %v5251_v17  ;;  %v903_v16 = vld [vmem:[%s11483_s2 + $0xa90] sm:$0xff]  ;;  %v5467_v17 = vpack.c.bf16 %v908_v10, %v904_v9  ;;  %v5273_v23 = vpack.c.bf16 %v905_v15, %v901_v14  ;;  %v5291_v9 = vpack.c.bf16 %v946_v4, %v942_v3  ;;  %v941_v10 = vld [vmem:[%s11483_s2 + $0xbc0] sm:$0xff]  ;;  %v950_v15 = vld [vmem:[%s11483_s2 + $0xc08] sm:$0xff] }
  0xab   : > { %5448 = vmatprep.subr.bf16.mxu1 %v5447_v21  ;;  %v912_v21 = vld [vmem:[%s11483_s2 + $0xad8] sm:$0xff]  ;;  %v5469_v24 = vpack.c.bf16 %v907_v18, %v903_v16  ;;  %v947_v14 = vld [vmem:[%s11483_s2 + $0xbf0] sm:$0xff]  ;;  %v954_v16 = vld [vmem:[%s11483_s2 + $0xc28] sm:$0xff] }
  0xac   : > { %v956_v18 = vld [vmem:[%s11483_s2 + $0xc38] sm:$0xff]  ;;  %v1724_v43 = vld [vmem:[%s11485_s4 + $0x20] sm:$0xff] }
  0xad   : > { %5254 = vmatpush1.bf16.msra.mxu0 %v5253_v27  ;;  %v913_v27 = vld [vmem:[%s11483_s2 + $0xae0] sm:$0xff] }
  0xae   : > { %5450 = vmatpush1.bf16.msra.mxu1 %v5449_v28  ;;  %5256 = vmatprep.subr.bf16.mxu0 %v5255_v29  ;;  %v911_v28 = vld [vmem:[%s11483_s2 + $0xad0] sm:$0xff]  ;;  %v5471_v29 = vpack.c.bf16 %v916_v22, %v912_v21  ;;  %v5277_v35 = vpack.c.bf16 %v913_v27, %v909_v26  ;;  %v5295_v21 = vpack.c.bf16 %v954_v16, %v950_v15  ;;  %v949_v22 = vld [vmem:[%s11483_s2 + $0xc00] sm:$0xff]  ;;  %v1721_v27 = vld [vmem:[%s11485_s4 + $0x8] sm:$0xff] }
  0xaf   : > { %5452 = vmatprep.subr.bf16.mxu1 %v5451_v33  ;;  %v920_v33 = vld [vmem:[%s11483_s2 + $0xb18] sm:$0xff]  ;;  %v5473_v36 = vpack.c.bf16 %v915_v30, %v911_v28  ;;  %v955_v26 = vld [vmem:[%s11483_s2 + $0xc30] sm:$0xff]  ;;  %v1725_v28 = vld [vmem:[%s11485_s4 + $0x28] sm:$0xff] }
  0xb0   : > { %v1728_v55 = vld [vmem:[%s11485_s4 + $0x40] sm:$0xff] }
  0xb1   : > { %5258 = vmatpush1.bf16.msra.mxu0 %v5257_v39  ;;  %v921_v39 = vld [vmem:[%s11483_s2 + $0xb20] sm:$0xff] }
  0xb2   : > { %5454 = vmatpush1.bf16.msra.mxu1 %v5453_v40  ;;  %5260 = vmatprep.subr.bf16.mxu0 %v5259_v41  ;;  %v919_v40 = vld [vmem:[%s11483_s2 + $0xb10] sm:$0xff]  ;;  %v5475_v41 = vpack.c.bf16 %v924_v34, %v920_v33  ;;  %v5281_v47 = vpack.c.bf16 %v921_v39, %v917_v38  ;;  %v549_v33 = vld [vmem:[%s7266_s29 + $0x60] sm:$0xff]  ;;  %v556_v38 = vld [vmem:[%s7266_s29 + $0x98] sm:$0xff] }
  0xb3   : > { %5456 = vmatprep.subr.bf16.mxu1 %v5455_v45  ;;  %v928_v45 = vld [vmem:[%s11483_s2 + $0xb58] sm:$0xff]  ;;  %v5477_v48 = vpack.c.bf16 %v923_v42, %v919_v40  ;;  %v555_v39 = vld [vmem:[%s7266_s29 + $0x90] sm:$0xff]  ;;  %v1720_v42 = vld [vmem:[%s11485_s4] sm:$0xff] }
  0xb4   : > { %v563_v40 = vld [vmem:[%s7266_s29 + $0xd0] sm:$0xff]  ;;  %v1732_v56 = vld [vmem:[%s11485_s4 + $0x60] sm:$0xff] }
  0xb5   : > { %5262 = vmatpush1.bf16.msra.mxu0 %v5261_v51  ;;  %v929_v51 = vld [vmem:[%s11483_s2 + $0xb60] sm:$0xff] }
  0xb6   : > { %5458 = vmatpush1.bf16.msra.mxu1 %v5457_v52  ;;  %5264 = vmatprep.subr.bf16.mxu0 %v5263_v53  ;;  %v927_v52 = vld [vmem:[%s11483_s2 + $0xb50] sm:$0xff]  ;;  %v5479_v53 = vpack.c.bf16 %v932_v46, %v928_v45  ;;  %v5285_v59 = vpack.c.bf16 %v929_v51, %v925_v50  ;;  %v1729_v46 = vld [vmem:[%s11485_s4 + $0x48] sm:$0xff]  ;;  %v1731_v50 = vld [vmem:[%s11485_s4 + $0x58] sm:$0xff] }
  0xb7   : > { %5460 = vmatprep.subr.bf16.mxu1 %v5459_v57  ;;  %v936_v57 = vld [vmem:[%s11483_s2 + $0xb98] sm:$0xff]  ;;  %v5481_v60 = vpack.c.bf16 %v931_v54, %v927_v52  ;;  %v1726_v45 = vld [vmem:[%s11485_s4 + $0x30] sm:$0xff]  ;;  %v5497_v52 = vpack.c.bf16 %v1724_v43, %v1720_v42  ;;  %v1736_v4 = vld [vmem:[%s11485_s4 + $0x80] sm:$0xff] }
  0xb8   : > { %v1735_v51 = vld [vmem:[%s11485_s4 + $0x78] sm:$0xff]  ;;  %v1760_v42 = vld [vmem:[%s11485_s4 + $0x140] sm:$0xff] }
  0xb9   : > { %5266 = vmatpush1.bf16.msra.mxu0 %v5265_v63  ;;  %v937_v63 = vld [vmem:[%s11483_s2 + $0xba0] sm:$0xff] }
  0xba   : > { %5462 = vmatpush1.bf16.msra.mxu1 %v5461_v0  ;;  %5268 = vmatprep.subr.bf16.mxu0 %v5267_v1  ;;  %v935_v0 = vld [vmem:[%s11483_s2 + $0xb90] sm:$0xff]  ;;  %v5483_v1 = vpack.c.bf16 %v940_v58, %v936_v57  ;;  %v5289_v7 = vpack.c.bf16 %v937_v63, %v933_v62  ;;  %v5599_v58 = vpack.c.bf16 %v1735_v51, %v1731_v50  ;;  %v550_v62 = vld [vmem:[%s7266_s29 + $0x68] sm:$0xff]  ;;  %v1739_v63 = vld [vmem:[%s11485_s4 + $0x98] sm:$0xff] }
  0xbb   : > { %5464 = vmatprep.subr.bf16.mxu1 %v5463_v5  ;;  %v944_v5 = vld [vmem:[%s11483_s2 + $0xbd8] sm:$0xff]  ;;  %v5485_v8 = vpack.c.bf16 %v939_v2, %v935_v0  ;;  %v1730_v57 = vld [vmem:[%s11485_s4 + $0x50] sm:$0xff]  ;;  %v1764_v43 = vld [vmem:[%s11485_s4 + $0x160] sm:$0xff] }
  0xbc   : > { %v1743_v0 = vld [vmem:[%s11485_s4 + $0xb8] sm:$0xff] }
  0xbd   : > { %5270 = vmatpush1.bf16.msra.mxu0 %v5269_v11  ;;  %v945_v11 = vld [vmem:[%s11483_s2 + $0xbe0] sm:$0xff]  ;;  %v1771_v50 = vld [vmem:[%s11485_s4 + $0x198] sm:$0xff] }
  0xbe   : > { %5466 = vmatpush1.bf16.msra.mxu1 %v5465_v12  ;;  %5272 = vmatprep.subr.bf16.mxu0 %v5271_v13  ;;  %v943_v12 = vld [vmem:[%s11483_s2 + $0xbd0] sm:$0xff]  ;;  %v5487_v13 = vpack.c.bf16 %v948_v6, %v944_v5  ;;  %v5293_v19 = vpack.c.bf16 %v945_v11, %v941_v10  ;;  %v1740_v5 = vld [vmem:[%s11485_s4 + $0xa0] sm:$0xff]  ;;  %v1749_v10 = vld [vmem:[%s11485_s4 + $0xe8] sm:$0xff] }
  0xbf   : > { %5468 = vmatprep.subr.bf16.mxu1 %v5467_v17  ;;  %v952_v17 = vld [vmem:[%s11483_s2 + $0xc18] sm:$0xff]  ;;  %v5489_v20 = vpack.c.bf16 %v947_v14, %v943_v12  ;;  %v1738_v6 = vld [vmem:[%s11485_s4 + $0x90] sm:$0xff]  ;;  %v557_v11 = vld [vmem:[%s7266_s29 + $0xa0] sm:$0xff]  ;;  %v5505_v14 = vpack.c.bf16 %v1740_v5, %v1736_v4 }
  0xc0   : > { %v1747_v12 = vld [vmem:[%s11485_s4 + $0xd8] sm:$0xff]  ;;  %v1780_v4 = vld [vmem:[%s11485_s4 + $0x1e0] sm:$0xff]  ;;  %v1778_v5 = vld [vmem:[%s11485_s4 + $0x1d0] sm:$0xff] }
  0xc1   : > { %5274 = vmatpush1.bf16.msra.mxu0 %v5273_v23  ;;  %v953_v23 = vld [vmem:[%s11483_s2 + $0xc20] sm:$0xff]  ;;  %v1775_v51 = vld [vmem:[%s11485_s4 + $0x1b8] sm:$0xff] }
  0xc2   : > { %5470 = vmatpush1.bf16.msra.mxu1 %v5469_v24  ;;  %5276 = vmatprep.subr.bf16.mxu0 %v5275_v25  ;;  %v5491_v24 = vpack.c.bf16 %v956_v18, %v952_v17  ;;  %v951_v25 = vld [vmem:[%s11483_s2 + $0xc10] sm:$0xff]  ;;  %v5297_v30 = vpack.c.bf16 %v953_v23, %v949_v22  ;;  %v1744_v17 = vld [vmem:[%s11485_s4 + $0xc0] sm:$0xff]  ;;  %v1753_v22 = vld [vmem:[%s11485_s4 + $0x108] sm:$0xff] }
  0xc3   : > { %5472 = vmatprep.subr.bf16.mxu1 %v5471_v29  ;;  %v541_v29 = vld [vmem:[%s7266_s29 + $0x20] sm:$0xff]  ;;  %v5493_v34 = vpack.c.bf16 %v955_v26, %v951_v25  ;;  %v1757_v23 = vld [vmem:[%s11485_s4 + $0x128] sm:$0xff]  ;;  %v1755_v25 = vld [vmem:[%s11485_s4 + $0x118] sm:$0xff] }
  0xc4   : > { %v1748_v18 = vld [vmem:[%s11485_s4 + $0xe0] sm:$0xff]  ;;  %v1759_v26 = vld [vmem:[%s11485_s4 + $0x138] sm:$0xff] }
  0xc5   : > { %5278 = vmatpush1.bf16.msra.mxu0 %v5277_v35  ;;  %v5495_v35 = vpack.c.bf16 %v1725_v28, %v1721_v27  ;;  %v5509_v27 = vpack.c.bf16 %v1748_v18, %v1744_v17  ;;  %v1786_v17 = vld [vmem:[%s11485_s4 + $0x210] sm:$0xff] }
  0xc6   : > { %5474 = vmatpush1.bf16.msra.mxu1 %v5473_v36  ;;  %5280 = vmatprep.subr.bf16.mxu0 %v5279_v37  ;;  %v5595_v36 = vpack.c.bf16 %v1727_v32, %v1723_v31  ;;  %v548_v37 = vld [vmem:[%s7266_s29 + $0x58] sm:$0xff]  ;;  %v1756_v31 = vld [vmem:[%s11485_s4 + $0x120] sm:$0xff]  ;;  %v1754_v32 = vld [vmem:[%s11485_s4 + $0x110] sm:$0xff] }
  0xc7   : > { %5476 = vmatprep.subr.bf16.mxu1 %v5475_v41  ;;  %v562_v41 = vld [vmem:[%s7266_s29 + $0xc8] sm:$0xff] }
  0xc9   : > { %5282 = vmatpush1.bf16.msra.mxu0 %v5281_v47  ;;  %v1733_v47 = vld [vmem:[%s11485_s4 + $0x68] sm:$0xff] }
  0xca   : > { %5478 = vmatpush1.bf16.msra.mxu1 %v5477_v48  ;;  %5284 = vmatprep.subr.bf16.mxu0 %v5283_v49  ;;  %v6840_v48 = vmov 0.0   ;;  %v543_v49 = vld [vmem:[%s7266_s29 + $0x30] sm:$0xff]  ;;  %v5499_v54 = vpack.c.bf16 %v1733_v47, %v1729_v46  ;;  %v1769_v47 = vld [vmem:[%s11485_s4 + $0x188] sm:$0xff] }
  0xcb   : > { %5480 = vmatprep.subr.bf16.mxu1 %v5479_v53  ;;  %v5597_v53 = vpack.c.bf16 %v1726_v45, %v1722_v44  ;;  %v1762_v44 = vld [vmem:[%s11485_s4 + $0x150] sm:$0xff] }
  0xcc   : > { %v1766_v46 = vld [vmem:[%s11485_s4 + $0x170] sm:$0xff] }
  0xcd   : > { %5286 = vmatpush1.bf16.msra.mxu0 %v5285_v59  ;;  %v1734_v59 = vld [vmem:[%s11485_s4 + $0x70] sm:$0xff] }
  0xce   : > { %5482 = vmatpush1.bf16.msra.mxu1 %v5481_v60  ;;  %5288 = vmatprep.subr.bf16.mxu0 %v5287_v61  ;;  %v1737_v60 = vld [vmem:[%s11485_s4 + $0x88] sm:$0xff]  ;;  %v5601_v2 = vpack.c.bf16 %v1734_v59, %v1730_v57  ;;  %v1770_v57 = vld [vmem:[%s11485_s4 + $0x190] sm:$0xff] }
  0xcf   : > { %5484 = vmatprep.subr.bf16.mxu1 %v5483_v1  ;;  %v1741_v61 = vld [vmem:[%s11485_s4 + $0xa8] sm:$0xff]  ;;  %v5501_v1 = vpack.c.bf16 %v1732_v56, %v1728_v55  ;;  %v1768_v55 = vld [vmem:[%s11485_s4 + $0x180] sm:$0xff]  ;;  %v1774_v59 = vld [vmem:[%s11485_s4 + $0x1b0] sm:$0xff] }
  0xd0   : > { %v5503_v3 = vpack.c.bf16 %v1741_v61, %v1737_v60  ;;  %v1772_v56 = vld [vmem:[%s11485_s4 + $0x1a0] sm:$0xff]  ;;  %v1777_v60 = vld [vmem:[%s11485_s4 + $0x1c8] sm:$0xff] }
  0xd1   : > { %5290 = vmatpush1.bf16.msra.mxu0 %v5289_v7  ;;  %v5603_v7 = vpack.c.bf16 %v1743_v0, %v1739_v63  ;;  %v1781_v61 = vld [vmem:[%s11485_s4 + $0x1e8] sm:$0xff]  ;;  %v1783_v63 = vld [vmem:[%s11485_s4 + $0x1f8] sm:$0xff]  ;;  %v5521_v0 = vpack.c.bf16 %v1772_v56, %v1768_v55  ;;  %v1814_v56 = vld [vmem:[%s11485_s4 + $0x2f0] sm:$0xff] }
  0xd2   : > { %5486 = vmatpush1.bf16.msra.mxu1 %v5485_v8  ;;  %5292 = vmatprep.subr.bf16.mxu0 %v5291_v9  ;;  %v1742_v8 = vld [vmem:[%s11485_s4 + $0xb0] sm:$0xff]  ;;  %v1745_v9 = vld [vmem:[%s11485_s4 + $0xc8] sm:$0xff] }
  0xd3   : > { %5488 = vmatprep.subr.bf16.mxu1 %v5487_v13  ;;  %v1751_v13 = vld [vmem:[%s11485_s4 + $0xf8] sm:$0xff]  ;;  %v5605_v15 = vpack.c.bf16 %v1742_v8, %v1738_v6  ;;  %v5507_v16 = vpack.c.bf16 %v1749_v10, %v1745_v9  ;;  %v1785_v8 = vld [vmem:[%s11485_s4 + $0x208] sm:$0xff] }
  0xd4   : > { %v1789_v9 = vld [vmem:[%s11485_s4 + $0x228] sm:$0xff]  ;;  %v1787_v10 = vld [vmem:[%s11485_s4 + $0x218] sm:$0xff] }
  0xd5   : > { %5294 = vmatpush1.bf16.msra.mxu0 %v5293_v19  ;;  %v1746_v19 = vld [vmem:[%s11485_s4 + $0xd0] sm:$0xff] }
  0xd6   : > { %5490 = vmatpush1.bf16.msra.mxu1 %v5489_v20  ;;  %5296 = vmatprep.subr.bf16.mxu0 %v5295_v21  ;;  %v5607_v20 = vpack.c.bf16 %v1751_v13, %v1747_v12  ;;  %v1750_v21 = vld [vmem:[%s11485_s4 + $0xf0] sm:$0xff] }
  0xd7   : > { %5492 = vmatprep.subr.bf16.mxu1 %v5491_v24  ;;  %v564_v24 = vld [vmem:[%s7266_s29 + $0xd8] sm:$0xff]  ;;  %v5609_v28 = vpack.c.bf16 %v1750_v21, %v1746_v19  ;;  %v1790_v19 = vld [vmem:[%s11485_s4 + $0x230] sm:$0xff]  ;;  %v1797_v21 = vld [vmem:[%s11485_s4 + $0x268] sm:$0xff] }
  0xd8   : > { %1235 = vmatmul.mubr.f32.vlgmr.msra.gmra.mrb[0].mxu0 %v541_v29 }
  0xd9   : > { %1591 = vmatmul.mubr.f32.vlgmr.msra.gmra.mrb[0].mxu1 %v541_v29  ;;  %5298 = vmatpush1.bf16.msra.mxu0 %v5297_v30  ;;  %v5511_v29 = vpack.c.bf16 %v1757_v23, %v1753_v22  ;;  %v1752_v30 = vld [vmem:[%s11485_s4 + $0x100] sm:$0xff]  ;;  %v1795_v22 = vld [vmem:[%s11485_s4 + $0x258] sm:$0xff] }
  0xda   : > { %1240 = vmatprep.mubr.f32.mxu0 %v549_v33  ;;  %1596 = vmatprep.mubr.f32.mxu1 %v549_v33  ;;  %v5611_v33 = vpack.c.bf16 %v1759_v26, %v1755_v25  ;;  %v1799_v23 = vld [vmem:[%s11485_s4 + $0x278] sm:$0xff]  ;;  %v5629_v25 = vpack.c.bf16 %v1790_v19, %v1786_v17  ;;  %v1833_v17 = vld [vmem:[%s11485_s4 + $0x388] sm:$0xff] }
  0xdb   : > { %5494 = vmatpush1.bf16.msra.mxu1 %v5493_v34  ;;  %5496 = vmatprep.subr.bf16.mxu0 %v5495_v35  ;;  %v1758_v34 = vld [vmem:[%s11485_s4 + $0x130] sm:$0xff]  ;;  %v1761_v35 = vld [vmem:[%s11485_s4 + $0x148] sm:$0xff]  ;;  %v1835_v19 = vld [vmem:[%s11485_s4 + $0x398] sm:$0xff] }
  0xdc   : > { %1241 = vmatmul.mubr.f32.gmra.mrb[2].mxu0 %v548_v37  ;;  %5596 = vmatprep.subr.bf16.mxu1 %v5595_v36  ;;  %v1765_v36 = vld [vmem:[%s11485_s4 + $0x168] sm:$0xff] }
  0xdd   : > { %1597 = vmatmul.mubr.f32.gmra.mrb[2].mxu1 %v548_v37  ;;  %1246 = vmatprep.mubr.f32.mxu0 %v556_v38  ;;  %v1763_v37 = vld [vmem:[%s11485_s4 + $0x158] sm:$0xff] }
  0xde   : > { %1602 = vmatprep.mubr.f32.mxu1 %v556_v38  ;;  %v1767_v38 = vld [vmem:[%s11485_s4 + $0x178] sm:$0xff] }
  0xdf   : > { %v5615_v45 = vpack.c.bf16 %v1767_v38, %v1763_v37 }
  0xe0   : > { %1247 = vmatmul.mubr.f32.gmra.mrb[4].mxu0 %v555_v39 }
  0xe1   : > { %1603 = vmatmul.mubr.f32.gmra.mrb[4].mxu1 %v555_v39  ;;  %1252 = vmatprep.mubr.f32.mxu0 %v563_v40  ;;  %v5513_v39 = vpack.c.bf16 %v1756_v31, %v1752_v30  ;;  %v5631_v30 = vpack.c.bf16 %v1799_v23, %v1795_v22  ;;  %v1798_v31 = vld [vmem:[%s11485_s4 + $0x270] sm:$0xff] }
  0xe2   : > { %1608 = vmatprep.mubr.f32.mxu1 %v563_v40  ;;  %v5613_v40 = vpack.c.bf16 %v1758_v34, %v1754_v32  ;;  %v1801_v32 = vld [vmem:[%s11485_s4 + $0x288] sm:$0xff]  ;;  %v1803_v34 = vld [vmem:[%s11485_s4 + $0x298] sm:$0xff] }
  0xe4   : > { %1253 = vmatmul.mubr.f32.gmra.mrb[6].mxu0 %v562_v41 }
  0xe5   : > { %1609 = vmatmul.mubr.f32.gmra.mrb[6].mxu1 %v562_v41  ;;  %1323 = vmatprep.mubr.f32.mxu0 %v6840_v48  ;;  %v5515_v41 = vpack.c.bf16 %v1765_v36, %v1761_v35  ;;  %v1807_v35 = vld [vmem:[%s11485_s4 + $0x2b8] sm:$0xff] }
  0xe6   : > { %1679 = vmatprep.mubr.f32.mxu1 %v6840_v48 }
  0xe8   : > { %4981 = vmatmul.mubr.msk.f32.vlgmr.msra.gmra.mrb[0].mxu0 %vm979_vm0, %v543_v49 }
  0xe9   : > { %4985 = vmatmul.mubr.msk.f32.vlgmr.msra.gmra.mrb[0].mxu1 %vm979_vm0, %v543_v49  ;;  %1329 = vmatprep.mubr.f32.mxu0 %v6840_v48  ;;  %v1773_v49 = vld [vmem:[%s11485_s4 + $0x1a8] sm:$0xff] }
  0xea   : > { %1685 = vmatprep.mubr.f32.mxu1 %v6840_v48  ;;  %5498 = vmatpush1.bf16.msra.mxu0 %v5497_v52  ;;  %v5517_v52 = vpack.c.bf16 %v1764_v43, %v1760_v42  ;;  %v5635_v42 = vpack.c.bf16 %v1807_v35, %v1803_v34  ;;  %v1806_v43 = vld [vmem:[%s11485_s4 + $0x2b0] sm:$0xff]  ;;  %v1847_v35 = vld [vmem:[%s11485_s4 + $0x3f8] sm:$0xff] }
  0xeb   : > { %5598 = vmatpush1.bf16.msra.mxu1 %v5597_v53  ;;  %5500 = vmatprep.subr.bf16.mxu0 %v5499_v54  ;;  %v5617_v53 = vpack.c.bf16 %v1766_v46, %v1762_v44  ;;  %v5519_v54 = vpack.c.bf16 %v1773_v49, %v1769_v47  ;;  %v1809_v44 = vld [vmem:[%s11485_s4 + $0x2c8] sm:$0xff]  ;;  %v1811_v46 = vld [vmem:[%s11485_s4 + $0x2d8] sm:$0xff] }
  0xec   : > { %4982 = vmatmul.mubr.msk.f32.gmra.mrb[2].mxu0 %vm979_vm0, %v550_v62  ;;  %5600 = vmatprep.subr.bf16.mxu1 %v5599_v58  ;;  %v5619_v58 = vpack.c.bf16 %v1775_v51, %v1771_v50  ;;  %v1815_v47 = vld [vmem:[%s11485_s4 + $0x2f8] sm:$0xff] }
  0xed   : > { %4986 = vmatmul.mubr.msk.f32.gmra.mrb[2].mxu1 %vm979_vm0, %v550_v62  ;;  %1335 = vmatprep.mubr.f32.mxu0 %v6840_v48  ;;  %v1779_v62 = vld [vmem:[%s11485_s4 + $0x1d8] sm:$0xff]  ;;  %v5639_v55 = vpack.c.bf16 %v1815_v47, %v1811_v46 }
  0xee   : > { %1691 = vmatprep.mubr.f32.mxu1 %v6840_v48  ;;  %5502 = vmatpush1.bf16.msra.mxu0 %v5501_v1  ;;  %v5621_v1 = vpack.c.bf16 %v1774_v59, %v1770_v57  ;;  %v5623_v6 = vpack.c.bf16 %v1783_v63, %v1779_v62  ;;  %v1817_v57 = vld [vmem:[%s11485_s4 + $0x308] sm:$0xff]  ;;  %v1819_v59 = vld [vmem:[%s11485_s4 + $0x318] sm:$0xff] }
  0xef   : > { %5602 = vmatpush1.bf16.msra.mxu1 %v5601_v2  ;;  %5504 = vmatprep.subr.bf16.mxu0 %v5503_v3  ;;  %v5523_v2 = vpack.c.bf16 %v1781_v61, %v1777_v60  ;;  %v1776_v3 = vld [vmem:[%s11485_s4 + $0x1c0] sm:$0xff]  ;;  %v1823_v60 = vld [vmem:[%s11485_s4 + $0x338] sm:$0xff] }
  0xf0   : > { %4983 = vmatmul.mubr.msk.f32.gmra.mrb[4].mxu0 %vm979_vm0, %v557_v11  ;;  %5604 = vmatprep.subr.bf16.mxu1 %v5603_v7  ;;  %v1782_v7 = vld [vmem:[%s11485_s4 + $0x1f0] sm:$0xff]  ;;  %v5525_v12 = vpack.c.bf16 %v1780_v4, %v1776_v3  ;;  %v5643_v3 = vpack.c.bf16 %v1823_v60, %v1819_v59  ;;  %v1855_v47 = vld [vmem:[%s11485_s4 + $0x438] sm:$0xff]  ;;  %v1852_v59 = vld [vmem:[%s11485_s4 + $0x420] sm:$0xff] }
  0xf1   : > { %4987 = vmatmul.mubr.msk.f32.gmra.mrb[4].mxu1 %vm979_vm0, %v557_v11  ;;  %1341 = vmatprep.mubr.f32.mxu0 %v6840_v48  ;;  %v1791_v11 = vld [vmem:[%s11485_s4 + $0x238] sm:$0xff]  ;;  %v5625_v13 = vpack.c.bf16 %v1782_v7, %v1778_v5  ;;  %v1822_v4 = vld [vmem:[%s11485_s4 + $0x330] sm:$0xff]  ;;  %v1825_v5 = vld [vmem:[%s11485_s4 + $0x348] sm:$0xff] }
  0xf2   : > { %1697 = vmatprep.mubr.f32.mxu1 %v6840_v48  ;;  %5506 = vmatpush1.bf16.msra.mxu0 %v5505_v14  ;;  %v5527_v14 = vpack.c.bf16 %v1789_v9, %v1785_v8  ;;  %v5627_v18 = vpack.c.bf16 %v1791_v11, %v1787_v10  ;;  %v1827_v7 = vld [vmem:[%s11485_s4 + $0x358] sm:$0xff] }
  0xf3   : > { %5606 = vmatpush1.bf16.msra.mxu1 %v5605_v15  ;;  %5508 = vmatprep.subr.bf16.mxu0 %v5507_v16  ;;  %v1784_v15 = vld [vmem:[%s11485_s4 + $0x200] sm:$0xff]  ;;  %v1831_v8 = vld [vmem:[%s11485_s4 + $0x378] sm:$0xff] }
  0xf4   : > { %4984 = vmatmul.mubr.msk.f32.gmra.mrb[6].mxu0 %vm979_vm0, %v564_v24  ;;  %5608 = vmatprep.subr.bf16.mxu1 %v5607_v20  ;;  %v1788_v16 = vld [vmem:[%s11485_s4 + $0x220] sm:$0xff]  ;;  %v1793_v20 = vld [vmem:[%s11485_s4 + $0x248] sm:$0xff] }
  0xf5   : > { %4988 = vmatmul.mubr.msk.f32.gmra.mrb[6].mxu1 %vm979_vm0, %v564_v24  ;;  %v5529_v24 = vpack.c.bf16 %v1788_v16, %v1784_v15  ;;  %v5531_v26 = vpack.c.bf16 %v1797_v21, %v1793_v20  ;;  %v5647_v15 = vpack.c.bf16 %v1831_v8, %v1827_v7  ;;  %v1830_v16 = vld [vmem:[%s11485_s4 + $0x370] sm:$0xff]  ;;  %v1839_v20 = vld [vmem:[%s11485_s4 + $0x3b8] sm:$0xff] }
  0xf6   : > { %5510 = vmatpush1.bf16.msra.mxu0 %v5509_v27  ;;  %v1792_v27 = vld [vmem:[%s11485_s4 + $0x240] sm:$0xff] }
  0xf7   : > { %5610 = vmatpush1.bf16.msra.mxu1 %v5609_v28  ;;  %5512 = vmatprep.subr.bf16.mxu0 %v5511_v29  ;;  %v1796_v28 = vld [vmem:[%s11485_s4 + $0x260] sm:$0xff]  ;;  %v1794_v29 = vld [vmem:[%s11485_s4 + $0x250] sm:$0xff] }
  0xf8   : > { %5612 = vmatprep.subr.bf16.mxu1 %v5611_v33  ;;  %v1805_v33 = vld [vmem:[%s11485_s4 + $0x2a8] sm:$0xff]  ;;  %v5533_v36 = vpack.c.bf16 %v1796_v28, %v1792_v27  ;;  %v5633_v37 = vpack.c.bf16 %v1798_v31, %v1794_v29  ;;  %v1834_v27 = vld [vmem:[%s11485_s4 + $0x390] sm:$0xff] }
  0xf9   : > { %v5535_v38 = vpack.c.bf16 %v1805_v33, %v1801_v32  ;;  %v1838_v28 = vld [vmem:[%s11485_s4 + $0x3b0] sm:$0xff]  ;;  %v1841_v31 = vld [vmem:[%s11485_s4 + $0x3c8] sm:$0xff]  ;;  %v1843_v33 = vld [vmem:[%s11485_s4 + $0x3d8] sm:$0xff] }
  0xfa   : > { %5514 = vmatpush1.bf16.msra.mxu0 %v5513_v39  ;;  %v1800_v39 = vld [vmem:[%s11485_s4 + $0x280] sm:$0xff]  ;;  %v1845_v32 = vld [vmem:[%s11485_s4 + $0x3e8] sm:$0xff] }
  0xfb   : > { %5614 = vmatpush1.bf16.msra.mxu1 %v5613_v40  ;;  %5516 = vmatprep.subr.bf16.mxu0 %v5515_v41  ;;  %v1804_v40 = vld [vmem:[%s11485_s4 + $0x2a0] sm:$0xff]  ;;  %v1802_v41 = vld [vmem:[%s11485_s4 + $0x290] sm:$0xff]  ;;  %v5555_v34 = vpack.c.bf16 %v1845_v32, %v1841_v31 }
  0xfc   : > { %5616 = vmatprep.subr.bf16.mxu1 %v5615_v45  ;;  %v1813_v45 = vld [vmem:[%s11485_s4 + $0x2e8] sm:$0xff]  ;;  %v5537_v49 = vpack.c.bf16 %v1804_v40, %v1800_v39  ;;  %v5637_v50 = vpack.c.bf16 %v1806_v43, %v1802_v41  ;;  %v1842_v40 = vld [vmem:[%s11485_s4 + $0x3d0] sm:$0xff]  ;;  %v1864_v32 = vld [vmem:[%s11485_s4 + $0x480] sm:$0xff] }
  0xfd   : > { %v5539_v51 = vpack.c.bf16 %v1813_v45, %v1809_v44  ;;  %v1846_v41 = vld [vmem:[%s11485_s4 + $0x3f0] sm:$0xff]  ;;  %v1849_v43 = vld [vmem:[%s11485_s4 + $0x408] sm:$0xff]  ;;  %v1851_v45 = vld [vmem:[%s11485_s4 + $0x418] sm:$0xff] }
  0xfe   : > { %5518 = vmatpush1.bf16.msra.mxu0 %v5517_v52  ;;  %v1808_v52 = vld [vmem:[%s11485_s4 + $0x2c0] sm:$0xff]  ;;  %v1853_v44 = vld [vmem:[%s11485_s4 + $0x428] sm:$0xff] }
  0xff   : > { %5618 = vmatpush1.bf16.msra.mxu1 %v5617_v53  ;;  %5520 = vmatprep.subr.bf16.mxu0 %v5519_v54  ;;  %v1812_v53 = vld [vmem:[%s11485_s4 + $0x2e0] sm:$0xff]  ;;  %v1810_v54 = vld [vmem:[%s11485_s4 + $0x2d0] sm:$0xff]  ;;  %v5559_v46 = vpack.c.bf16 %v1853_v44, %v1849_v43 }
 0x100   : > { %5620 = vmatprep.subr.bf16.mxu1 %v5619_v58  ;;  %v1821_v58 = vld [vmem:[%s11485_s4 + $0x328] sm:$0xff]  ;;  %v5541_v61 = vpack.c.bf16 %v1812_v53, %v1808_v52  ;;  %v5641_v62 = vpack.c.bf16 %v1814_v56, %v1810_v54  ;;  %v8616_v53 = vld [vmem:[%s11484_s3] sm:$0xf] }
 0x101   : > { %v5543_v63 = vpack.c.bf16 %v1821_v58, %v1817_v57  ;;  %v1848_v58 = vld [vmem:[%s11485_s4 + $0x400] sm:$0xff] }
 0x102   : > { %5522 = vmatpush1.bf16.msra.mxu0 %v5521_v0  ;;  %v1816_v0 = vld [vmem:[%s11485_s4 + $0x300] sm:$0xff] }
 0x103   : > { %5622 = vmatpush1.bf16.msra.mxu1 %v5621_v1  ;;  %5524 = vmatprep.subr.bf16.mxu0 %v5523_v2  ;;  %v1820_v1 = vld [vmem:[%s11485_s4 + $0x320] sm:$0xff]  ;;  %v1818_v2 = vld [vmem:[%s11485_s4 + $0x310] sm:$0xff] }
 0x104   : > { %5624 = vmatprep.subr.bf16.mxu1 %v5623_v6  ;;  %v1829_v6 = vld [vmem:[%s11485_s4 + $0x368] sm:$0xff]  ;;  %v5545_v9 = vpack.c.bf16 %v1820_v1, %v1816_v0  ;;  %v5645_v10 = vpack.c.bf16 %v1822_v4, %v1818_v2  ;;  %v1854_v0 = vld [vmem:[%s11485_s4 + $0x430] sm:$0xff] }
 0x105   : > { %v5547_v11 = vpack.c.bf16 %v1829_v6, %v1825_v5  ;;  %v1857_v1 = vld [vmem:[%s11485_s4 + $0x448] sm:$0xff]  ;;  %v1859_v5 = vld [vmem:[%s11485_s4 + $0x458] sm:$0xff] }
 0x106   : > { %5526 = vmatpush1.bf16.msra.mxu0 %v5525_v12  ;;  %v1824_v12 = vld [vmem:[%s11485_s4 + $0x340] sm:$0xff]  ;;  %v1861_v4 = vld [vmem:[%s11485_s4 + $0x468] sm:$0xff]  ;;  %v1863_v6 = vld [vmem:[%s11485_s4 + $0x478] sm:$0xff] }
 0x107   : > { %5626 = vmatpush1.bf16.msra.mxu1 %v5625_v13  ;;  %5528 = vmatprep.subr.bf16.mxu0 %v5527_v14  ;;  %v1828_v13 = vld [vmem:[%s11485_s4 + $0x360] sm:$0xff]  ;;  %v1826_v14 = vld [vmem:[%s11485_s4 + $0x350] sm:$0xff] }
 0x108   : > { %5628 = vmatprep.subr.bf16.mxu1 %v5627_v18  ;;  %v1837_v18 = vld [vmem:[%s11485_s4 + $0x3a8] sm:$0xff]  ;;  %v5549_v21 = vpack.c.bf16 %v1828_v13, %v1824_v12  ;;  %v5649_v22 = vpack.c.bf16 %v1830_v16, %v1826_v14  ;;  %v1860_v12 = vld [vmem:[%s11485_s4 + $0x460] sm:$0xff] }
 0x109   : > { %v5551_v23 = vpack.c.bf16 %v1837_v18, %v1833_v17  ;;  %v5563_v17 = vpack.c.bf16 %v1861_v4, %v1857_v1  ;;  %v5663_v18 = vpack.c.bf16 %v1863_v6, %v1859_v5  ;;  %v1876_v5 = vld [vmem:[%s11485_s4 + $0x4e0] sm:$0xff]  ;;  %v1874_v6 = vld [vmem:[%s11485_s4 + $0x4d0] sm:$0xff] }
 0x10a   : > { %5530 = vmatpush1.bf16.msra.mxu0 %v5529_v24  ;;  %v1832_v24 = vld [vmem:[%s11485_s4 + $0x380] sm:$0xff] }
 0x10b   : > { %5630 = vmatpush1.bf16.msra.mxu1 %v5629_v25  ;;  %5532 = vmatprep.subr.bf16.mxu0 %v5531_v26  ;;  %v1836_v25 = vld [vmem:[%s11485_s4 + $0x3a0] sm:$0xff]  ;;  %v5651_v26 = vpack.c.bf16 %v1839_v20, %v1835_v19  ;;  %v1858_v19 = vld [vmem:[%s11485_s4 + $0x450] sm:$0xff] }
 0x10c   : > { %5632 = vmatprep.subr.bf16.mxu1 %v5631_v30  ;;  %v5553_v29 = vpack.c.bf16 %v1836_v25, %v1832_v24  ;;  %v5653_v30 = vpack.c.bf16 %v1838_v28, %v1834_v27  ;;  %v1862_v20 = vld [vmem:[%s11485_s4 + $0x470] sm:$0xff]  ;;  %v1869_v24 = vld [vmem:[%s11485_s4 + $0x4a8] sm:$0xff]  ;;  %v1867_v25 = vld [vmem:[%s11485_s4 + $0x498] sm:$0xff] }
 0x10d   : > { %v5665_v31 = vpack.c.bf16 %v1862_v20, %v1858_v19  ;;  %v1882_v19 = vld [vmem:[%s11485_s4 + $0x510] sm:$0xff] }
 0x10e   : > { %5534 = vmatpush1.bf16.msra.mxu0 %v5533_v36  ;;  %v1840_v36 = vld [vmem:[%s11485_s4 + $0x3c0] sm:$0xff]  ;;  %v1886_v20 = vld [vmem:[%s11485_s4 + $0x530] sm:$0xff] }
 0x10f   : > { %5634 = vmatpush1.bf16.msra.mxu1 %v5633_v37  ;;  %5536 = vmatprep.subr.bf16.mxu0 %v5535_v38  ;;  %v1844_v37 = vld [vmem:[%s11485_s4 + $0x3e0] sm:$0xff]  ;;  %v5655_v38 = vpack.c.bf16 %v1847_v35, %v1843_v33 }
 0x110   : > { %5636 = vmatprep.subr.bf16.mxu1 %v5635_v42  ;;  %v5557_v39 = vpack.c.bf16 %v1844_v37, %v1840_v36  ;;  %v5657_v42 = vpack.c.bf16 %v1846_v41, %v1842_v40  ;;  %v1868_v33 = vld [vmem:[%s11485_s4 + $0x4a0] sm:$0xff]  ;;  %v1866_v40 = vld [vmem:[%s11485_s4 + $0x490] sm:$0xff] }
 0x111   : > { %v1870_v41 = vld [vmem:[%s11485_s4 + $0x4b0] sm:$0xff] }
 0x112   : > { %5538 = vmatpush1.bf16.msra.mxu0 %v5537_v49  ;;  %v5659_v49 = vpack.c.bf16 %v1855_v47, %v1851_v45  ;;  %v1877_v45 = vld [vmem:[%s11485_s4 + $0x4e8] sm:$0xff]  ;;  %v1879_v47 = vld [vmem:[%s11485_s4 + $0x4f8] sm:$0xff] }
 0x113   : > { %5638 = vmatpush1.bf16.msra.mxu1 %v5637_v50  ;;  %5540 = vmatprep.subr.bf16.mxu0 %v5539_v51  ;;  %v959_v50 = vlaneseq }
 0x114   : > { %5640 = vmatprep.subr.bf16.mxu1 %v5639_v55 }
 0x115   : > { %v8608_v51 = vshrl.u32 %v959_v50, 7 }
 0x116   : > { %5542 = vmatpush1.bf16.msra.mxu0 %v5541_v61 }
 0x117   : > { %5642 = vmatpush1.bf16.msra.mxu1 %v5641_v62  ;;  %5544 = vmatprep.subr.bf16.mxu0 %v5543_v63  ;;  %v8611_v52 = vsub.s32 0, %v8608_v51  ;;  %v8619_v54 = vsub.s32 1, %v8608_v51  ;;  %v1850_v63 = vld [vmem:[%s11485_s4 + $0x410] sm:$0xff]  ;;  %v8690_v27 = vsub.s32 3, %v8608_v51 }
 0x118   : > { %5644 = vmatprep.subr.bf16.mxu1 %v5643_v3 }
 0x119   : > { %v8623_v55 = vrot.slane %v8616_v53, %v8611_v52  ;;  %v8627_v56 = vrot.slane %v8616_v53, %v8619_v54 }
 0x11a   : > { %5546 = vmatpush1.bf16.msra.mxu0 %v5545_v9  ;;  %v5561_v9 = vpack.c.bf16 %v1852_v59, %v1848_v58  ;;  %v5569_v58 = vpack.c.bf16 %v1868_v33, %v1864_v32  ;;  %v5669_v59 = vpack.c.bf16 %v1870_v41, %v1866_v40  ;;  %v1888_v32 = vld [vmem:[%s11485_s4 + $0x540] sm:$0xff]  ;;  %v1901_v40 = vld [vmem:[%s11485_s4 + $0x5a8] sm:$0xff]  ;;  %v1899_v41 = vld [vmem:[%s11485_s4 + $0x598] sm:$0xff] }
 0x11b   : > { %5646 = vmatpush1.bf16.msra.mxu1 %v5645_v10  ;;  %5548 = vmatprep.subr.bf16.mxu0 %v5547_v11  ;;  %v5661_v10 = vpack.c.bf16 %v1854_v0, %v1850_v63  ;;  %v1856_v11 = vld [vmem:[%s11485_s4 + $0x440] sm:$0xff] }
 0x11c   : > { %5648 = vmatprep.subr.bf16.mxu1 %v5647_v15  ;;  %v1892_v33 = vld [vmem:[%s11485_s4 + $0x560] sm:$0xff] }
 0x11e   : > { %5550 = vmatpush1.bf16.msra.mxu0 %v5549_v21  ;;  %v1865_v21 = vld [vmem:[%s11485_s4 + $0x488] sm:$0xff] }
 0x11f   : > { %5650 = vmatpush1.bf16.msra.mxu1 %v5649_v22  ;;  %5552 = vmatprep.subr.bf16.mxu0 %v5551_v23 }
 0x120   : > { %5652 = vmatprep.subr.bf16.mxu1 %v5651_v26  ;;  %v1871_v26 = vld [vmem:[%s11485_s4 + $0x4b8] sm:$0xff] }
 0x122   : > { %5554 = vmatpush1.bf16.msra.mxu0 %v5553_v29 }
 0x123   : > { %5654 = vmatpush1.bf16.msra.mxu1 %v5653_v30  ;;  %5556 = vmatprep.subr.bf16.mxu0 %v5555_v34  ;;  %v5565_v30 = vpack.c.bf16 %v1860_v12, %v1856_v11  ;;  %v1885_v11 = vld [vmem:[%s11485_s4 + $0x528] sm:$0xff]  ;;  %v1887_v12 = vld [vmem:[%s11485_s4 + $0x538] sm:$0xff] }
 0x124   : > { %5656 = vmatprep.subr.bf16.mxu1 %v5655_v38  ;;  %v5567_v38 = vpack.c.bf16 %v1869_v24, %v1865_v21  ;;  %v1889_v21 = vld [vmem:[%s11485_s4 + $0x548] sm:$0xff] }
 0x126   : > { %5558 = vmatpush1.bf16.msra.mxu0 %v5557_v39  ;;  %v5667_v39 = vpack.c.bf16 %v1871_v26, %v1867_v25  ;;  %v1893_v25 = vld [vmem:[%s11485_s4 + $0x568] sm:$0xff]  ;;  %v1891_v26 = vld [vmem:[%s11485_s4 + $0x558] sm:$0xff] }
 0x127   : > { %5658 = vmatpush1.bf16.msra.mxu1 %v5657_v42  ;;  %5560 = vmatprep.subr.bf16.mxu0 %v5559_v46  ;;  %v1873_v42 = vld [vmem:[%s11485_s4 + $0x4c8] sm:$0xff]  ;;  %v1875_v46 = vld [vmem:[%s11485_s4 + $0x4d8] sm:$0xff] }
 0x128   : > { %5660 = vmatprep.subr.bf16.mxu1 %v5659_v49  ;;  %v8724_v49 = vrot.slane %v8616_v53, %v8690_v27  ;;  %v5671_v4 = vpack.c.bf16 %v1879_v47, %v1875_v46  ;;  %v1896_v46 = vld [vmem:[%s11485_s4 + $0x580] sm:$0xff] }
 0x129   : > { %v1900_v47 = vld [vmem:[%s11485_s4 + $0x5a0] sm:$0xff] }
 0x1bb   : > { %v1325_v57 = vpop.f32.mrb[0].mxu0 }
 0x1bc   : > { %v6418_v60 = vadd.f32 %v1325_v57, %v8623_v55  ;;  %v8636_v61 = vpop.f32.mrb[0].mxu1  ;;  %v1327_v62 = vpop.f32.mrb[1].mxu0 }
 0x1bd   : > { %v6419_v2 = vadd.f32 %v1327_v62, %v8627_v56  ;;  %v8648_v3 = vpop.f32.mrb[1].mxu1 }
 0x1be   : > { %v1704_v13 = vmax.f32 %v6418_v60, 0.0  ;;  %v1872_v60 = vld [vmem:[%s11485_s4 + $0x4c0] sm:$0xff] }
 0x1bf   : > { %v1705_v7 = vmax.f32 %v6419_v2, 0.0  ;;  %v1331_v8 = vpop.f32.mrb[2].mxu0  ;;  %v5571_v2 = vpack.c.bf16 %v1877_v45, %v1873_v42  ;;  %v1903_v42 = vld [vmem:[%s11485_s4 + $0x5b8] sm:$0xff] }
 0x1c0   : > { %v6420_v14 = vadd.f32 %v1331_v8, %v8623_v55  ;;  %v8666_v15 = vpop.f32.mrb[2].mxu1  ;;  %v1333_v16 = vpop.f32.mrb[3].mxu0 }
 0x1c1   : > { %v6421_v22 = vadd.f32 %v1333_v16, %v8627_v56  ;;  %v8678_v23 = vpop.f32.mrb[3].mxu1  ;;  %2018 = vmatprep.mubr.f32.mxu0 %v1705_v7  ;;  %2196 = vmatprep.mubr.f32.mxu1 %v1705_v7  ;;  %v1878_v7 = vld [vmem:[%s11485_s4 + $0x4f0] sm:$0xff] }
 0x1c2   : > { %2019 = vmatmul.mubr.f32.vlgmr.msra.gmra.mrb[8].mxu0 %v1704_v13  ;;  %2197 = vmatmul.mubr.f32.vlgmr.msra.gmra.mrb[8].mxu1 %v1704_v13  ;;  %v1708_v34 = vmax.f32 %v6420_v14, 0.0  ;;  %v5573_v14 = vpack.c.bf16 %v1876_v5, %v1872_v60  ;;  %v5673_v16 = vpack.c.bf16 %v1878_v7, %v1874_v6  ;;  %v1905_v60 = vld [vmem:[%s11485_s4 + $0x5c8] sm:$0xff]  ;;  %v1904_v5 = vld [vmem:[%s11485_s4 + $0x5c0] sm:$0xff]  ;;  %v8839_v7 = vsub.s32 2, %v8608_v51 }
 0x1c3   : > { %v1709_v28 = vmax.f32 %v6421_v22, 0.0  ;;  %5562 = vmatpush1.bf16.msra.mxu0 %v5561_v9  ;;  %5662 = vmatpush1.bf16.msra.mxu1 %v5661_v10  ;;  %v1337_v29 = vpop.f32.mrb[4].mxu0  ;;  %v1881_v9 = vld [vmem:[%s11485_s4 + $0x508] sm:$0xff]  ;;  %v6427_v10 = vadd.f32 %v8648_v3, %v8724_v49  ;;  %v1880_v3 = vld [vmem:[%s11485_s4 + $0x500] sm:$0xff] }
 0x1c4   : > { %v6422_v35 = vadd.f32 %v1337_v29, %v8623_v55  ;;  %v8699_v36 = vpop.f32.mrb[4].mxu1  ;;  %v1339_v37 = vpop.f32.mrb[5].mxu0  ;;  %5564 = vmatprep.subr.bf16.mxu0 %v5563_v17  ;;  %5664 = vmatprep.subr.bf16.mxu1 %v5663_v18  ;;  %v1884_v17 = vld [vmem:[%s11485_s4 + $0x520] sm:$0xff]  ;;  %v5575_v22 = vpack.c.bf16 %v1885_v11, %v1881_v9  ;;  %v1910_v11 = vld [vmem:[%s11485_s4 + $0x5f0] sm:$0xff] }
 0x1c5   : > { %v6423_v43 = vadd.f32 %v1339_v37, %v8627_v56  ;;  %v8711_v44 = vpop.f32.mrb[5].mxu1  ;;  %2024 = vmatprep.mubr.f32.mxu0 %v1709_v28  ;;  %2202 = vmatprep.mubr.f32.mxu1 %v1709_v28  ;;  %v1895_v28 = vld [vmem:[%s11485_s4 + $0x578] sm:$0xff]  ;;  %v1707_v29 = vmax.f32 %v6427_v10, 0.0  ;;  %v1890_v37 = vld [vmem:[%s11485_s4 + $0x550] sm:$0xff]  ;;  %v1908_v6 = vld [vmem:[%s11485_s4 + $0x5e0] sm:$0xff] }
 0x1c6   : > { %2025 = vmatmul.mubr.f32.gmra.mrb[10].mxu0 %v1708_v34  ;;  %2203 = vmatmul.mubr.f32.gmra.mrb[10].mxu1 %v1708_v34  ;;  %v1712_v62 = vmax.f32 %v6422_v35, 0.0  ;;  %v5579_v34 = vpack.c.bf16 %v1893_v25, %v1889_v21  ;;  %v5679_v35 = vpack.c.bf16 %v1895_v28, %v1891_v26  ;;  %v1906_v10 = vld [vmem:[%s11485_s4 + $0x5d0] sm:$0xff]  ;;  %v1916_v21 = vld [vmem:[%s11485_s4 + $0x620] sm:$0xff]  ;;  %v2329_v25 = vld [vmem:[%s11487_s6 + $0x18] sm:$0xff] }
 0x1c7   : > { %v1713_v50 = vmax.f32 %v6423_v43, 0.0  ;;  %5566 = vmatpush1.bf16.msra.mxu0 %v5565_v30  ;;  %5666 = vmatpush1.bf16.msra.mxu1 %v5665_v31  ;;  %v1343_v57 = vpop.f32.mrb[6].mxu0  ;;  %v5577_v30 = vpack.c.bf16 %v1884_v17, %v1880_v3  ;;  %v5677_v31 = vpack.c.bf16 %v1886_v20, %v1882_v19  ;;  %v5581_v43 = vpack.c.bf16 %v1892_v33, %v1888_v32  ;;  %v1912_v17 = vld [vmem:[%s11485_s4 + $0x600] sm:$0xff]  ;;  %v2328_v33 = vld [vmem:[%s11487_s6 + $0x10] sm:$0xff] }
 0x1c8   : > { %v6424_v63 = vadd.f32 %v1343_v57, %v8623_v55  ;;  %v8730_v0 = vpop.f32.mrb[6].mxu1  ;;  %v1345_v1 = vpop.f32.mrb[7].mxu0  ;;  %5568 = vmatprep.subr.bf16.mxu0 %v5567_v38  ;;  %5668 = vmatprep.subr.bf16.mxu1 %v5667_v39  ;;  %v1894_v38 = vld [vmem:[%s11485_s4 + $0x570] sm:$0xff]  ;;  %v1897_v39 = vld [vmem:[%s11485_s4 + $0x588] sm:$0xff]  ;;  %v5683_v57 = vpack.c.bf16 %v1903_v42, %v1899_v41  ;;  %v5689_v3 = vpack.c.bf16 %v1910_v11, %v1906_v10  ;;  %v2326_v32 = vld [vmem:[%s11487_s6] sm:$0xff] }
 0x1c9   : > { %v6425_v55 = vadd.f32 %v1345_v1, %v8627_v56  ;;  %v8742_v8 = vpop.f32.mrb[7].mxu1  ;;  %2030 = vmatprep.mubr.f32.mxu0 %v1713_v50  ;;  %2208 = vmatprep.mubr.f32.mxu1 %v1713_v50  ;;  %v1883_v56 = vld [vmem:[%s11485_s4 + $0x518] sm:$0xff]  ;;  %v5681_v45 = vpack.c.bf16 %v1894_v38, %v1890_v37  ;;  %v5583_v50 = vpack.c.bf16 %v1901_v40, %v1897_v39  ;;  %v2330_v41 = vld [vmem:[%s11487_s6 + $0x20] sm:$0xff]  ;;  %v2332_v42 = vld [vmem:[%s11487_s6 + $0x30] sm:$0xff] }
 0x1ca   : > { %2031 = vmatmul.mubr.f32.gmra.mrb[12].mxu0 %v1712_v62  ;;  %2209 = vmatmul.mubr.f32.gmra.mrb[12].mxu1 %v1712_v62  ;;  %v1716_v18 = vmax.f32 %v6424_v63, 0.0  ;;  %v5675_v24 = vpack.c.bf16 %v1887_v12, %v1883_v56  ;;  %v1909_v62 = vld [vmem:[%s11485_s4 + $0x5e8] sm:$0xff]  ;;  %v1907_v63 = vld [vmem:[%s11485_s4 + $0x5d8] sm:$0xff]  ;;  %v5593_v26 = vpack.c.bf16 %v1916_v21, %v1912_v17  ;;  %v5697_v37 = vpack.c.bf16 %v2328_v33, %v2326_v32  ;;  %v2342_v10 = vld [vmem:[%s11487_s6 + $0x80] sm:$0xff] }
 0x1cb   : > { %v1717_v13 = vmax.f32 %v6425_v55, 0.0  ;;  %5570 = vmatpush1.bf16.msra.mxu0 %v5569_v58  ;;  %5670 = vmatpush1.bf16.msra.mxu1 %v5669_v59  ;;  %v1898_v58 = vld [vmem:[%s11485_s4 + $0x590] sm:$0xff]  ;;  %v1911_v1 = vld [vmem:[%s11485_s4 + $0x5f8] sm:$0xff]  ;;  %v5587_v55 = vpack.c.bf16 %v1909_v62, %v1905_v60  ;;  %v1913_v56 = vld [vmem:[%s11485_s4 + $0x608] sm:$0xff]  ;;  %v6431_v39 = vadd.f32 %v8711_v44, %v8724_v49 }
 0x1cc   : > { %5572 = vmatprep.subr.bf16.mxu0 %v5571_v2  ;;  %5672 = vmatprep.subr.bf16.mxu1 %v5671_v4  ;;  %v1902_v59 = vld [vmem:[%s11485_s4 + $0x5b0] sm:$0xff]  ;;  %v5585_v2 = vpack.c.bf16 %v1900_v47, %v1896_v46  ;;  %v5687_v9 = vpack.c.bf16 %v1911_v1, %v1907_v63  ;;  %v1917_v12 = vld [vmem:[%s11485_s4 + $0x628] sm:$0xff]  ;;  %v5701_v46 = vpack.c.bf16 %v2332_v42, %v2330_v41  ;;  %v2350_v21 = vld [vmem:[%s11487_s6 + $0xc0] sm:$0xff] }
 0x1cd   : > { %2036 = vmatprep.mubr.f32.mxu0 %v1717_v13  ;;  %2214 = vmatprep.mubr.f32.mxu1 %v1717_v13  ;;  %v5685_v4 = vpack.c.bf16 %v1902_v59, %v1898_v58  ;;  %v1915_v13 = vld [vmem:[%s11485_s4 + $0x618] sm:$0xff]  ;;  %v5591_v19 = vpack.c.bf16 %v1917_v12, %v1913_v56  ;;  %v1715_v47 = vmax.f32 %v6431_v39, 0.0  ;;  %v2334_v58 = vld [vmem:[%s11487_s6 + $0x40] sm:$0xff]  ;;  %v2336_v59 = vld [vmem:[%s11487_s6 + $0x50] sm:$0xff] }
 0x1ce   : > { %2037 = vmatmul.mubr.f32.gmra.mrb[14].mxu0 %v1716_v18  ;;  %2215 = vmatmul.mubr.f32.gmra.mrb[14].mxu1 %v1716_v18  ;;  %v970_v18 = vrot.slane %v8616_v53, %v8839_v7  ;;  %v2327_v53 = vld [vmem:[%s11487_s6 + $0x8] sm:$0xff]  ;;  %v5705_v62 = vpack.c.bf16 %v2336_v59, %v2334_v58  ;;  %v2344_v11 = vld [vmem:[%s11487_s6 + $0x90] sm:$0xff]  ;;  %v2349_v12 = vld [vmem:[%s11487_s6 + $0xb8] sm:$0xff] }
 0x1cf   : > { %5574 = vmatpush1.bf16.msra.mxu0 %v5573_v14  ;;  %5674 = vmatpush1.bf16.msra.mxu1 %v5673_v16  ;;  %v1919_v14 = vld [vmem:[%s11485_s4 + $0x638] sm:$0xff]  ;;  %v5589_v16 = vpack.c.bf16 %v1908_v6, %v1904_v5  ;;  %v2343_v5 = vld [vmem:[%s11487_s6 + $0x88] sm:$0xff]  ;;  %v2362_v39 = vld [vmem:[%s11487_s6 + $0x120] sm:$0xff] }
 0x1d0   : > { %4989 = vmatprep.mubr.msk.f32.mxu0 %vm979_vm0, %v1707_v29  ;;  %4993 = vmatprep.mubr.msk.f32.mxu1 %vm979_vm0, %v1707_v29  ;;  %v5691_v20 = vpack.c.bf16 %v1919_v14, %v1915_v13  ;;  %v6426_v29 = vadd.f32 %v8636_v61, %v970_v18  ;;  %v2333_v61 = vld [vmem:[%s11487_s6 + $0x38] sm:$0xff]  ;;  %v6432_v60 = vadd.f32 %v8730_v0, %v970_v18  ;;  %v2347_v56 = vld [vmem:[%s11487_s6 + $0xa8] sm:$0xff]  ;;  %v2370_v58 = vld [vmem:[%s11487_s6 + $0x160] sm:$0xff] }
 0x1d1   : > { %5576 = vmatprep.subr.bf16.mxu0 %v5575_v22  ;;  %5676 = vmatprep.subr.bf16.mxu1 %v5675_v24  ;;  %v1914_v22 = vld [vmem:[%s11485_s4 + $0x610] sm:$0xff]  ;;  %v2345_v0 = vld [vmem:[%s11487_s6 + $0x98] sm:$0xff]  ;;  %v5713_v13 = vpack.c.bf16 %v2344_v11, %v2342_v10  ;;  %v5715_v14 = vpack.c.bf16 %v2349_v12, %v2347_v56  ;;  %v2351_v17 = vld [vmem:[%s11487_s6 + $0xc8] sm:$0xff] }
 0x1d2   : > { %v1918_v24 = vld [vmem:[%s11485_s4 + $0x630] sm:$0xff]  ;;  %v1718_v6 = vmax.f32 %v6432_v60, 0.0  ;;  %v2367_v41 = vld [vmem:[%s11487_s6 + $0x148] sm:$0xff]  ;;  %v2369_v42 = vld [vmem:[%s11487_s6 + $0x158] sm:$0xff] }
 0x1d3   : > { %5578 = vmatpush1.bf16.msra.mxu0 %v5577_v30  ;;  %5678 = vmatpush1.bf16.msra.mxu1 %v5677_v31  ;;  %v5693_v28 = vpack.c.bf16 %v1918_v24, %v1914_v22  ;;  %v5695_v30 = vpack.c.bf16 %v2329_v25, %v2327_v53  ;;  %v6429_v31 = vadd.f32 %v8678_v23, %v8724_v49  ;;  %v2352_v22 = vld [vmem:[%s11487_s6 + $0xd0] sm:$0xff]  ;;  %v2355_v24 = vld [vmem:[%s11487_s6 + $0xe8] sm:$0xff]  ;;  %v2357_v53 = vld [vmem:[%s11487_s6 + $0xf8] sm:$0xff] }
 0x1d4   : > { %5580 = vmatprep.subr.bf16.mxu0 %v5579_v34  ;;  %5680 = vmatprep.subr.bf16.mxu1 %v5679_v35  ;;  %v2331_v34 = vld [vmem:[%s11487_s6 + $0x28] sm:$0xff]  ;;  %v1706_v35 = vmax.f32 %v6426_v29, 0.0  ;;  %v6428_v23 = vadd.f32 %v8666_v15, %v970_v18  ;;  %v5721_v25 = vpack.c.bf16 %v2352_v22, %v2350_v21  ;;  %v2356_v29 = vld [vmem:[%s11487_s6 + $0xf0] sm:$0xff]  ;;  %v2382_v56 = vld [vmem:[%s11487_s6 + $0x1c0] sm:$0xff] }
 0x1d5   : > { %v1711_v38 = vmax.f32 %v6429_v31, 0.0  ;;  %v5699_v40 = vpack.c.bf16 %v2333_v61, %v2331_v34  ;;  %v2335_v15 = vld [vmem:[%s11487_s6 + $0x48] sm:$0xff]  ;;  %v2361_v31 = vld [vmem:[%s11487_s6 + $0x118] sm:$0xff]  ;;  %v2358_v34 = vld [vmem:[%s11487_s6 + $0x100] sm:$0xff] }
 0x1d6   : > { %v1710_v44 = vmax.f32 %v6428_v23, 0.0  ;;  %v2360_v61 = vld [vmem:[%s11487_s6 + $0x110] sm:$0xff]  ;;  %v2365_v23 = vld [vmem:[%s11487_s6 + $0x138] sm:$0xff] }
 0x1d7   : > { %5582 = vmatpush1.bf16.msra.mxu0 %v5581_v43  ;;  %5682 = vmatpush1.bf16.msra.mxu1 %v5681_v45  ;;  %v2337_v43 = vld [vmem:[%s11487_s6 + $0x58] sm:$0xff]  ;;  %v6430_v45 = vadd.f32 %v8699_v36, %v970_v18  ;;  %v2339_v36 = vld [vmem:[%s11487_s6 + $0x68] sm:$0xff]  ;;  %v2372_v59 = vld [vmem:[%s11487_s6 + $0x170] sm:$0xff] }
 0x1d8   : > { %5584 = vmatprep.subr.bf16.mxu0 %v5583_v50  ;;  %5684 = vmatprep.subr.bf16.mxu1 %v5683_v57  ;;  %v6433_v50 = vadd.f32 %v8742_v8, %v8724_v49  ;;  %v5703_v57 = vpack.c.bf16 %v2337_v43, %v2335_v15  ;;  %v2341_v49 = vld [vmem:[%s11487_s6 + $0x78] sm:$0xff]  ;;  %v5735_v43 = vpack.c.bf16 %v2369_v42, %v2367_v41  ;;  %v2384_v12 = vld [vmem:[%s11487_s6 + $0x1d0] sm:$0xff]  ;;  %v9127_v41 = vld [vmem:[%s11486_s5] sm:$0xf] }
 0x1d9   : > { %v1714_v8 = vmax.f32 %v6430_v45, 0.0  ;;  %v5707_v1 = vpack.c.bf16 %v2341_v49, %v2339_v36  ;;  %v2353_v18 = vld [vmem:[%s11487_s6 + $0xd8] sm:$0xff]  ;;  %v2368_v45 = vld [vmem:[%s11487_s6 + $0x150] sm:$0xff]  ;;  %v2375_v36 = vld [vmem:[%s11487_s6 + $0x188] sm:$0xff]  ;;  %v1925_v42 = vrot.slane %v9127_v41, %v8611_v52 }
 0x1da   : > { %v1719_v63 = vmax.f32 %v6433_v50, 0.0  ;;  %v2377_v49 = vld [vmem:[%s11487_s6 + $0x198] sm:$0xff] }
 0x1db   : > { %5586 = vmatpush1.bf16.msra.mxu0 %v5585_v2  ;;  %5686 = vmatpush1.bf16.msra.mxu1 %v5685_v4  ;;  %v2338_v2 = vld [vmem:[%s11487_s6 + $0x60] sm:$0xff]  ;;  %v2340_v4 = vld [vmem:[%s11487_s6 + $0x70] sm:$0xff]  ;;  %v5743_v60 = vpack.c.bf16 %v2377_v49, %v2375_v36  ;;  %v2393_v21 = vld [vmem:[%s11487_s6 + $0x218] sm:$0xff] }
 0x1dc   : > { %5588 = vmatprep.subr.bf16.mxu0 %v5587_v55  ;;  %5688 = vmatprep.subr.bf16.mxu1 %v5687_v9  ;;  %v5709_v55 = vpack.c.bf16 %v2340_v4, %v2338_v2  ;;  %v5711_v9 = vpack.c.bf16 %v2345_v0, %v2343_v5  ;;  %v2381_v2 = vld [vmem:[%s11487_s6 + $0x1b8] sm:$0xff]  ;;  %v2378_v0 = vld [vmem:[%s11487_s6 + $0x1a0] sm:$0xff] }
 0x1dd   : > { %v2397_v36 = vld [vmem:[%s11487_s6 + $0x238] sm:$0xff] }
 0x1df   : > { %5590 = vmatpush1.bf16.msra.mxu0 %v5589_v16  ;;  %5690 = vmatpush1.bf16.msra.mxu1 %v5689_v3  ;;  %v2346_v16 = vld [vmem:[%s11487_s6 + $0xa0] sm:$0xff]  ;;  %v2348_v3 = vld [vmem:[%s11487_s6 + $0xb0] sm:$0xff] }
 0x1e0   : > { %5592 = vmatprep.subr.bf16.mxu0 %v5591_v19  ;;  %5692 = vmatprep.subr.bf16.mxu1 %v5691_v20  ;;  %v5717_v19 = vpack.c.bf16 %v2348_v3, %v2346_v16  ;;  %v5719_v20 = vpack.c.bf16 %v2353_v18, %v2351_v17  ;;  %v2389_v16 = vld [vmem:[%s11487_s6 + $0x1f8] sm:$0xff]  ;;  %v2386_v17 = vld [vmem:[%s11487_s6 + $0x1e0] sm:$0xff]  ;;  %v2388_v18 = vld [vmem:[%s11487_s6 + $0x1f0] sm:$0xff] }
 0x1e3   : > { %5594 = vmatpush1.bf16.msra.mxu0 %v5593_v26  ;;  %5694 = vmatpush1.bf16.msra.mxu1 %v5693_v28  ;;  %v5723_v26 = vpack.c.bf16 %v2357_v53, %v2355_v24  ;;  %v2354_v28 = vld [vmem:[%s11487_s6 + $0xe0] sm:$0xff]  ;;  %v2661_v24 = vld [vmem:[%s11489_s8 + $0x8] sm:$0xff] }
 0x1e4   : > { %5696 = vmatprep.subr.bf16.mxu0 %v5695_v30  ;;  %v2359_v30 = vld [vmem:[%s11487_s6 + $0x108] sm:$0xff]  ;;  %v5725_v32 = vpack.c.bf16 %v2356_v29, %v2354_v28  ;;  %v2664_v28 = vld [vmem:[%s11489_s8 + $0x20] sm:$0xff] }
 0x1e5   : > { %v5727_v33 = vpack.c.bf16 %v2361_v31, %v2359_v30  ;;  %v2665_v53 = vld [vmem:[%s11489_s8 + $0x28] sm:$0xff] }
 0x1e6   : > { %2108 = vmatmul.mubr.f32.vlgmr.msra.gmra.mrb[8].mxu0 %v1706_v35  ;;  %2286 = vmatmul.mubr.f32.vlgmr.msra.gmra.mrb[8].mxu1 %v1706_v35  ;;  %v2363_v35 = vld [vmem:[%s11487_s6 + $0x128] sm:$0xff] }
 0x1e7   : > { %4990 = vmatprep.mubr.msk.f32.mxu0 %vm979_vm0, %v1711_v38  ;;  %4994 = vmatprep.mubr.msk.f32.mxu1 %vm979_vm0, %v1711_v38  ;;  %v5731_v38 = vpack.c.bf16 %v2365_v23, %v2363_v35  ;;  %v2669_v29 = vld [vmem:[%s11489_s8 + $0x48] sm:$0xff] }
 0x1e8   : > { %5698 = vmatpush1.bf16.msra.mxu0 %v5697_v37  ;;  %v5729_v37 = vpack.c.bf16 %v2360_v61, %v2358_v34  ;;  %v2673_v30 = vld [vmem:[%s11489_s8 + $0x68] sm:$0xff]  ;;  %v2672_v34 = vld [vmem:[%s11489_s8 + $0x60] sm:$0xff] }
 0x1e9   : > { %5700 = vmatprep.subr.bf16.mxu0 %v5699_v40  ;;  %v2364_v40 = vld [vmem:[%s11487_s6 + $0x130] sm:$0xff]  ;;  %v2677_v61 = vld [vmem:[%s11489_s8 + $0x88] sm:$0xff] }
 0x1ea   : > { %2114 = vmatmul.mubr.f32.gmra.mrb[10].mxu0 %v1710_v44  ;;  %2292 = vmatmul.mubr.f32.gmra.mrb[10].mxu1 %v1710_v44  ;;  %v5733_v15 = vpack.c.bf16 %v2364_v40, %v2362_v39  ;;  %v2366_v44 = vld [vmem:[%s11487_s6 + $0x140] sm:$0xff]  ;;  %v2681_v35 = vld [vmem:[%s11489_s8 + $0xa8] sm:$0xff] }
 0x1eb   : > { %4991 = vmatprep.mubr.msk.f32.mxu0 %vm979_vm0, %v1715_v47  ;;  %4995 = vmatprep.mubr.msk.f32.mxu1 %vm979_vm0, %v1715_v47  ;;  %v2373_v47 = vld [vmem:[%s11487_s6 + $0x178] sm:$0xff]  ;;  %v5737_v50 = vpack.c.bf16 %v2368_v45, %v2366_v44  ;;  %v2680_v39 = vld [vmem:[%s11489_s8 + $0xa0] sm:$0xff] }
 0x1ec   : > { %5702 = vmatpush1.bf16.msra.mxu0 %v5701_v46  ;;  %v2371_v46 = vld [vmem:[%s11487_s6 + $0x168] sm:$0xff] }
 0x1ed   : > { %5704 = vmatprep.subr.bf16.mxu0 %v5703_v57  ;;  %v5739_v57 = vpack.c.bf16 %v2373_v47, %v2371_v46 }
 0x1ee   : > { %2120 = vmatmul.mubr.f32.gmra.mrb[12].mxu0 %v1714_v8  ;;  %2298 = vmatmul.mubr.f32.gmra.mrb[12].mxu1 %v1714_v8  ;;  %v5741_v8 = vpack.c.bf16 %v2372_v59, %v2370_v58  ;;  %v2395_v59 = vld [vmem:[%s11487_s6 + $0x228] sm:$0xff] }
 0x1ef   : > { %4992 = vmatprep.mubr.msk.f32.mxu0 %vm979_vm0, %v1719_v63  ;;  %4996 = vmatprep.mubr.msk.f32.mxu1 %vm979_vm0, %v1719_v63  ;;  %v2376_v63 = vld [vmem:[%s11487_s6 + $0x190] sm:$0xff] }
 0x1f0   : > { %5706 = vmatpush1.bf16.msra.mxu0 %v5705_v62  ;;  %v2374_v62 = vld [vmem:[%s11487_s6 + $0x180] sm:$0xff] }
 0x1f1   : > { %5708 = vmatprep.subr.bf16.mxu0 %v5707_v1  ;;  %v2379_v1 = vld [vmem:[%s11487_s6 + $0x1a8] sm:$0xff]  ;;  %v5745_v4 = vpack.c.bf16 %v2376_v63, %v2374_v62 }
 0x1f2   : > { %2126 = vmatmul.mubr.f32.gmra.mrb[14].mxu0 %v1718_v6  ;;  %2304 = vmatmul.mubr.f32.gmra.mrb[14].mxu1 %v1718_v6  ;;  %v5747_v5 = vpack.c.bf16 %v2381_v2, %v2379_v1  ;;  %v2380_v6 = vld [vmem:[%s11487_s6 + $0x1b0] sm:$0xff] }
 0x1f3   : > { %2810 = vmatprep.mubr.f32.mxu1 %v6840_v48  ;;  %v5749_v10 = vpack.c.bf16 %v2380_v6, %v2378_v0  ;;  %v2394_v0 = vld [vmem:[%s11487_s6 + $0x220] sm:$0xff]  ;;  %v2396_v6 = vld [vmem:[%s11487_s6 + $0x230] sm:$0xff] }
 0x1f4   : > { %5710 = vmatpush1.bf16.msra.mxu0 %v5709_v55  ;;  %v2383_v55 = vld [vmem:[%s11487_s6 + $0x1c8] sm:$0xff] }
 0x1f5   : > { %5712 = vmatprep.subr.bf16.mxu0 %v5711_v9  ;;  %v2385_v9 = vld [vmem:[%s11487_s6 + $0x1d8] sm:$0xff] }
 0x1f6   : > { %v5751_v11 = vpack.c.bf16 %v2385_v9, %v2383_v55  ;;  %v2399_v9 = vld [vmem:[%s11487_s6 + $0x248] sm:$0xff] }
 0x1f8   : > { %5714 = vmatpush1.bf16.msra.mxu0 %v5713_v13  ;;  %v5753_v13 = vpack.c.bf16 %v2384_v12, %v2382_v56 }
 0x1f9   : > { %5716 = vmatprep.subr.bf16.mxu0 %v5715_v14  ;;  %v2387_v14 = vld [vmem:[%s11487_s6 + $0x1e8] sm:$0xff] }
 0x1fa   : > { %v5755_v3 = vpack.c.bf16 %v2389_v16, %v2387_v14 }
 0x1fc   : > { %5718 = vmatpush1.bf16.msra.mxu0 %v5717_v19  ;;  %v5757_v19 = vpack.c.bf16 %v2388_v18, %v2386_v17 }
 0x1fd   : > { %5720 = vmatprep.subr.bf16.mxu0 %v5719_v20  ;;  %v2391_v20 = vld [vmem:[%s11487_s6 + $0x208] sm:$0xff] }
 0x1fe   : > { %v5759_v22 = vpack.c.bf16 %v2393_v21, %v2391_v20  ;;  %v2400_v20 = vld [vmem:[%s11487_s6 + $0x250] sm:$0xff]  ;;  %v9175_v21 = vrot.slane %v9127_v41, %v8690_v27 }
 0x200   : > { %5722 = vmatpush1.bf16.msra.mxu0 %v5721_v25  ;;  %v2660_v25 = vld [vmem:[%s11489_s8] sm:$0xff] }
 0x201   : > { %5724 = vmatprep.subr.bf16.mxu0 %v5723_v26  ;;  %v5795_v26 = vpack.c.bf16 %v2665_v53, %v2661_v24  ;;  %v5797_v31 = vpack.c.bf16 %v2664_v28, %v2660_v25  ;;  %v2403_v24 = vld [vmem:[%s11487_s6 + $0x268] sm:$0xff]  ;;  %v2405_v53 = vld [vmem:[%s11487_s6 + $0x278] sm:$0xff] }
 0x203   : > { %5796 = vmatprep.subr.bf16.mxu1 %v5795_v26 }
 0x204   : > { %5726 = vmatpush1.bf16.msra.mxu0 %v5725_v32  ;;  %v5799_v32 = vpack.c.bf16 %v2673_v30, %v2669_v29  ;;  %5798 = vmatpush1.bf16.msra.mxu1 %v5797_v31 }
 0x205   : > { %5728 = vmatprep.subr.bf16.mxu0 %v5727_v33  ;;  %v2668_v33 = vld [vmem:[%s11489_s8 + $0x40] sm:$0xff] }
 0x206   : > { %v5801_v23 = vpack.c.bf16 %v2672_v34, %v2668_v33  ;;  %5800 = vmatprep.subr.bf16.mxu1 %v5799_v32  ;;  %v5771_v34 = vpack.c.bf16 %v2405_v53, %v2403_v24 }
 0x208   : > { %5730 = vmatpush1.bf16.msra.mxu0 %v5729_v37  ;;  %v5803_v37 = vpack.c.bf16 %v2681_v35, %v2677_v61  ;;  %5802 = vmatpush1.bf16.msra.mxu1 %v5801_v23  ;;  %v2402_v61 = vld [vmem:[%s11487_s6 + $0x260] sm:$0xff]  ;;  %v2404_v35 = vld [vmem:[%s11487_s6 + $0x270] sm:$0xff] }
 0x209   : > { %5732 = vmatprep.subr.bf16.mxu0 %v5731_v38  ;;  %v2676_v38 = vld [vmem:[%s11489_s8 + $0x80] sm:$0xff] }
 0x20a   : > { %v5805_v40 = vpack.c.bf16 %v2680_v39, %v2676_v38  ;;  %5804 = vmatprep.subr.bf16.mxu1 %v5803_v37  ;;  %v2407_v38 = vld [vmem:[%s11487_s6 + $0x288] sm:$0xff]  ;;  %v2409_v39 = vld [vmem:[%s11487_s6 + $0x298] sm:$0xff] }
 0x20c   : > { %5734 = vmatpush1.bf16.msra.mxu0 %v5733_v15  ;;  %5806 = vmatpush1.bf16.msra.mxu1 %v5805_v40  ;;  %v1929_v15 = vrot.slane %v9127_v41, %v8619_v54 }
 0x20d   : > { %5736 = vmatprep.subr.bf16.mxu0 %v5735_v43 }
 0x210   : > { %5738 = vmatpush1.bf16.msra.mxu0 %v5737_v50  ;;  %v2390_v50 = vld [vmem:[%s11487_s6 + $0x200] sm:$0xff] }
 0x211   : > { %5740 = vmatprep.subr.bf16.mxu0 %v5739_v57  ;;  %v2392_v57 = vld [vmem:[%s11487_s6 + $0x210] sm:$0xff] }
 0x212   : > { %v5761_v62 = vpack.c.bf16 %v2392_v57, %v2390_v50  ;;  %v2411_v50 = vld [vmem:[%s11487_s6 + $0x2a8] sm:$0xff]  ;;  %v2413_v57 = vld [vmem:[%s11487_s6 + $0x2b8] sm:$0xff] }
 0x214   : > { %5742 = vmatpush1.bf16.msra.mxu0 %v5741_v8 }
 0x215   : > { %5744 = vmatprep.subr.bf16.mxu0 %v5743_v60 }
 0x218   : > { %5746 = vmatpush1.bf16.msra.mxu0 %v5745_v4 }
 0x219   : > { %5748 = vmatprep.subr.bf16.mxu0 %v5747_v5  ;;  %v5763_v5 = vpack.c.bf16 %v2397_v36, %v2395_v59  ;;  %v5779_v59 = vpack.c.bf16 %v2413_v57, %v2411_v50  ;;  %v2410_v36 = vld [vmem:[%s11487_s6 + $0x2a0] sm:$0xff]  ;;  %v2709_v50 = vld [vmem:[%s11489_s8 + $0x188] sm:$0xff] }
 0x21a   : > { %v2713_v57 = vld [vmem:[%s11489_s8 + $0x1a8] sm:$0xff] }
 0x21c   : > { %5750 = vmatpush1.bf16.msra.mxu0 %v5749_v10  ;;  %v2401_v10 = vld [vmem:[%s11487_s6 + $0x258] sm:$0xff] }
 0x21d   : > { %5752 = vmatprep.subr.bf16.mxu0 %v5751_v11  ;;  %v5767_v18 = vpack.c.bf16 %v2401_v10, %v2399_v9  ;;  %v2418_v10 = vld [vmem:[%s11487_s6 + $0x2e0] sm:$0xff] }
 0x220   : > { %5754 = vmatpush1.bf16.msra.mxu0 %v5753_v13  ;;  %v5765_v13 = vpack.c.bf16 %v2396_v6, %v2394_v0  ;;  %v2419_v0 = vld [vmem:[%s11487_s6 + $0x2e8] sm:$0xff]  ;;  %v2421_v6 = vld [vmem:[%s11487_s6 + $0x2f8] sm:$0xff] }
 0x221   : > { %5756 = vmatprep.subr.bf16.mxu0 %v5755_v3  ;;  %v5787_v9 = vpack.c.bf16 %v2421_v6, %v2419_v0  ;;  %v2663_v0 = vld [vmem:[%s11489_s8 + $0x18] sm:$0xff] }
 0x222   : > { %v2667_v6 = vld [vmem:[%s11489_s8 + $0x38] sm:$0xff] }
 0x224   : > { %5758 = vmatpush1.bf16.msra.mxu0 %v5757_v19  ;;  %v2398_v19 = vld [vmem:[%s11487_s6 + $0x240] sm:$0xff] }
 0x225   : > { %5760 = vmatprep.subr.bf16.mxu0 %v5759_v22  ;;  %v5769_v29 = vpack.c.bf16 %v2400_v20, %v2398_v19  ;;  %v2424_v19 = vld [vmem:[%s11487_s6 + $0x310] sm:$0xff] }
 0x2b9   : > { %v2109_v43 = vpop.f32.mrb[8].mxu0  ;;  %v9133_v44 = vpop.f32.mrb[8].mxu1 }
 0x2ba   : > { %v6434_v45 = vadd.f32 %v2109_v43, %v1925_v42  ;;  %v2111_v46 = vpop.f32.mrb[9].mxu0  ;;  %v2289_v47 = vpop.f32.mrb[9].mxu1 }
 0x2bb   : > { %v6435_v58 = vadd.f32 %v2111_v46, %v1929_v15  ;;  %v6443_v23 = vadd.f32 %v2289_v47, %v9175_v21  ;;  %v2408_v46 = vld [vmem:[%s11487_s6 + $0x290] sm:$0xff] }
 0x2bc   : > { %v2310_v63 = vmax.f32 %v6434_v45, 0.0  ;;  %v5775_v45 = vpack.c.bf16 %v2409_v39, %v2407_v38  ;;  %v2692_v38 = vld [vmem:[%s11489_s8 + $0x100] sm:$0xff] }
 0x2bd   : > { %v2311_v49 = vmax.f32 %v6435_v58, 0.0  ;;  %v2115_v8 = vpop.f32.mrb[10].mxu0  ;;  %v9147_v60 = vpop.f32.mrb[10].mxu1  ;;  %v2313_v47 = vmax.f32 %v6443_v23, 0.0  ;;  %v2697_v23 = vld [vmem:[%s11489_s8 + $0x128] sm:$0xff]  ;;  %v2696_v39 = vld [vmem:[%s11489_s8 + $0x120] sm:$0xff] }
 0x2be   : > { %v6436_v1 = vadd.f32 %v2115_v8, %v1925_v42  ;;  %v2117_v2 = vpop.f32.mrb[11].mxu0  ;;  %v9149_v4 = vpop.f32.mrb[11].mxu1  ;;  %v2415_v8 = vld [vmem:[%s11487_s6 + $0x2c8] sm:$0xff] }
 0x2bf   : > { %v6437_v55 = vadd.f32 %v2117_v2, %v1929_v15  ;;  %2514 = vmatprep.mubr.f32.mxu0 %v2311_v49  ;;  %v2412_v49 = vld [vmem:[%s11487_s6 + $0x2b0] sm:$0xff]  ;;  %v2414_v2 = vld [vmem:[%s11487_s6 + $0x2c0] sm:$0xff]  ;;  %v6445_v24 = vadd.f32 %v9149_v4, %v9175_v21 }
 0x2c0   : > { %2515 = vmatmul.mubr.f32.vlgmr.msra.gmra.mrb[16].mxu0 %v2310_v63  ;;  %v2314_v14 = vmax.f32 %v6436_v1, 0.0  ;;  %v5781_v63 = vpack.c.bf16 %v2412_v49, %v2410_v36  ;;  %v2712_v36 = vld [vmem:[%s11489_s8 + $0x1a0] sm:$0xff] }
 0x2c1   : > { %v2315_v11 = vmax.f32 %v6437_v55, 0.0  ;;  %5762 = vmatpush1.bf16.msra.mxu0 %v5761_v62  ;;  %v2121_v56 = vpop.f32.mrb[12].mxu0  ;;  %v9163_v12 = vpop.f32.mrb[12].mxu1  ;;  %v2417_v62 = vld [vmem:[%s11487_s6 + $0x2d8] sm:$0xff] }
 0x2c2   : > { %v6438_v16 = vadd.f32 %v2121_v56, %v1925_v42  ;;  %v2123_v3 = vpop.f32.mrb[13].mxu0  ;;  %v9165_v17 = vpop.f32.mrb[13].mxu1  ;;  %5764 = vmatprep.subr.bf16.mxu0 %v5763_v5  ;;  %v5783_v1 = vpack.c.bf16 %v2417_v62, %v2415_v8  ;;  %v2416_v5 = vld [vmem:[%s11487_s6 + $0x2d0] sm:$0xff]  ;;  %v2423_v56 = vld [vmem:[%s11487_s6 + $0x308] sm:$0xff] }
 0x2c3   : > { %v6439_v22 = vadd.f32 %v2123_v3, %v1929_v15  ;;  %2520 = vmatprep.mubr.f32.mxu0 %v2315_v11  ;;  %v5785_v55 = vpack.c.bf16 %v2416_v5, %v2414_v2  ;;  %v2420_v11 = vld [vmem:[%s11487_s6 + $0x2f0] sm:$0xff]  ;;  %v2717_v8 = vld [vmem:[%s11489_s8 + $0x1c8] sm:$0xff]  ;;  %v2720_v2 = vld [vmem:[%s11489_s8 + $0x1e0] sm:$0xff] }
 0x2c4   : > { %2521 = vmatmul.mubr.f32.gmra.mrb[18].mxu0 %v2314_v14  ;;  %v2318_v30 = vmax.f32 %v6438_v16, 0.0  ;;  %v5789_v14 = vpack.c.bf16 %v2420_v11, %v2418_v10  ;;  %v1933_v16 = vrot.slane %v9127_v41, %v8839_v7  ;;  %v2721_v62 = vld [vmem:[%s11489_s8 + $0x1e8] sm:$0xff]  ;;  %v2947_v10 = vld [vmem:[%s11491_s10 + $0x38] sm:$0xff] }
 0x2c5   : > { %v2319_v25 = vmax.f32 %v6439_v22, 0.0  ;;  %5766 = vmatpush1.bf16.msra.mxu0 %v5765_v13  ;;  %v2127_v26 = vpop.f32.mrb[14].mxu0  ;;  %v9183_v28 = vpop.f32.mrb[14].mxu1  ;;  %v2425_v13 = vld [vmem:[%s11487_s6 + $0x318] sm:$0xff] }
 0x2c6   : > { %v6440_v31 = vadd.f32 %v2127_v26, %v1925_v42  ;;  %v2129_v32 = vpop.f32.mrb[15].mxu0  ;;  %v9185_v33 = vpop.f32.mrb[15].mxu1  ;;  %5768 = vmatprep.subr.bf16.mxu0 %v5767_v18  ;;  %v5773_v42 = vpack.c.bf16 %v2404_v35, %v2402_v61  ;;  %v5791_v3 = vpack.c.bf16 %v2425_v13, %v2423_v56  ;;  %v2422_v18 = vld [vmem:[%s11487_s6 + $0x300] sm:$0xff]  ;;  %v6442_v22 = vadd.f32 %v9133_v44, %v1933_v16  ;;  %v2693_v35 = vld [vmem:[%s11489_s8 + $0x108] sm:$0xff]  ;;  %v2942_v56 = vld [vmem:[%s11491_s10 + $0x10] sm:$0xff] }
 0x2c7   : > { %v6441_v37 = vadd.f32 %v2129_v32, %v1929_v15  ;;  %2526 = vmatprep.mubr.f32.mxu0 %v2319_v25  ;;  %v2406_v15 = vld [vmem:[%s11487_s6 + $0x280] sm:$0xff]  ;;  %v5793_v20 = vpack.c.bf16 %v2424_v19, %v2422_v18  ;;  %v6444_v53 = vadd.f32 %v9147_v60, %v1933_v16  ;;  %v2317_v25 = vmax.f32 %v6445_v24, 0.0  ;;  %v2946_v13 = vld [vmem:[%s11491_s10 + $0x30] sm:$0xff]  ;;  %v2959_v24 = vld [vmem:[%s11491_s10 + $0x98] sm:$0xff] }
 0x2c8   : > { %2527 = vmatmul.mubr.f32.gmra.mrb[20].mxu0 %v2318_v30  ;;  %v2322_v43 = vmax.f32 %v6440_v31, 0.0  ;;  %v5777_v58 = vpack.c.bf16 %v2408_v46, %v2406_v15  ;;  %v2312_v41 = vmax.f32 %v6442_v22, 0.0  ;;  %v6447_v26 = vadd.f32 %v9165_v17, %v9175_v21  ;;  %v2700_v15 = vld [vmem:[%s11489_s8 + $0x140] sm:$0xff]  ;;  %v2950_v19 = vld [vmem:[%s11491_s10 + $0x50] sm:$0xff] }
 0x2c9   : > { %v2323_v40 = vmax.f32 %v6441_v37, 0.0  ;;  %5770 = vmatpush1.bf16.msra.mxu0 %v5769_v29  ;;  %v2316_v29 = vmax.f32 %v6444_v53, 0.0  ;;  %v6446_v30 = vadd.f32 %v9163_v12, %v1933_v16  ;;  %v6449_v44 = vadd.f32 %v9185_v33, %v9175_v21  ;;  %v2685_v12 = vld [vmem:[%s11489_s8 + $0xc8] sm:$0xff]  ;;  %v2704_v46 = vld [vmem:[%s11489_s8 + $0x160] sm:$0xff] }
 0x2ca   : > { %5772 = vmatprep.subr.bf16.mxu0 %v5771_v34  ;;  %v2321_v31 = vmax.f32 %v6447_v26, 0.0  ;;  %v6448_v60 = vadd.f32 %v9183_v28, %v1933_v16  ;;  %v2689_v21 = vld [vmem:[%s11489_s8 + $0xe8] sm:$0xff]  ;;  %v2684_v34 = vld [vmem:[%s11489_s8 + $0xc0] sm:$0xff]  ;;  %v5811_v37 = vpack.c.bf16 %v2697_v23, %v2693_v35  ;;  %v2951_v16 = vld [vmem:[%s11491_s10 + $0x58] sm:$0xff] }
 0x2cb   : > { %2532 = vmatprep.mubr.f32.mxu0 %v2323_v40  ;;  %v2320_v4 = vmax.f32 %v6446_v30, 0.0  ;;  %v2325_v32 = vmax.f32 %v6449_v44, 0.0  ;;  %v5807_v33 = vpack.c.bf16 %v2689_v21, %v2685_v12  ;;  %v2688_v28 = vld [vmem:[%s11489_s8 + $0xe0] sm:$0xff]  ;;  %v5813_v40 = vpack.c.bf16 %v2696_v39, %v2692_v38  ;;  %v2962_v26 = vld [vmem:[%s11491_s10 + $0xb0] sm:$0xff]  ;;  %v2991_v39 = vld [vmem:[%s11491_s10 + $0x198] sm:$0xff] }
 0x2cc   : > { %2533 = vmatmul.mubr.f32.gmra.mrb[22].mxu0 %v2322_v43  ;;  %v2324_v17 = vmax.f32 %v6448_v60, 0.0  ;;  %v5809_v61 = vpack.c.bf16 %v2688_v28, %v2684_v34  ;;  %v2705_v43 = vld [vmem:[%s11489_s8 + $0x168] sm:$0xff]  ;;  %v2970_v60 = vld [vmem:[%s11491_s10 + $0xf0] sm:$0xff]  ;;  %v2983_v28 = vld [vmem:[%s11491_s10 + $0x158] sm:$0xff] }
 0x2cd   : > { %5774 = vmatpush1.bf16.msra.mxu0 %v5773_v42  ;;  %4997 = vmatprep.mubr.msk.f32.mxu0 %vm979_vm0, %v2313_v47  ;;  %v2701_v42 = vld [vmem:[%s11489_s8 + $0x148] sm:$0xff]  ;;  %v5817_v47 = vpack.c.bf16 %v2704_v46, %v2700_v15  ;;  %v2978_v34 = vld [vmem:[%s11491_s10 + $0x130] sm:$0xff]  ;;  %v2999_v46 = vld [vmem:[%s11491_s10 + $0x1d8] sm:$0xff] }
 0x2ce   : > { %5776 = vmatprep.subr.bf16.mxu0 %v5775_v45  ;;  %5808 = vmatprep.subr.bf16.mxu1 %v5807_v33  ;;  %v5815_v45 = vpack.c.bf16 %v2705_v43, %v2701_v42  ;;  %v2974_v33 = vld [vmem:[%s11491_s10 + $0x110] sm:$0xff] }
 0x2cf   : > { %5810 = vmatpush1.bf16.msra.mxu1 %v5809_v61  ;;  %v2987_v61 = vld [vmem:[%s11491_s10 + $0x178] sm:$0xff]  ;;  %v5977_v35 = vpack.c.bf16 %v2978_v34, %v2974_v33  ;;  %v2986_v38 = vld [vmem:[%s11491_s10 + $0x170] sm:$0xff] }
 0x2d0   : > { %5812 = vmatprep.subr.bf16.mxu1 %v5811_v37  ;;  %v5979_v23 = vpack.c.bf16 %v2987_v61, %v2983_v28  ;;  %v2982_v37 = vld [vmem:[%s11491_s10 + $0x150] sm:$0xff] }
 0x2d1   : > { %5778 = vmatpush1.bf16.msra.mxu0 %v5777_v58  ;;  %v5819_v58 = vpack.c.bf16 %v2713_v57, %v2709_v50  ;;  %v5981_v42 = vpack.c.bf16 %v2986_v38, %v2982_v37  ;;  %v2994_v15 = vld [vmem:[%s11491_s10 + $0x1b0] sm:$0xff] }
 0x2d2   : > { %5780 = vmatprep.subr.bf16.mxu0 %v5779_v59  ;;  %v2708_v59 = vld [vmem:[%s11489_s8 + $0x180] sm:$0xff]  ;;  %v3054_v28 = vld [vmem:[%s11491_s10 + $0x390] sm:$0xff] }
 0x2d3   : > { %5814 = vmatpush1.bf16.msra.mxu1 %v5813_v40  ;;  %v5821_v49 = vpack.c.bf16 %v2712_v36, %v2708_v59  ;;  %v2995_v40 = vld [vmem:[%s11491_s10 + $0x1b8] sm:$0xff]  ;;  %v3002_v59 = vld [vmem:[%s11491_s10 + $0x1f0] sm:$0xff] }
 0x2d4   : > { %5816 = vmatprep.subr.bf16.mxu1 %v5815_v45  ;;  %v5983_v43 = vpack.c.bf16 %v2995_v40, %v2991_v39  ;;  %v2990_v45 = vld [vmem:[%s11491_s10 + $0x190] sm:$0xff]  ;;  %v3007_v36 = vld [vmem:[%s11491_s10 + $0x218] sm:$0xff] }
 0x2d5   : > { %5782 = vmatpush1.bf16.msra.mxu0 %v5781_v63  ;;  %v5823_v63 = vpack.c.bf16 %v2721_v62, %v2717_v8  ;;  %v5985_v50 = vpack.c.bf16 %v2994_v15, %v2990_v45  ;;  %v3058_v61 = vld [vmem:[%s11491_s10 + $0x3b0] sm:$0xff] }
 0x2d6   : > { %5784 = vmatprep.subr.bf16.mxu0 %v5783_v1  ;;  %v2716_v1 = vld [vmem:[%s11489_s8 + $0x1c0] sm:$0xff] }
 0x2d7   : > { %5818 = vmatpush1.bf16.msra.mxu1 %v5817_v47  ;;  %v5825_v5 = vpack.c.bf16 %v2720_v2, %v2716_v1  ;;  %v3003_v47 = vld [vmem:[%s11491_s10 + $0x1f8] sm:$0xff]  ;;  %v3010_v1 = vld [vmem:[%s11491_s10 + $0x230] sm:$0xff] }
 0x2d8   : > { %5820 = vmatprep.subr.bf16.mxu1 %v5819_v58  ;;  %v5987_v57 = vpack.c.bf16 %v3003_v47, %v2999_v46  ;;  %v2998_v58 = vld [vmem:[%s11491_s10 + $0x1d0] sm:$0xff]  ;;  %v3015_v2 = vld [vmem:[%s11491_s10 + $0x258] sm:$0xff] }
 0x2d9   : > { %5786 = vmatpush1.bf16.msra.mxu0 %v5785_v55  ;;  %v5827_v55 = vpack.c.bf16 %v2667_v6, %v2663_v0  ;;  %v5989_v8 = vpack.c.bf16 %v3002_v59, %v2998_v58 }
 0x2da   : > { %5788 = vmatprep.subr.bf16.mxu0 %v5787_v9  ;;  %v2943_v9 = vld [vmem:[%s11491_s10 + $0x18] sm:$0xff] }
 0x2db   : > { %5822 = vmatpush1.bf16.msra.mxu1 %v5821_v49  ;;  %v5959_v11 = vpack.c.bf16 %v2947_v10, %v2943_v9  ;;  %v3011_v49 = vld [vmem:[%s11491_s10 + $0x238] sm:$0xff]  ;;  %v3018_v9 = vld [vmem:[%s11491_s10 + $0x270] sm:$0xff] }
 0x2dc   : > { %5824 = vmatprep.subr.bf16.mxu1 %v5823_v63  ;;  %v5991_v62 = vpack.c.bf16 %v3011_v49, %v3007_v36  ;;  %v3006_v63 = vld [vmem:[%s11491_s10 + $0x210] sm:$0xff]  ;;  %v3023_v10 = vld [vmem:[%s11491_s10 + $0x298] sm:$0xff] }
 0x2dd   : > { %5790 = vmatpush1.bf16.msra.mxu0 %v5789_v14  ;;  %v5961_v14 = vpack.c.bf16 %v2946_v13, %v2942_v56  ;;  %v5993_v0 = vpack.c.bf16 %v3010_v1, %v3006_v63 }
 0x2de   : > { %5792 = vmatprep.subr.bf16.mxu0 %v5791_v3  ;;  %v2955_v3 = vld [vmem:[%s11491_s10 + $0x78] sm:$0xff] }
 0x2df   : > { %5826 = vmatpush1.bf16.msra.mxu1 %v5825_v5  ;;  %v5963_v18 = vpack.c.bf16 %v2955_v3, %v2951_v16  ;;  %v3019_v5 = vld [vmem:[%s11491_s10 + $0x278] sm:$0xff]  ;;  %v3026_v16 = vld [vmem:[%s11491_s10 + $0x2b0] sm:$0xff] }
 0x2e0   : > { %5828 = vmatprep.subr.bf16.mxu1 %v5827_v55  ;;  %v5995_v6 = vpack.c.bf16 %v3019_v5, %v3015_v2  ;;  %v3014_v55 = vld [vmem:[%s11491_s10 + $0x250] sm:$0xff]  ;;  %v3031_v3 = vld [vmem:[%s11491_s10 + $0x2d8] sm:$0xff] }
 0x2e1   : > { %5794 = vmatpush1.bf16.msra.mxu0 %v5793_v20  ;;  %v2954_v20 = vld [vmem:[%s11491_s10 + $0x70] sm:$0xff]  ;;  %v5997_v56 = vpack.c.bf16 %v3018_v9, %v3014_v55  ;;  %v2636_v9 = vld [vmem:[%s9537_s26] sm:$0xff] }
 0x2e2   : > { %5960 = vmatprep.subr.bf16.mxu0 %v5959_v11  ;;  %v5965_v22 = vpack.c.bf16 %v2954_v20, %v2950_v19  ;;  %v3027_v11 = vld [vmem:[%s11491_s10 + $0x2b8] sm:$0xff] }
 0x2e3   : > { %v5999_v13 = vpack.c.bf16 %v3027_v11, %v3023_v10  ;;  %v2662_v10 = vld [vmem:[%s11489_s8 + $0x10] sm:$0xff] }
 0x2e4   : > { %2604 = vmatmul.mubr.f32.vlgmr.msra.gmra.mrb[16].mxu0 %v2312_v41  ;;  %v2963_v41 = vld [vmem:[%s11491_s10 + $0xb8] sm:$0xff]  ;;  %v2666_v11 = vld [vmem:[%s11489_s8 + $0x30] sm:$0xff] }
 0x2e5   : > { %4998 = vmatprep.mubr.msk.f32.mxu0 %vm979_vm0, %v2317_v25  ;;  %5962 = vmatpush1.bf16.msra.mxu0 %v5961_v14  ;;  %v5967_v53 = vpack.c.bf16 %v2963_v41, %v2959_v24  ;;  %v2958_v25 = vld [vmem:[%s11491_s10 + $0x90] sm:$0xff]  ;;  %v3039_v41 = vld [vmem:[%s11491_s10 + $0x318] sm:$0xff] }
 0x2e6   : > { %5964 = vmatprep.subr.bf16.mxu0 %v5963_v18  ;;  %v5969_v30 = vpack.c.bf16 %v2962_v26, %v2958_v25  ;;  %v3022_v14 = vld [vmem:[%s11491_s10 + $0x290] sm:$0xff]  ;;  %v3035_v18 = vld [vmem:[%s11491_s10 + $0x2f8] sm:$0xff] }
 0x2e7   : > { %v6001_v19 = vpack.c.bf16 %v3026_v16, %v3022_v14  ;;  %v6003_v20 = vpack.c.bf16 %v3035_v18, %v3031_v3  ;;  %v3034_v24 = vld [vmem:[%s11491_s10 + $0x2f0] sm:$0xff]  ;;  %v2671_v14 = vld [vmem:[%s11489_s8 + $0x58] sm:$0xff]  ;;  %v5829_v18 = vpack.c.bf16 %v2666_v11, %v2662_v10 }
 0x2e8   : > { %2610 = vmatmul.mubr.f32.gmra.mrb[18].mxu0 %v2316_v29  ;;  %v2967_v29 = vld [vmem:[%s11491_s10 + $0xd8] sm:$0xff]  ;;  %v2718_v10 = vld [vmem:[%s11489_s8 + $0x1d0] sm:$0xff] }
 0x2e9   : > { %4999 = vmatprep.mubr.msk.f32.mxu0 %vm979_vm0, %v2321_v31  ;;  %5966 = vmatpush1.bf16.msra.mxu0 %v5965_v22  ;;  %v2971_v31 = vld [vmem:[%s11491_s10 + $0xf8] sm:$0xff]  ;;  %v3030_v22 = vld [vmem:[%s11491_s10 + $0x2d0] sm:$0xff] }
 0x2ea   : > { %5968 = vmatprep.subr.bf16.mxu0 %v5967_v53  ;;  %v5971_v44 = vpack.c.bf16 %v2971_v31, %v2967_v29  ;;  %v3043_v53 = vld [vmem:[%s11491_s10 + $0x338] sm:$0xff]  ;;  %v6005_v25 = vpack.c.bf16 %v3034_v24, %v3030_v22  ;;  %v3038_v29 = vld [vmem:[%s11491_s10 + $0x310] sm:$0xff] }
 0x2eb   : > { %v6007_v26 = vpack.c.bf16 %v3043_v53, %v3039_v41  ;;  %v3047_v31 = vld [vmem:[%s11491_s10 + $0x358] sm:$0xff]  ;;  %v2670_v24 = vld [vmem:[%s11489_s8 + $0x50] sm:$0xff] }
 0x2ec   : > { %2616 = vmatmul.mubr.f32.gmra.mrb[20].mxu0 %v2320_v4  ;;  %v2966_v4 = vld [vmem:[%s11491_s10 + $0xd0] sm:$0xff]  ;;  %v2675_v16 = vld [vmem:[%s11489_s8 + $0x78] sm:$0xff] }
 0x2ed   : > { %5000 = vmatprep.mubr.msk.f32.mxu0 %vm979_vm0, %v2325_v32  ;;  %v2975_v32 = vld [vmem:[%s11491_s10 + $0x118] sm:$0xff]  ;;  %5970 = vmatpush1.bf16.msra.mxu0 %v5969_v30  ;;  %v5973_v12 = vpack.c.bf16 %v2970_v60, %v2966_v4  ;;  %v3042_v30 = vld [vmem:[%s11491_s10 + $0x330] sm:$0xff]  ;;  %v5831_v22 = vpack.c.bf16 %v2675_v16, %v2671_v14 }
 0x2ee   : > { %5972 = vmatprep.subr.bf16.mxu0 %v5971_v44  ;;  %v3051_v44 = vld [vmem:[%s11491_s10 + $0x378] sm:$0xff]  ;;  %v6009_v4 = vpack.c.bf16 %v3042_v30, %v3038_v29  ;;  %v2674_v41 = vld [vmem:[%s11489_s8 + $0x70] sm:$0xff] }
 0x2ef   : > { %v6011_v60 = vpack.c.bf16 %v3051_v44, %v3047_v31  ;;  %v5833_v30 = vpack.c.bf16 %v2674_v41, %v2670_v24  ;;  %v2638_v31 = vld [vmem:[%s9537_s26 + $0x10] sm:$0xff] }
 0x2f0   : > { %2622 = vmatmul.mubr.f32.gmra.mrb[22].mxu0 %v2324_v17  ;;  %v2979_v17 = vld [vmem:[%s11491_s10 + $0x138] sm:$0xff]  ;;  %v2722_v11 = vld [vmem:[%s11489_s8 + $0x1f0] sm:$0xff] }
 0x2f1   : > { %v5975_v21 = vpack.c.bf16 %v2979_v17, %v2975_v32  ;;  %5974 = vmatpush1.bf16.msra.mxu0 %v5973_v12  ;;  %v3046_v32 = vld [vmem:[%s11491_s10 + $0x350] sm:$0xff]  ;;  %v3055_v12 = vld [vmem:[%s11491_s10 + $0x398] sm:$0xff]  ;;  %v5857_v14 = vpack.c.bf16 %v2722_v11, %v2718_v10  ;;  %v3012_v11 = vld [vmem:[%s11491_s10 + $0x240] sm:$0xff] }
 0x2f2   : > { %v3050_v17 = vld [vmem:[%s11491_s10 + $0x370] sm:$0xff] }
 0x2f3   : > { %5976 = vmatprep.subr.bf16.mxu0 %v5975_v21  ;;  %v3059_v21 = vld [vmem:[%s11491_s10 + $0x3b8] sm:$0xff]  ;;  %v6013_v33 = vpack.c.bf16 %v3050_v17, %v3046_v32  ;;  %v2682_v32 = vld [vmem:[%s11489_s8 + $0xb0] sm:$0xff] }
 0x2f4   : > { %v6015_v34 = vpack.c.bf16 %v3059_v21, %v3055_v12  ;;  %v2687_v12 = vld [vmem:[%s11489_s8 + $0xd8] sm:$0xff] }
 0x2f5   : > { %5978 = vmatpush1.bf16.msra.mxu0 %v5977_v35  ;;  %v2426_v35 = vld [vmem:[%s11488_s7] sm:$0x3]  ;;  %v2691_v21 = vld [vmem:[%s11489_s8 + $0xf8] sm:$0xff] }
 0x2f6   : > { %5980 = vmatprep.subr.bf16.mxu0 %v5979_v23  ;;  %v6017_v23 = vpack.c.bf16 %v3058_v61, %v3054_v28  ;;  %v2431_v37 = vrot.slane %v2426_v35, %v8611_v52  ;;  %v2435_v38 = vrot.slane %v2426_v35, %v8619_v54  ;;  %v2639_v28 = vld [vmem:[%s9537_s26 + $0x18] sm:$0xff]  ;;  %v5839_v35 = vpack.c.bf16 %v2691_v21, %v2687_v12  ;;  %v2964_v21 = vld [vmem:[%s11491_s10 + $0xc0] sm:$0xff] }
 0x2f9   : > { %5982 = vmatpush1.bf16.msra.mxu0 %v5981_v42 }
 0x2fa   : > { %5984 = vmatprep.subr.bf16.mxu0 %v5983_v43 }
 0x2fd   : > { %5986 = vmatpush1.bf16.msra.mxu0 %v5985_v50 }
 0x2fe   : > { %5988 = vmatprep.subr.bf16.mxu0 %v5987_v57 }
 0x301   : > { %5990 = vmatpush1.bf16.msra.mxu0 %v5989_v8 }
 0x302   : > { %5992 = vmatprep.subr.bf16.mxu0 %v5991_v62 }
 0x305   : > { %5994 = vmatpush1.bf16.msra.mxu0 %v5993_v0 }
 0x306   : > { %5996 = vmatprep.subr.bf16.mxu0 %v5995_v6 }
 0x309   : > { %5998 = vmatpush1.bf16.msra.mxu0 %v5997_v56 }
 0x30a   : > { %6000 = vmatprep.subr.bf16.mxu0 %v5999_v13 }
 0x30d   : > { %6002 = vmatpush1.bf16.msra.mxu0 %v6001_v19  ;;  %v2637_v19 = vld [vmem:[%s9537_s26 + $0x8] sm:$0xff]  ;;  %s11518_s26 = sld [smem:[#allocation12_spill]] }
 0x30e   : > { %6004 = vmatprep.subr.bf16.mxu0 %v6003_v20 }
 0x311   : > { %6006 = vmatpush1.bf16.msra.mxu0 %v6005_v25  ;;  %v2679_v25 = vld [vmem:[%s11489_s8 + $0x98] sm:$0xff] }
 0x312   : > { %6008 = vmatprep.subr.bf16.mxu0 %v6007_v26  ;;  %v2683_v26 = vld [vmem:[%s11489_s8 + $0xb8] sm:$0xff] }
 0x313   : > { %s11435_s14 = scalar_lea.hbm %s11518_s26, %s6612_s30 }
 0x315   : > { %6010 = vmatpush1.bf16.msra.mxu0 %v6009_v4  ;;  %v5835_v4 = vpack.c.bf16 %v2683_v26, %v2679_v25  ;;  %v2952_v25 = vld [vmem:[%s11491_s10 + $0x60] sm:$0xff]  ;;  %v2957_v26 = vld [vmem:[%s11491_s10 + $0x88] sm:$0xff] }
 0x316   : > { %6012 = vmatprep.subr.bf16.mxu0 %v6011_v60  ;;  %v2678_v60 = vld [vmem:[%s11489_s8 + $0x90] sm:$0xff] }
 0x319   : > { %6014 = vmatpush1.bf16.msra.mxu0 %v6013_v33 }
 0x31a   : > { %6016 = vmatprep.subr.bf16.mxu0 %v6015_v34  ;;  %v5837_v34 = vpack.c.bf16 %v2682_v32, %v2678_v60  ;;  %v2960_v60 = vld [vmem:[%s11491_s10 + $0xa0] sm:$0xff]  ;;  %v2965_v32 = vld [vmem:[%s11491_s10 + $0xc8] sm:$0xff] }
 0x31d   : > { %6018 = vmatpush1.bf16.msra.mxu0 %v6017_v23  ;;  %v2686_v23 = vld [vmem:[%s11489_s8 + $0xd0] sm:$0xff] }
 0x3b7   : > { %v2605_v39 = vpop.f32.mrb[16].mxu0 }
 0x3b8   : > { %v6450_v40 = vadd.f32 %v2605_v39, %v2431_v37  ;;  %v2607_v42 = vpop.f32.mrb[17].mxu0  ;;  %v2695_v39 = vld [vmem:[%s11489_s8 + $0x118] sm:$0xff] }
 0x3b9   : > { %v6451_v43 = vadd.f32 %v2607_v42, %v2435_v38 }
 0x3ba   : > { %2628 = vst [vmem:[%s9525_s25] sm:$0xff] %v6450_v40 }
 0x3bb   : > { %2629 = vst [vmem:[%s9525_s25 + $0x8] sm:$0xff] %v6451_v43  ;;  %v2640_v45 = vmul.f32 0.5, %v6451_v43  ;;  %v2611_v15 = vpop.f32.mrb[18].mxu0 }
 0x3bc   : > { %v6452_v46 = vadd.f32 %v2611_v15, %v2431_v37  ;;  %v2613_v47 = vpop.f32.mrb[19].mxu0 }
 0x3bd   : > { %v2644_v50 = vmul.f32 1.442695, %v2640_v45  ;;  %v6453_v57 = vadd.f32 %v2613_v47, %v2435_v38  ;;  %v2698_v47 = vld [vmem:[%s11489_s8 + $0x130] sm:$0xff] }
 0x3be   : > { %2630 = vst [vmem:[%s9525_s25 + $0x10] sm:$0xff] %v6452_v46 }
 0x3bf   : > { %6656 = vpow2.f32 %v2644_v50  ;;  %2631 = vst [vmem:[%s9525_s25 + $0x18] sm:$0xff] %v6453_v57  ;;  %v2641_v58 = vmul.f32 0.5, %v6453_v57  ;;  %v2617_v59 = vpop.f32.mrb[20].mxu0  ;;  %v2703_v50 = vld [vmem:[%s11489_s8 + $0x158] sm:$0xff] }
 0x3c0   : > { %v6454_v36 = vadd.f32 %v2617_v59, %v2431_v37  ;;  %v2619_v49 = vpop.f32.mrb[21].mxu0  ;;  %v2707_v57 = vld [vmem:[%s11489_s8 + $0x178] sm:$0xff] }
 0x3c1   : > { %v2646_v8 = vmul.f32 1.442695, %v2641_v58  ;;  %v6455_v62 = vadd.f32 %v2619_v49, %v2435_v38  ;;  %v5847_v59 = vpack.c.bf16 %v2707_v57, %v2703_v50  ;;  %v2706_v49 = vld [vmem:[%s11489_s8 + $0x170] sm:$0xff]  ;;  %v2992_v50 = vld [vmem:[%s11491_s10 + $0x1a0] sm:$0xff]  ;;  %v2997_v57 = vld [vmem:[%s11491_s10 + $0x1c8] sm:$0xff] }
 0x3c2   : > { %2632 = vst [vmem:[%s9525_s25 + $0x20] sm:$0xff] %v6454_v36 }
 0x3c3   : > { %6658 = vpow2.f32 %v2646_v8  ;;  %2633 = vst [vmem:[%s9525_s25 + $0x28] sm:$0xff] %v6455_v62  ;;  %v2642_v63 = vmul.f32 0.5, %v6455_v62  ;;  %v2623_v1 = vpop.f32.mrb[22].mxu0  ;;  %v2711_v8 = vld [vmem:[%s11489_s8 + $0x198] sm:$0xff] }
 0x3c4   : > { %v6456_v2 = vadd.f32 %v2623_v1, %v2431_v37  ;;  %v2625_v5 = vpop.f32.mrb[23].mxu0  ;;  %v2690_v37 = vld [vmem:[%s11489_s8 + $0xf0] sm:$0xff]  ;;  %v2715_v62 = vld [vmem:[%s11489_s8 + $0x1b8] sm:$0xff] }
 0x3c5   : > { %v2648_v0 = vmul.f32 1.442695, %v2642_v63  ;;  %v6457_v6 = vadd.f32 %v2625_v5, %v2435_v38  ;;  %v5841_v43 = vpack.c.bf16 %v2690_v37, %v2686_v23  ;;  %v5851_v1 = vpack.c.bf16 %v2715_v62, %v2711_v8  ;;  %v2714_v5 = vld [vmem:[%s11489_s8 + $0x1b0] sm:$0xff]  ;;  %v2972_v23 = vld [vmem:[%s11491_s10 + $0x100] sm:$0xff]  ;;  %v3005_v62 = vld [vmem:[%s11491_s10 + $0x208] sm:$0xff] }
 0x3c6   : > { %2634 = vst [vmem:[%s9525_s25 + $0x30] sm:$0xff] %v6456_v2  ;;  %v2976_v37 = vld [vmem:[%s11491_s10 + $0x120] sm:$0xff] }
 0x3c7   : > { %6660 = vpow2.f32 %v2648_v0  ;;  %2635 = vst [vmem:[%s9525_s25 + $0x38] sm:$0xff] %v6457_v6  ;;  %v2643_v55 = vmul.f32 0.5, %v6457_v6  ;;  %v2719_v0 = vld [vmem:[%s11489_s8 + $0x1d8] sm:$0xff]  ;;  %v3000_v8 = vld [vmem:[%s11491_s10 + $0x1e0] sm:$0xff]  ;;  %s6780_s25 = sshll.u32 %s6842_s22, 4  ;;  %s6781_s25 = int_to_ptr.vmem [resolvable:$false] %s6780_s25 }
 0x3c8   : > { %v2723_v6 = vld [vmem:[%s11489_s8 + $0x1f8] sm:$0xff]  ;;  %s6782_s27 = scalar_lea.vmem %s6781_s25, 7168  ;;  %p6783_p0 = scmp.lt.s32.totalorder %s11430_s21, %s6781_s25 }
 0x3c9   : > { %v6657_v56 = vpop.eup %6656  ;;  %v2650_v13 = vmul.f32 1.442695, %v2643_v55  ;;  %p6784_p1 = scmp.lt.s32.totalorder %s6782_s27, %s6776_s16 }
 0x3ca   : > { %v2652_v3 = vmul.f32 %v6657_v56, %v2636_v9  ;;  %v5855_v9 = vpack.c.bf16 %v2723_v6, %v2719_v0  ;;  %v2941_v56 = vld [vmem:[%s11491_s10 + $0x8] sm:$0xff]  ;;  %v3008_v0 = vld [vmem:[%s11491_s10 + $0x220] sm:$0xff] }
 0x3cb   : > { %6662 = vpow2.f32 %v2650_v13  ;;  %v2945_v13 = vld [vmem:[%s11491_s10 + $0x28] sm:$0xff]  ;;  %p6785_p2 = por %p6784_p1, %p6783_p0 }
 0x3cc   : > { %v9555_v20 = vadd.f32 %v6450_v40, %v2652_v3  ;;  %v2699_v40 = vld [vmem:[%s11489_s8 + $0x138] sm:$0xff]  ;;  %v5859_v16 = vpack.c.bf16 %v2945_v13, %v2941_v56  ;;  %v2940_v3 = vld [vmem:[%s11491_s10] sm:$0xff]  ;;  %v3013_v6 = vld [vmem:[%s11491_s10 + $0x248] sm:$0xff] }
 0x3cd   : > { %v6659_v53 = vpop.eup %6658  ;;  %v5843_v15 = vpack.c.bf16 %v2699_v40, %v2695_v39  ;;  %v2980_v40 = vld [vmem:[%s11491_s10 + $0x140] sm:$0xff]  ;;  %v3021_v13 = vld [vmem:[%s11491_s10 + $0x288] sm:$0xff]  ;;  %p6786_p3 = pnand %p6785_p2, %p6779_p13 }
 0x3ce   : > { %2811 = vmatmul.mubr.f32.vlgmr.msra.gmra.mrb[16].mxu1 %v9555_v20  ;;  %v2653_v29 = vmul.f32 %v6659_v53, %v2637_v19  ;;  %v2949_v19 = vld [vmem:[%s11491_s10 + $0x48] sm:$0xff]  ;;  %v2948_v53 = vld [vmem:[%s11491_s10 + $0x40] sm:$0xff] }
 0x3cf   : > { %5830 = vmatpush1.bf16.msra.mxu1 %v5829_v18  ;;  %2816 = vmatprep.mubr.f32.mxu1 %v6840_v48  ;;  %v2944_v18 = vld [vmem:[%s11491_s10 + $0x20] sm:$0xff] }
 0x3d0   : > { %5832 = vmatprep.subr.bf16.mxu1 %v5831_v22  ;;  %v9572_v44 = vadd.f32 %v6452_v46, %v2653_v29  ;;  %v2694_v46 = vld [vmem:[%s11489_s8 + $0x110] sm:$0xff]  ;;  %v2953_v22 = vld [vmem:[%s11491_s10 + $0x68] sm:$0xff]  ;;  %v5861_v24 = vpack.c.bf16 %v2944_v18, %v2940_v3  ;;  %v3016_v56 = vld [vmem:[%s11491_s10 + $0x260] sm:$0xff] }
 0x3d1   : > { %v6661_v17 = vpop.eup %6660  ;;  %v5845_v58 = vpack.c.bf16 %v2698_v47, %v2694_v46  ;;  %v5863_v41 = vpack.c.bf16 %v2953_v22, %v2949_v19  ;;  %v2961_v29 = vld [vmem:[%s11491_s10 + $0xa8] sm:$0xff]  ;;  %v2988_v47 = vld [vmem:[%s11491_s10 + $0x180] sm:$0xff] }
 0x3d2   : > { %2817 = vmatmul.mubr.f32.gmra.mrb[18].mxu1 %v9572_v44  ;;  %v2654_v33 = vmul.f32 %v6661_v17, %v2638_v31  ;;  %v5867_v31 = vpack.c.bf16 %v2961_v29, %v2957_v26  ;;  %v3020_v18 = vld [vmem:[%s11491_s10 + $0x280] sm:$0xff]  ;;  %v3029_v22 = vld [vmem:[%s11491_s10 + $0x2c8] sm:$0xff] }
 0x3d3   : > { %5834 = vmatpush1.bf16.msra.mxu1 %v5833_v30  ;;  %2822 = vmatprep.mubr.f32.mxu1 %v6840_v48  ;;  %v5865_v30 = vpack.c.bf16 %v2952_v25, %v2948_v53  ;;  %v3024_v19 = vld [vmem:[%s11491_s10 + $0x2a0] sm:$0xff]  ;;  %v3037_v29 = vld [vmem:[%s11491_s10 + $0x308] sm:$0xff] }
 0x3d4   : > { %5836 = vmatprep.subr.bf16.mxu1 %v5835_v4  ;;  %v9589_v61 = vadd.f32 %v6454_v36, %v2654_v33  ;;  %v2702_v36 = vld [vmem:[%s11489_s8 + $0x150] sm:$0xff]  ;;  %v2956_v4 = vld [vmem:[%s11491_s10 + $0x80] sm:$0xff] }
 0x3d5   : > { %v6663_v38 = vpop.eup %6662  ;;  %v5849_v63 = vpack.c.bf16 %v2706_v49, %v2702_v36  ;;  %v5869_v17 = vpack.c.bf16 %v2960_v60, %v2956_v4  ;;  %v2968_v33 = vld [vmem:[%s11491_s10 + $0xe0] sm:$0xff] }
 0x3d6   : > { %2823 = vmatmul.mubr.f32.gmra.mrb[20].mxu1 %v9589_v61  ;;  %v2655_v42 = vmul.f32 %v6663_v38, %v2639_v28  ;;  %v5873_v28 = vpack.c.bf16 %v2968_v33, %v2964_v21  ;;  %v2981_v38 = vld [vmem:[%s11491_s10 + $0x148] sm:$0xff]  ;;  %v2996_v49 = vld [vmem:[%s11491_s10 + $0x1c0] sm:$0xff] }
 0x3d7   : > { %5838 = vmatpush1.bf16.msra.mxu1 %v5837_v34  ;;  %2828 = vmatprep.mubr.f32.mxu1 %v6840_v48  ;;  %v2973_v34 = vld [vmem:[%s11491_s10 + $0x108] sm:$0xff]  ;;  %v3028_v25 = vld [vmem:[%s11491_s10 + $0x2c0] sm:$0xff] }
 0x3d8   : > { %5840 = vmatprep.subr.bf16.mxu1 %v5839_v35  ;;  %v9605_v45 = vadd.f32 %v6456_v2, %v2655_v42  ;;  %v2710_v2 = vld [vmem:[%s11489_s8 + $0x190] sm:$0xff]  ;;  %v2984_v42 = vld [vmem:[%s11491_s10 + $0x160] sm:$0xff] }
 0x3d9   : > { %v5853_v55 = vpack.c.bf16 %v2714_v5, %v2710_v2  ;;  %v3004_v5 = vld [vmem:[%s11491_s10 + $0x200] sm:$0xff] }
 0x3da   : > { %2829 = vmatmul.mubr.f32.gmra.mrb[22].mxu1 %v9605_v45  ;;  %v3032_v26 = vld [vmem:[%s11491_s10 + $0x2e0] sm:$0xff] }
 0x3db   : > { %5842 = vmatpush1.bf16.msra.mxu1 %v5841_v43  ;;  %2899 = vmatprep.mubr.f32.mxu1 %v6840_v48  ;;  %v2989_v43 = vld [vmem:[%s11491_s10 + $0x188] sm:$0xff]  ;;  %v3036_v60 = vld [vmem:[%s11491_s10 + $0x300] sm:$0xff] }
 0x3dc   : > { %5844 = vmatprep.subr.bf16.mxu1 %v5843_v15  ;;  %v5881_v15 = vpack.c.bf16 %v2984_v42, %v2980_v40  ;;  %v3044_v33 = vld [vmem:[%s11491_s10 + $0x340] sm:$0xff]  ;;  %v3067_v40 = vld [vmem:[%s11491_s10 + $0x3f8] sm:$0xff] }
 0x3df   : > { %5846 = vmatpush1.bf16.msra.mxu1 %v5845_v58  ;;  %v3001_v58 = vld [vmem:[%s11491_s10 + $0x1e8] sm:$0xff] }
 0x3e0   : > { %5848 = vmatprep.subr.bf16.mxu1 %v5847_v59  ;;  %v5885_v59 = vpack.c.bf16 %v2992_v50, %v2988_v47  ;;  %v5887_v36 = vpack.c.bf16 %v3001_v58, %v2997_v57  ;;  %v3060_v47 = vld [vmem:[%s11491_s10 + $0x3c0] sm:$0xff]  ;;  %v3069_v58 = vld [vmem:[%s11491_s10 + $0x408] sm:$0xff] }
 0x3e1   : > { %v3064_v50 = vld [vmem:[%s11491_s10 + $0x3e0] sm:$0xff] }
 0x3e3   : > { %5850 = vmatpush1.bf16.msra.mxu1 %v5849_v63  ;;  %v3009_v63 = vld [vmem:[%s11491_s10 + $0x228] sm:$0xff] }
 0x3e4   : > { %5852 = vmatprep.subr.bf16.mxu1 %v5851_v1  ;;  %v5889_v1 = vpack.c.bf16 %v3000_v8, %v2996_v49  ;;  %v5891_v2 = vpack.c.bf16 %v3009_v63, %v3005_v62  ;;  %v3075_v49 = vld [vmem:[%s11491_s10 + $0x438] sm:$0xff]  ;;  %v5921_v8 = vpack.c.bf16 %v3064_v50, %v3060_v47 }
 0x3e5   : > { %v3095_v47 = vld [vmem:[%s11491_s10 + $0x4d8] sm:$0xff] }
 0x3e6   : > { %v3099_v50 = vld [vmem:[%s11491_s10 + $0x4f8] sm:$0xff] }
 0x3e7   : > { %5854 = vmatpush1.bf16.msra.mxu1 %v5853_v55  ;;  %v3017_v55 = vld [vmem:[%s11491_s10 + $0x268] sm:$0xff] }
 0x3e8   : > { %5856 = vmatprep.subr.bf16.mxu1 %v5855_v9  ;;  %v5893_v9 = vpack.c.bf16 %v3008_v0, %v3004_v5  ;;  %v5895_v10 = vpack.c.bf16 %v3017_v55, %v3013_v6  ;;  %v3068_v6 = vld [vmem:[%s11491_s10 + $0x400] sm:$0xff] }
 0x3e9   : > { %v3072_v55 = vld [vmem:[%s11491_s10 + $0x420] sm:$0xff] }
 0x3eb   : > { %5858 = vmatpush1.bf16.msra.mxu1 %v5857_v14  ;;  %v3025_v14 = vld [vmem:[%s11491_s10 + $0x2a8] sm:$0xff] }
 0x3ec   : > { %5860 = vmatprep.subr.bf16.mxu1 %v5859_v16  ;;  %v5897_v16 = vpack.c.bf16 %v3016_v56, %v3012_v11  ;;  %v5899_v3 = vpack.c.bf16 %v3025_v14, %v3021_v13  ;;  %v3070_v11 = vld [vmem:[%s11491_s10 + $0x410] sm:$0xff]  ;;  %v3077_v13 = vld [vmem:[%s11491_s10 + $0x448] sm:$0xff] }
 0x3ed   : > { %v3074_v56 = vld [vmem:[%s11491_s10 + $0x430] sm:$0xff] }
 0x3ee   : > { %2900 = vmatmul.mubr.f32.vlgmr.msra.gmra.mrb[24].mxu1 %v9555_v20  ;;  %v2969_v20 = vld [vmem:[%s11491_s10 + $0xe8] sm:$0xff] }
 0x3ef   : > { %2905 = vmatprep.mubr.f32.mxu1 %v6840_v48  ;;  %5862 = vmatpush1.bf16.msra.mxu1 %v5861_v24  ;;  %v5871_v12 = vpack.c.bf16 %v2969_v20, %v2965_v32  ;;  %v3033_v24 = vld [vmem:[%s11491_s10 + $0x2e8] sm:$0xff]  ;;  %v3040_v32 = vld [vmem:[%s11491_s10 + $0x320] sm:$0xff] }
 0x3f0   : > { %5864 = vmatprep.subr.bf16.mxu1 %v5863_v41  ;;  %v5901_v41 = vpack.c.bf16 %v3024_v19, %v3020_v18  ;;  %v5903_v53 = vpack.c.bf16 %v3033_v24, %v3029_v22  ;;  %v3045_v20 = vld [vmem:[%s11491_s10 + $0x348] sm:$0xff]  ;;  %v3083_v18 = vld [vmem:[%s11491_s10 + $0x478] sm:$0xff]  ;;  %v5925_v24 = vpack.c.bf16 %v3072_v55, %v3068_v6  ;;  %v6035_v55 = vpack.c.bf16 %v3099_v50, %v3095_v47 }
 0x3f2   : > { %2906 = vmatmul.mubr.f32.gmra.mrb[26].mxu1 %v9572_v44  ;;  %v2977_v44 = vld [vmem:[%s11491_s10 + $0x128] sm:$0xff] }
 0x3f3   : > { %2911 = vmatprep.mubr.f32.mxu1 %v6840_v48  ;;  %5866 = vmatpush1.bf16.msra.mxu1 %v5865_v30  ;;  %v5875_v35 = vpack.c.bf16 %v2977_v44, %v2973_v34  ;;  %v3041_v30 = vld [vmem:[%s11491_s10 + $0x328] sm:$0xff]  ;;  %v3048_v34 = vld [vmem:[%s11491_s10 + $0x360] sm:$0xff] }
 0x3f4   : > { %5868 = vmatprep.subr.bf16.mxu1 %v5867_v31  ;;  %v5905_v31 = vpack.c.bf16 %v3032_v26, %v3028_v25  ;;  %v5907_v4 = vpack.c.bf16 %v3041_v30, %v3037_v29  ;;  %v3053_v44 = vld [vmem:[%s11491_s10 + $0x388] sm:$0xff]  ;;  %v3080_v25 = vld [vmem:[%s11491_s10 + $0x460] sm:$0xff] }
 0x3f6   : > { %2912 = vmatmul.mubr.f32.gmra.mrb[28].mxu1 %v9589_v61  ;;  %v5877_v61 = vpack.c.bf16 %v2976_v37, %v2972_v23  ;;  %v3052_v37 = vld [vmem:[%s11491_s10 + $0x380] sm:$0xff] }
 0x3f7   : > { %2917 = vmatprep.mubr.f32.mxu1 %v6840_v48  ;;  %5870 = vmatpush1.bf16.msra.mxu1 %v5869_v17  ;;  %v2985_v48 = vld [vmem:[%s11491_s10 + $0x168] sm:$0xff] }
 0x3f8   : > { %5872 = vmatprep.subr.bf16.mxu1 %v5871_v12  ;;  %v5879_v39 = vpack.c.bf16 %v2985_v48, %v2981_v38  ;;  %v3049_v17 = vld [vmem:[%s11491_s10 + $0x368] sm:$0xff]  ;;  %v5909_v12 = vpack.c.bf16 %v3040_v32, %v3036_v60  ;;  %v3056_v38 = vld [vmem:[%s11491_s10 + $0x3a0] sm:$0xff]  ;;  %v3078_v60 = vld [vmem:[%s11491_s10 + $0x450] sm:$0xff] }
 0x3f9   : > { %v5911_v21 = vpack.c.bf16 %v3049_v17, %v3045_v20  ;;  %v3061_v48 = vld [vmem:[%s11491_s10 + $0x3c8] sm:$0xff]  ;;  %v5917_v42 = vpack.c.bf16 %v3056_v38, %v3052_v37  ;;  %v3082_v32 = vld [vmem:[%s11491_s10 + $0x470] sm:$0xff]  ;;  %v3088_v37 = vld [vmem:[%s11491_s10 + $0x4a0] sm:$0xff] }
 0x3fa   : > { %2918 = vmatmul.mubr.f32.gmra.mrb[30].mxu1 %v9605_v45  ;;  %v2993_v45 = vld [vmem:[%s11491_s10 + $0x1a8] sm:$0xff] }
 0x3fb   : > { %5874 = vmatpush1.bf16.msra.mxu1 %v5873_v28  ;;  %v5883_v46 = vpack.c.bf16 %v2993_v45, %v2989_v43  ;;  %v3057_v28 = vld [vmem:[%s11491_s10 + $0x3a8] sm:$0xff]  ;;  %v3062_v45 = vld [vmem:[%s11491_s10 + $0x3d0] sm:$0xff] }
 0x3fc   : > { %5876 = vmatprep.subr.bf16.mxu1 %v5875_v35  ;;  %v5913_v35 = vpack.c.bf16 %v3048_v34, %v3044_v33  ;;  %v5915_v23 = vpack.c.bf16 %v3057_v28, %v3053_v44  ;;  %v3085_v20 = vld [vmem:[%s11491_s10 + $0x488] sm:$0xff]  ;;  %v3091_v33 = vld [vmem:[%s11491_s10 + $0x4b8] sm:$0xff] }
 0x3ff   : > { %5878 = vmatpush1.bf16.msra.mxu1 %v5877_v61  ;;  %v3065_v61 = vld [vmem:[%s11491_s10 + $0x3e8] sm:$0xff] }
 0x400   : > { %5880 = vmatprep.subr.bf16.mxu1 %v5879_v39  ;;  %v3063_v39 = vld [vmem:[%s11491_s10 + $0x3d8] sm:$0xff] }
 0x401   : > { %v6019_v43 = vpack.c.bf16 %v3067_v40, %v3063_v39 }
 0x403   : > { %5882 = vmatpush1.bf16.msra.mxu1 %v5881_v15  ;;  %v3066_v15 = vld [vmem:[%s11491_s10 + $0x3f0] sm:$0xff]  ;;  %6020 = vmatprep.subr.bf16.mxu0 %v6019_v43 }
 0x404   : > { %5884 = vmatprep.subr.bf16.mxu1 %v5883_v46  ;;  %v5919_v46 = vpack.c.bf16 %v3065_v61, %v3061_v48  ;;  %v6021_v57 = vpack.c.bf16 %v3066_v15, %v3062_v45  ;;  %v3090_v43 = vld [vmem:[%s11491_s10 + $0x4b0] sm:$0xff]  ;;  %v3093_v45 = vld [vmem:[%s11491_s10 + $0x4c8] sm:$0xff] }
 0x406   : > { %6022 = vmatpush1.bf16.msra.mxu0 %v6021_v57 }
 0x407   : > { %5886 = vmatpush1.bf16.msra.mxu1 %v5885_v59  ;;  %v3073_v59 = vld [vmem:[%s11491_s10 + $0x428] sm:$0xff] }
 0x408   : > { %5888 = vmatprep.subr.bf16.mxu1 %v5887_v36  ;;  %v3071_v36 = vld [vmem:[%s11491_s10 + $0x418] sm:$0xff]  ;;  %v5923_v63 = vpack.c.bf16 %v3073_v59, %v3069_v58 }
 0x409   : > { %v6023_v62 = vpack.c.bf16 %v3075_v49, %v3071_v36  ;;  %v3092_v49 = vld [vmem:[%s11491_s10 + $0x4c0] sm:$0xff] }
 0x40b   : > { %5890 = vmatpush1.bf16.msra.mxu1 %v5889_v1  ;;  %6024 = vmatprep.subr.bf16.mxu0 %v6023_v62  ;;  %v9877_v1 = vld [vmem:[%s11490_s9] sm:$0xf] }
 0x40c   : > { %5892 = vmatprep.subr.bf16.mxu1 %v5891_v2  ;;  %v9881_v2 = vrot.slane %v9877_v1, %v8611_v52  ;;  %v9885_v5 = vrot.slane %v9877_v1, %v8619_v54 }
 0x40f   : > { %5894 = vmatpush1.bf16.msra.mxu1 %v5893_v9 }
 0x410   : > { %5896 = vmatprep.subr.bf16.mxu1 %v5895_v10 }
 0x413   : > { %5898 = vmatpush1.bf16.msra.mxu1 %v5897_v16  ;;  %v3081_v16 = vld [vmem:[%s11491_s10 + $0x468] sm:$0xff] }
 0x414   : > { %5900 = vmatprep.subr.bf16.mxu1 %v5899_v3  ;;  %v3079_v3 = vld [vmem:[%s11491_s10 + $0x458] sm:$0xff] }
 0x417   : > { %5902 = vmatpush1.bf16.msra.mxu1 %v5901_v41  ;;  %v6025_v41 = vpack.c.bf16 %v3074_v56, %v3070_v11  ;;  %v3101_v11 = vld [vmem:[%s11491_s10 + $0x508] sm:$0xff] }
 0x418   : > { %5904 = vmatprep.subr.bf16.mxu1 %v5903_v53  ;;  %v3076_v53 = vld [vmem:[%s11491_s10 + $0x440] sm:$0xff] }
 0x419   : > { %v5929_v28 = vpack.c.bf16 %v3080_v25, %v3076_v53  ;;  %v3102_v53 = vld [vmem:[%s11491_s10 + $0x510] sm:$0xff] }
 0x41a   : > { %v3106_v25 = vld [vmem:[%s11491_s10 + $0x530] sm:$0xff] }
 0x41b   : > { %5906 = vmatpush1.bf16.msra.mxu1 %v5905_v31  ;;  %v5927_v31 = vpack.c.bf16 %v3081_v16, %v3077_v13  ;;  %v3103_v13 = vld [vmem:[%s11491_s10 + $0x518] sm:$0xff] }
 0x41c   : > { %5908 = vmatprep.subr.bf16.mxu1 %v5907_v4  ;;  %v6027_v4 = vpack.c.bf16 %v3083_v18, %v3079_v3  ;;  %v3100_v18 = vld [vmem:[%s11491_s10 + $0x500] sm:$0xff] }
 0x41f   : > { %5910 = vmatpush1.bf16.msra.mxu1 %v5909_v12  ;;  %v3089_v12 = vld [vmem:[%s11491_s10 + $0x4a8] sm:$0xff] }
 0x420   : > { %5912 = vmatprep.subr.bf16.mxu1 %v5911_v21  ;;  %v3087_v21 = vld [vmem:[%s11491_s10 + $0x498] sm:$0xff]  ;;  %v5931_v39 = vpack.c.bf16 %v3089_v12, %v3085_v20  ;;  %v3112_v20 = vld [vmem:[%s11491_s10 + $0x560] sm:$0xff] }
 0x421   : > { %v6031_v40 = vpack.c.bf16 %v3091_v33, %v3087_v21  ;;  %v3110_v21 = vld [vmem:[%s11491_s10 + $0x550] sm:$0xff] }
 0x422   : > { %v3114_v33 = vld [vmem:[%s11491_s10 + $0x570] sm:$0xff] }
 0x423   : > { %5914 = vmatpush1.bf16.msra.mxu1 %v5913_v35  ;;  %v6029_v35 = vpack.c.bf16 %v3082_v32, %v3078_v60  ;;  %v6041_v60 = vpack.c.bf16 %v3106_v25, %v3102_v53  ;;  %v3108_v32 = vld [vmem:[%s11491_s10 + $0x540] sm:$0xff] }
 0x424   : > { %5916 = vmatprep.subr.bf16.mxu1 %v5915_v23  ;;  %v3084_v23 = vld [vmem:[%s11491_s10 + $0x480] sm:$0xff] }
 0x425   : > { %v5933_v59 = vpack.c.bf16 %v3088_v37, %v3084_v23  ;;  %v5945_v23 = vpack.c.bf16 %v3112_v20, %v3108_v32  ;;  %v6045_v37 = vpack.c.bf16 %v3114_v33, %v3110_v21  ;;  %v3546_v32 = vld [vmem:[%s11493_s12] sm:$0xff]  ;;  %v3553_v20 = vld [vmem:[%s11493_s12 + $0x38] sm:$0xff]  ;;  %v3555_v21 = vld [vmem:[%s11493_s12 + $0x48] sm:$0xff] }
 0x426   : > { %v3561_v33 = vld [vmem:[%s11493_s12 + $0x78] sm:$0xff] }
 0x427   : > { %5918 = vmatpush1.bf16.msra.mxu1 %v5917_v42  ;;  %v3086_v42 = vld [vmem:[%s11491_s10 + $0x490] sm:$0xff] }
 0x428   : > { %5920 = vmatprep.subr.bf16.mxu1 %v5919_v46  ;;  %v3097_v46 = vld [vmem:[%s11491_s10 + $0x4e8] sm:$0xff]  ;;  %v6033_v36 = vpack.c.bf16 %v3090_v43, %v3086_v42  ;;  %v3122_v42 = vld [vmem:[%s11491_s10 + $0x5b0] sm:$0xff] }
 0x429   : > { %v5935_v6 = vpack.c.bf16 %v3097_v46, %v3093_v45  ;;  %v3125_v43 = vld [vmem:[%s11491_s10 + $0x5c8] sm:$0xff]  ;;  %v3131_v46 = vld [vmem:[%s11491_s10 + $0x5f8] sm:$0xff] }
 0x42a   : > { %v3129_v45 = vld [vmem:[%s11491_s10 + $0x5e8] sm:$0xff] }
 0x42b   : > { %5922 = vmatpush1.bf16.msra.mxu1 %v5921_v8  ;;  %v3096_v8 = vld [vmem:[%s11491_s10 + $0x4e0] sm:$0xff] }
 0x42c   : > { %5924 = vmatprep.subr.bf16.mxu1 %v5923_v63 }
 0x4a1   : > { %v2812_v0 = vpop.f32.mrb[16].mxu1 }
 0x4a2   : > { %v2813_v9 = vadd.f32 %v2812_v0, %v9881_v2  ;;  %v2814_v10 = vpop.f32.mrb[17].mxu1 }
 0x4a3   : > { %v2815_v14 = vadd.f32 %v2814_v10, %v9885_v5  ;;  %v3098_v10 = vld [vmem:[%s11491_s10 + $0x4f0] sm:$0xff] }
 0x4a4   : > { %v2924_v26 = vmax.f32 %v2813_v9, 0.0  ;;  %v3094_v9 = vld [vmem:[%s11491_s10 + $0x4d0] sm:$0xff] }
 0x4a5   : > { %v2925_v19 = vmax.f32 %v2815_v14, 0.0  ;;  %v2818_v22 = vpop.f32.mrb[18].mxu1  ;;  %v3107_v14 = vld [vmem:[%s11491_s10 + $0x538] sm:$0xff]  ;;  %v6037_v3 = vpack.c.bf16 %v3098_v10, %v3094_v9 }
 0x4a6   : > { %v2819_v29 = vadd.f32 %v2818_v22, %v9881_v2  ;;  %v2820_v30 = vpop.f32.mrb[19].mxu1 }
 0x4a7   : > { %v2821_v17 = vadd.f32 %v2820_v30, %v9885_v5  ;;  %3238 = vmatprep.mubr.f32.mxu1 %v2925_v19  ;;  %3416 = vmatprep.mubr.f32.mxu0 %v2925_v19  ;;  %v3104_v19 = vld [vmem:[%s11491_s10 + $0x520] sm:$0xff]  ;;  %v3111_v30 = vld [vmem:[%s11491_s10 + $0x558] sm:$0xff] }
 0x4a8   : > { %3239 = vmatmul.mubr.f32.vlgmr.msra.gmra.mrb[32].mxu1 %v2924_v26  ;;  %3417 = vmatmul.mubr.f32.vlgmr.msra.gmra.mrb[24].mxu0 %v2924_v26  ;;  %v2928_v38 = vmax.f32 %v2819_v29, 0.0  ;;  %v3109_v26 = vld [vmem:[%s11491_s10 + $0x548] sm:$0xff] }
 0x4a9   : > { %v2929_v34 = vmax.f32 %v2821_v17, 0.0  ;;  %5926 = vmatpush1.bf16.msra.mxu1 %v5925_v24  ;;  %6026 = vmatpush1.bf16.msra.mxu0 %v6025_v41  ;;  %v2824_v44 = vpop.f32.mrb[20].mxu1  ;;  %v6039_v41 = vpack.c.bf16 %v3107_v14, %v3103_v13  ;;  %v3113_v29 = vld [vmem:[%s11491_s10 + $0x568] sm:$0xff]  ;;  %v10099_v13 = vrot.slane %v9877_v1, %v8839_v7 }
 0x4aa   : > { %v2825_v48 = vadd.f32 %v2824_v44, %v9881_v2  ;;  %v2826_v61 = vpop.f32.mrb[21].mxu1  ;;  %5928 = vmatprep.subr.bf16.mxu1 %v5927_v31  ;;  %6028 = vmatprep.subr.bf16.mxu0 %v6027_v4  ;;  %v3115_v31 = vld [vmem:[%s11491_s10 + $0x578] sm:$0xff]  ;;  %v5941_v4 = vpack.c.bf16 %v3104_v19, %v3100_v18  ;;  %v5943_v17 = vpack.c.bf16 %v3113_v29, %v3109_v26  ;;  %v3121_v44 = vld [vmem:[%s11491_s10 + $0x5a8] sm:$0xff]  ;;  %v3138_v18 = vld [vmem:[%s11491_s10 + $0x630] sm:$0xff] }
 0x4ab   : > { %v2827_v15 = vadd.f32 %v2826_v61, %v9885_v5  ;;  %3244 = vmatprep.mubr.f32.mxu1 %v2929_v34  ;;  %3422 = vmatprep.mubr.f32.mxu0 %v2929_v34  ;;  %v6043_v12 = vpack.c.bf16 %v3115_v31, %v3111_v30  ;;  %v3117_v34 = vld [vmem:[%s11491_s10 + $0x588] sm:$0xff] }
 0x4ac   : > { %3245 = vmatmul.mubr.f32.gmra.mrb[34].mxu1 %v2928_v38  ;;  %3423 = vmatmul.mubr.f32.gmra.mrb[26].mxu0 %v2928_v38  ;;  %v2932_v62 = vmax.f32 %v2825_v48, 0.0  ;;  %v3116_v38 = vld [vmem:[%s11491_s10 + $0x580] sm:$0xff]  ;;  %v5947_v61 = vpack.c.bf16 %v3121_v44, %v3117_v34  ;;  %v3547_v19 = vld [vmem:[%s11493_s12 + $0x8] sm:$0xff]  ;;  %v3568_v34 = vld [vmem:[%s11493_s12 + $0xb0] sm:$0xff] }
 0x4ad   : > { %v2933_v57 = vmax.f32 %v2827_v15, 0.0  ;;  %5930 = vmatpush1.bf16.msra.mxu1 %v5929_v28  ;;  %6030 = vmatpush1.bf16.msra.mxu0 %v6029_v35  ;;  %v2830_v58 = vpop.f32.mrb[22].mxu1  ;;  %v3119_v28 = vld [vmem:[%s11491_s10 + $0x598] sm:$0xff]  ;;  %v3120_v48 = vld [vmem:[%s11491_s10 + $0x5a0] sm:$0xff]  ;;  %v3563_v44 = vld [vmem:[%s11493_s12 + $0x88] sm:$0xff] }
 0x4ae   : > { %v2831_v63 = vadd.f32 %v2830_v58, %v9881_v2  ;;  %v2832_v0 = vpop.f32.mrb[23].mxu1  ;;  %5932 = vmatprep.subr.bf16.mxu1 %v5931_v39  ;;  %6032 = vmatprep.subr.bf16.mxu0 %v6031_v40  ;;  %v3105_v2 = vld [vmem:[%s11491_s10 + $0x528] sm:$0xff]  ;;  %v3123_v35 = vld [vmem:[%s11491_s10 + $0x5b8] sm:$0xff]  ;;  %v3118_v40 = vld [vmem:[%s11491_s10 + $0x590] sm:$0xff]  ;;  %v5949_v47 = vpack.c.bf16 %v3120_v48, %v3116_v38  ;;  %v6061_v48 = vpack.c.bf16 %v3553_v20, %v3546_v32 }
 0x4af   : > { %v2833_v56 = vadd.f32 %v2832_v0, %v9885_v5  ;;  %3250 = vmatprep.mubr.f32.mxu1 %v2933_v57  ;;  %3428 = vmatprep.mubr.f32.mxu0 %v2933_v57  ;;  %v5937_v5 = vpack.c.bf16 %v3096_v8, %v3092_v49  ;;  %v5939_v24 = vpack.c.bf16 %v3105_v2, %v3101_v11  ;;  %v3127_v15 = vld [vmem:[%s11491_s10 + $0x5d8] sm:$0xff]  ;;  %v3124_v57 = vld [vmem:[%s11491_s10 + $0x5c0] sm:$0xff]  ;;  %v3126_v49 = vld [vmem:[%s11491_s10 + $0x5d0] sm:$0xff] }
 0x4b0   : > { %3251 = vmatmul.mubr.f32.gmra.mrb[36].mxu1 %v2932_v62  ;;  %3429 = vmatmul.mubr.f32.gmra.mrb[28].mxu0 %v2932_v62  ;;  %v2936_v22 = vmax.f32 %v2831_v63, 0.0  ;;  %v6047_v39 = vpack.c.bf16 %v3123_v35, %v3119_v28  ;;  %v6049_v50 = vpack.c.bf16 %v3122_v42, %v3118_v40  ;;  %v3128_v58 = vld [vmem:[%s11491_s10 + $0x5e0] sm:$0xff]  ;;  %v3130_v8 = vld [vmem:[%s11491_s10 + $0x5f0] sm:$0xff]  ;;  %v3133_v62 = vld [vmem:[%s11491_s10 + $0x608] sm:$0xff]  ;;  %v10080_v63 = vrot.slane %v9877_v1, %v8690_v27 }
 0x4b1   : > { %v2937_v16 = vmax.f32 %v2833_v56, 0.0  ;;  %5934 = vmatpush1.bf16.msra.mxu1 %v5933_v59  ;;  %6034 = vmatpush1.bf16.msra.mxu0 %v6033_v36  ;;  %v5951_v59 = vpack.c.bf16 %v3129_v45, %v3125_v43  ;;  %v6051_v36 = vpack.c.bf16 %v3131_v46, %v3127_v15  ;;  %v3137_v0 = vld [vmem:[%s11491_s10 + $0x628] sm:$0xff]  ;;  %v5953_v10 = vpack.c.bf16 %v3128_v58, %v3124_v57  ;;  %v3132_v56 = vld [vmem:[%s11491_s10 + $0x600] sm:$0xff]  ;;  %v3577_v58 = vld [vmem:[%s11493_s12 + $0xf8] sm:$0xff] }
 0x4b2   : > { %5936 = vmatprep.subr.bf16.mxu1 %v5935_v6  ;;  %6036 = vmatprep.subr.bf16.mxu0 %v6035_v55  ;;  %v3135_v6 = vld [vmem:[%s11491_s10 + $0x618] sm:$0xff]  ;;  %v6053_v11 = vpack.c.bf16 %v3130_v8, %v3126_v49  ;;  %v3136_v2 = vld [vmem:[%s11491_s10 + $0x620] sm:$0xff]  ;;  %v3567_v40 = vld [vmem:[%s11493_s12 + $0xa8] sm:$0xff]  ;;  %v6063_v45 = vpack.c.bf16 %v3568_v34, %v3561_v33 }
 0x4b3   : > { %3256 = vmatprep.mubr.f32.mxu1 %v2937_v16  ;;  %3434 = vmatprep.mubr.f32.mxu0 %v2937_v16  ;;  %v3139_v55 = vld [vmem:[%s11491_s10 + $0x638] sm:$0xff]  ;;  %v5955_v16 = vpack.c.bf16 %v3137_v0, %v3133_v62  ;;  %v5957_v26 = vpack.c.bf16 %v3136_v2, %v3132_v56  ;;  %v3570_v28 = vld [vmem:[%s11493_s12 + $0xc0] sm:$0xff]  ;;  %v3612_v32 = vld [vmem:[%s11493_s12 + $0x210] sm:$0xff] }
 0x4b4   : > { %3257 = vmatmul.mubr.f32.gmra.mrb[38].mxu1 %v2936_v22  ;;  %3435 = vmatmul.mubr.f32.gmra.mrb[30].mxu0 %v2936_v22  ;;  %v3554_v22 = vld [vmem:[%s11493_s12 + $0x40] sm:$0xff]  ;;  %v6163_v15 = vpack.c.bf16 %v3570_v28, %v3563_v44  ;;  %v3609_v33 = vld [vmem:[%s11493_s12 + $0x1f8] sm:$0xff]  ;;  %v3604_v28 = vld [vmem:[%s11493_s12 + $0x1d0] sm:$0xff] }
 0x4b5   : > { %5938 = vmatpush1.bf16.msra.mxu1 %v5937_v5  ;;  %6038 = vmatpush1.bf16.msra.mxu0 %v6037_v3  ;;  %v6055_v5 = vpack.c.bf16 %v3139_v55, %v3135_v6  ;;  %v3134_v3 = vld [vmem:[%s11491_s10 + $0x610] sm:$0xff]  ;;  %v3562_v46 = vld [vmem:[%s11493_s12 + $0x80] sm:$0xff] }
 0x4b6   : > { %5940 = vmatprep.subr.bf16.mxu1 %v5939_v24  ;;  %6040 = vmatprep.subr.bf16.mxu0 %v6039_v41  ;;  %v3549_v24 = vld [vmem:[%s11493_s12 + $0x18] sm:$0xff]  ;;  %v3556_v41 = vld [vmem:[%s11493_s12 + $0x50] sm:$0xff]  ;;  %v6057_v29 = vpack.c.bf16 %v3138_v18, %v3134_v3  ;;  %v3582_v57 = vld [vmem:[%s11493_s12 + $0x120] sm:$0xff] }
 0x4b7   : > { %v3574_v55 = vld [vmem:[%s11493_s12 + $0xe0] sm:$0xff]  ;;  %v3591_v3 = vld [vmem:[%s11493_s12 + $0x168] sm:$0xff] }
 0x4b8   : > { %v3598_v18 = vld [vmem:[%s11493_s12 + $0x1a0] sm:$0xff] }
 0x4b9   : > { %5942 = vmatpush1.bf16.msra.mxu1 %v5941_v4  ;;  %6042 = vmatpush1.bf16.msra.mxu0 %v6041_v60  ;;  %v6059_v4 = vpack.c.bf16 %v3554_v22, %v3547_v19  ;;  %v6159_v60 = vpack.c.bf16 %v3556_v41, %v3549_v24  ;;  %v3588_v41 = vld [vmem:[%s11493_s12 + $0x150] sm:$0xff] }
 0x4ba   : > { %5944 = vmatprep.subr.bf16.mxu1 %v5943_v17  ;;  %6044 = vmatprep.subr.bf16.mxu0 %v6043_v12  ;;  %v3548_v12 = vld [vmem:[%s11493_s12 + $0x10] sm:$0xff] }
 0x4bd   : > { %5946 = vmatpush1.bf16.msra.mxu1 %v5945_v23  ;;  %6046 = vmatpush1.bf16.msra.mxu0 %v6045_v37 }
 0x4be   : > { %5948 = vmatprep.subr.bf16.mxu1 %v5947_v61  ;;  %6048 = vmatprep.subr.bf16.mxu0 %v6047_v39  ;;  %v6161_v61 = vpack.c.bf16 %v3555_v21, %v3548_v12  ;;  %v3560_v39 = vld [vmem:[%s11493_s12 + $0x70] sm:$0xff]  ;;  %v3602_v21 = vld [vmem:[%s11493_s12 + $0x1c0] sm:$0xff] }
 0x4bf   : > { %v6065_v0 = vpack.c.bf16 %v3567_v40, %v3560_v39  ;;  %v3616_v40 = vld [vmem:[%s11493_s12 + $0x230] sm:$0xff] }
 0x4c1   : > { %v2901_v9 = vpop.f32.mrb[24].mxu1  ;;  %5950 = vmatpush1.bf16.msra.mxu1 %v5949_v47  ;;  %6050 = vmatpush1.bf16.msra.mxu0 %v6049_v50  ;;  %v3569_v47 = vld [vmem:[%s11493_s12 + $0xb8] sm:$0xff]  ;;  %v3575_v50 = vld [vmem:[%s11493_s12 + $0xe8] sm:$0xff] }
 0x4c2   : > { %v2903_v14 = vpop.f32.mrb[25].mxu1  ;;  %5952 = vmatprep.subr.bf16.mxu1 %v5951_v59  ;;  %6052 = vmatprep.subr.bf16.mxu0 %v6051_v36  ;;  %v2902_v30 = vadd.f32 %v2901_v9, %v10099_v13  ;;  %v3584_v59 = vld [vmem:[%s11493_s12 + $0x130] sm:$0xff]  ;;  %v6165_v6 = vpack.c.bf16 %v3569_v47, %v3562_v46  ;;  %v3581_v9 = vld [vmem:[%s11493_s12 + $0x118] sm:$0xff]  ;;  %v6067_v56 = vpack.c.bf16 %v3582_v57, %v3575_v50  ;;  %v3631_v47 = vld [vmem:[%s11493_s12 + $0x2a8] sm:$0xff] }
 0x4c3   : > { %v2904_v1 = vadd.f32 %v2903_v14, %v10080_v63  ;;  %v6167_v2 = vpack.c.bf16 %v3584_v59, %v3577_v58  ;;  %v3576_v14 = vld [vmem:[%s11493_s12 + $0xf0] sm:$0xff]  ;;  %v6069_v22 = vpack.c.bf16 %v3581_v9, %v3574_v55  ;;  %v3625_v46 = vld [vmem:[%s11493_s12 + $0x278] sm:$0xff]  ;;  %v3638_v50 = vld [vmem:[%s11493_s12 + $0x2e0] sm:$0xff] }
 0x4c4   : > { %v2926_v23 = vmax.f32 %v2902_v30, 0.0  ;;  %v3597_v30 = vld [vmem:[%s11493_s12 + $0x198] sm:$0xff]  ;;  %v3640_v58 = vld [vmem:[%s11493_s12 + $0x2f0] sm:$0xff]  ;;  %v3639_v55 = vld [vmem:[%s11493_s12 + $0x2e8] sm:$0xff] }
 0x4c5   : > { %v2927_v53 = vmax.f32 %v2904_v1, 0.0  ;;  %v2907_v25 = vpop.f32.mrb[26].mxu1  ;;  %5954 = vmatpush1.bf16.msra.mxu1 %v5953_v10  ;;  %6054 = vmatpush1.bf16.msra.mxu0 %v6053_v11  ;;  %v3633_v57 = vld [vmem:[%s11493_s12 + $0x2b8] sm:$0xff] }
 0x4c6   : > { %v2909_v31 = vpop.f32.mrb[27].mxu1  ;;  %5956 = vmatprep.subr.bf16.mxu1 %v5955_v16  ;;  %6056 = vmatprep.subr.bf16.mxu0 %v6055_v5  ;;  %v2908_v37 = vadd.f32 %v2907_v25, %v10099_v13  ;;  %v3583_v16 = vld [vmem:[%s11493_s12 + $0x128] sm:$0xff]  ;;  %v3589_v5 = vld [vmem:[%s11493_s12 + $0x158] sm:$0xff] }
 0x4c7   : > { %v2910_v17 = vadd.f32 %v2909_v31, %v10080_v63  ;;  %5001 = vmatprep.mubr.msk.f32.mxu1 %vm979_vm0, %v2927_v53  ;;  %5005 = vmatprep.mubr.msk.f32.mxu0 %vm979_vm0, %v2927_v53  ;;  %v6169_v24 = vpack.c.bf16 %v3583_v16, %v3576_v14  ;;  %v3595_v53 = vld [vmem:[%s11493_s12 + $0x188] sm:$0xff]  ;;  %v3645_v9 = vld [vmem:[%s11493_s12 + $0x318] sm:$0xff]  ;;  %v3644_v16 = vld [vmem:[%s11493_s12 + $0x310] sm:$0xff] }
 0x4c8   : > { %v2930_v49 = vmax.f32 %v2908_v37, 0.0  ;;  %v3603_v31 = vld [vmem:[%s11493_s12 + $0x1c8] sm:$0xff]  ;;  %v3624_v37 = vld [vmem:[%s11493_s12 + $0x270] sm:$0xff] }
 0x4c9   : > { %v2913_v35 = vpop.f32.mrb[28].mxu1  ;;  %5958 = vmatpush1.bf16.msra.mxu1 %v5957_v26  ;;  %6058 = vmatpush1.bf16.msra.mxu0 %v6057_v29  ;;  %v2931_v42 = vmax.f32 %v2910_v17, 0.0  ;;  %v6171_v29 = vpack.c.bf16 %v3598_v18, %v3591_v3  ;;  %v6073_v17 = vpack.c.bf16 %v3595_v53, %v3588_v41  ;;  %v3646_v18 = vld [vmem:[%s11493_s12 + $0x320] sm:$0xff]  ;;  %v3668_v41 = vld [vmem:[%s11493_s12 + $0x3d0] sm:$0xff] }
 0x4ca   : > { %v2915_v38 = vpop.f32.mrb[29].mxu1  ;;  %6060 = vmatprep.subr.bf16.mxu1 %v6059_v4  ;;  %6160 = vmatprep.subr.bf16.mxu0 %v6159_v60  ;;  %v2914_v8 = vadd.f32 %v2913_v35, %v10099_v13  ;;  %v3610_v4 = vld [vmem:[%s11493_s12 + $0x200] sm:$0xff]  ;;  %v3605_v60 = vld [vmem:[%s11493_s12 + $0x1d8] sm:$0xff]  ;;  %v3611_v35 = vld [vmem:[%s11493_s12 + $0x208] sm:$0xff] }
 0x4cb   : > { %v2916_v43 = vadd.f32 %v2915_v38, %v10080_v63  ;;  %v6075_v34 = vpack.c.bf16 %v3610_v4, %v3603_v31  ;;  %v6175_v44 = vpack.c.bf16 %v3612_v32, %v3605_v60  ;;  %v3619_v38 = vld [vmem:[%s11493_s12 + $0x248] sm:$0xff]  ;;  %v6177_v39 = vpack.c.bf16 %v3611_v35, %v3604_v28  ;;  %v3660_v31 = vld [vmem:[%s11493_s12 + $0x390] sm:$0xff]  ;;  %v3673_v60 = vld [vmem:[%s11493_s12 + $0x3f8] sm:$0xff] }
 0x4cc   : > { %3328 = vmatmul.mubr.f32.vlgmr.msra.gmra.mrb[32].mxu1 %v2926_v23  ;;  %3506 = vmatmul.mubr.f32.vlgmr.msra.gmra.mrb[24].mxu0 %v2926_v23  ;;  %v2934_v19 = vmax.f32 %v2914_v8, 0.0  ;;  %v3617_v23 = vld [vmem:[%s11493_s12 + $0x238] sm:$0xff]  ;;  %v3667_v4 = vld [vmem:[%s11493_s12 + $0x3c8] sm:$0xff]  ;;  %v3680_v32 = vld [vmem:[%s11493_s12 + $0x430] sm:$0xff] }
 0x4cd   : > { %v2919_v36 = vpop.f32.mrb[30].mxu1  ;;  %5002 = vmatprep.mubr.msk.f32.mxu1 %vm979_vm0, %v2931_v42  ;;  %5006 = vmatprep.mubr.msk.f32.mxu0 %vm979_vm0, %v2931_v42  ;;  %v2935_v10 = vmax.f32 %v2916_v43, 0.0  ;;  %v3623_v42 = vld [vmem:[%s11493_s12 + $0x268] sm:$0xff]  ;;  %v6079_v43 = vpack.c.bf16 %v3624_v37, %v3617_v23  ;;  %v3637_v8 = vld [vmem:[%s11493_s12 + $0x2d8] sm:$0xff]  ;;  %v3674_v35 = vld [vmem:[%s11493_s12 + $0x400] sm:$0xff] }
 0x4ce   : > { %v2921_v62 = vpop.f32.mrb[31].mxu1  ;;  %6062 = vmatpush1.bf16.msra.mxu1 %v6061_v48  ;;  %6162 = vmatpush1.bf16.msra.mxu0 %v6161_v61  ;;  %v2920_v1 = vadd.f32 %v2919_v36, %v10099_v13  ;;  %v3590_v13 = vld [vmem:[%s11493_s12 + $0x160] sm:$0xff]  ;;  %v6077_v61 = vpack.c.bf16 %v3609_v33, %v3602_v21  ;;  %v6081_v59 = vpack.c.bf16 %v3623_v42, %v3616_v40  ;;  %v3672_v33 = vld [vmem:[%s11493_s12 + $0x3f0] sm:$0xff]  ;;  %v3681_v23 = vld [vmem:[%s11493_s12 + $0x438] sm:$0xff] }
 0x4cf   : > { %v2922_v11 = vadd.f32 %v2921_v62, %v10080_v63  ;;  %6064 = vmatprep.subr.bf16.mxu1 %v6063_v45  ;;  %6164 = vmatprep.subr.bf16.mxu0 %v6163_v15  ;;  %v3596_v63 = vld [vmem:[%s11493_s12 + $0x190] sm:$0xff]  ;;  %v6173_v12 = vpack.c.bf16 %v3597_v30, %v3590_v13  ;;  %v3626_v48 = vld [vmem:[%s11493_s12 + $0x280] sm:$0xff]  ;;  %v6083_v62 = vpack.c.bf16 %v3638_v50, %v3631_v47  ;;  %v3687_v37 = vld [vmem:[%s11493_s12 + $0x468] sm:$0xff] }
 0x4d0   : > { %3334 = vmatmul.mubr.f32.gmra.mrb[34].mxu1 %v2930_v49  ;;  %3512 = vmatmul.mubr.f32.gmra.mrb[26].mxu0 %v2930_v49  ;;  %v6071_v26 = vpack.c.bf16 %v3596_v63, %v3589_v5  ;;  %v2938_v20 = vmax.f32 %v2920_v1, 0.0  ;;  %v6179_v45 = vpack.c.bf16 %v3626_v48, %v3619_v38  ;;  %v3618_v15 = vld [vmem:[%s11493_s12 + $0x240] sm:$0xff]  ;;  %v3651_v5 = vld [vmem:[%s11493_s12 + $0x348] sm:$0xff]  ;;  %v6193_v21 = vpack.c.bf16 %v3667_v4, %v3660_v31  ;;  %v3689_v48 = vld [vmem:[%s11493_s12 + $0x478] sm:$0xff] }
 0x4d1   : > { %5003 = vmatprep.mubr.msk.f32.mxu1 %vm979_vm0, %v2935_v10  ;;  %5007 = vmatprep.mubr.msk.f32.mxu0 %vm979_vm0, %v2935_v10  ;;  %v2939_v25 = vmax.f32 %v2922_v11, 0.0  ;;  %v6181_v36 = vpack.c.bf16 %v3625_v46, %v3618_v15  ;;  %v3630_v49 = vld [vmem:[%s11493_s12 + $0x2a0] sm:$0xff]  ;;  %v3652_v10 = vld [vmem:[%s11493_s12 + $0x350] sm:$0xff]  ;;  %v3647_v11 = vld [vmem:[%s11493_s12 + $0x328] sm:$0xff]  ;;  %v6089_v53 = vpack.c.bf16 %v3651_v5, %v3644_v16  ;;  %v6197_v40 = vpack.c.bf16 %v3681_v23, %v3674_v35 }
 0x4d2   : > { %6066 = vmatpush1.bf16.msra.mxu1 %v6065_v0  ;;  %6166 = vmatpush1.bf16.msra.mxu0 %v6165_v6  ;;  %v6183_v0 = vpack.c.bf16 %v3640_v58, %v3633_v57  ;;  %v3632_v6 = vld [vmem:[%s11493_s12 + $0x2b0] sm:$0xff]  ;;  %v6087_v63 = vpack.c.bf16 %v3652_v10, %v3645_v9  ;;  %v3659_v1 = vld [vmem:[%s11493_s12 + $0x388] sm:$0xff]  ;;  %v3694_v38 = vld [vmem:[%s11493_s12 + $0x4a0] sm:$0xff] }
 0x4d3   : > { %6068 = vmatprep.subr.bf16.mxu1 %v6067_v56  ;;  %6168 = vmatprep.subr.bf16.mxu0 %v6167_v2  ;;  %v3654_v56 = vld [vmem:[%s11493_s12 + $0x360] sm:$0xff]  ;;  %v6085_v2 = vpack.c.bf16 %v3637_v8, %v3630_v49  ;;  %v6185_v14 = vpack.c.bf16 %v3639_v55, %v3632_v6  ;;  %v3688_v46 = vld [vmem:[%s11493_s12 + $0x470] sm:$0xff]  ;;  %v3695_v47 = vld [vmem:[%s11493_s12 + $0x4a8] sm:$0xff] }
 0x4d4   : > { %3340 = vmatmul.mubr.f32.gmra.mrb[36].mxu1 %v2934_v19  ;;  %3518 = vmatmul.mubr.f32.gmra.mrb[28].mxu0 %v2934_v19  ;;  %v6187_v3 = vpack.c.bf16 %v3654_v56, %v3647_v11  ;;  %v3653_v19 = vld [vmem:[%s11493_s12 + $0x358] sm:$0xff]  ;;  %v3686_v42 = vld [vmem:[%s11493_s12 + $0x460] sm:$0xff]  ;;  %v3708_v57 = vld [vmem:[%s11493_s12 + $0x510] sm:$0xff]  ;;  %v6201_v49 = vpack.c.bf16 %v3695_v47, %v3688_v46 }
 0x4d5   : > { %5004 = vmatprep.mubr.msk.f32.mxu1 %vm979_vm0, %v2939_v25  ;;  %5008 = vmatprep.mubr.msk.f32.mxu0 %vm979_vm0, %v2939_v25  ;;  %v6189_v25 = vpack.c.bf16 %v3653_v19, %v3646_v18  ;;  %v3701_v50 = vld [vmem:[%s11493_s12 + $0x4d8] sm:$0xff]  ;;  %v3703_v58 = vld [vmem:[%s11493_s12 + $0x4e8] sm:$0xff]  ;;  %v3700_v8 = vld [vmem:[%s11493_s12 + $0x4d0] sm:$0xff] }
 0x4d6   : > { %6070 = vmatpush1.bf16.msra.mxu1 %v6069_v22  ;;  %6170 = vmatpush1.bf16.msra.mxu0 %v6169_v24  ;;  %v3666_v22 = vld [vmem:[%s11493_s12 + $0x3c0] sm:$0xff]  ;;  %v3661_v24 = vld [vmem:[%s11493_s12 + $0x398] sm:$0xff]  ;;  %v3715_v10 = vld [vmem:[%s11493_s12 + $0x548] sm:$0xff] }
 0x4d7   : > { %6072 = vmatprep.subr.bf16.mxu1 %v6071_v26  ;;  %6172 = vmatprep.subr.bf16.mxu0 %v6171_v29  ;;  %v3658_v26 = vld [vmem:[%s11493_s12 + $0x380] sm:$0xff]  ;;  %v3665_v29 = vld [vmem:[%s11493_s12 + $0x3b8] sm:$0xff]  ;;  %v6091_v13 = vpack.c.bf16 %v3666_v22, %v3659_v1  ;;  %v6191_v30 = vpack.c.bf16 %v3668_v41, %v3661_v24  ;;  %v3716_v19 = vld [vmem:[%s11493_s12 + $0x550] sm:$0xff] }
 0x4d8   : > { %3346 = vmatmul.mubr.f32.gmra.mrb[38].mxu1 %v2938_v20  ;;  %3524 = vmatmul.mubr.f32.gmra.mrb[30].mxu0 %v2938_v20  ;;  %v3675_v20 = vld [vmem:[%s11493_s12 + $0x408] sm:$0xff]  ;;  %v3702_v55 = vld [vmem:[%s11493_s12 + $0x4e0] sm:$0xff]  ;;  %v3709_v9 = vld [vmem:[%s11493_s12 + $0x518] sm:$0xff] }
 0x4d9   : > { %v3722_v11 = vld [vmem:[%s11493_s12 + $0x580] sm:$0xff]  ;;  %v3717_v56 = vld [vmem:[%s11493_s12 + $0x558] sm:$0xff]  ;;  %v6205_v16 = vpack.c.bf16 %v3709_v9, %v3702_v55  ;;  %v3723_v1 = vld [vmem:[%s11493_s12 + $0x588] sm:$0xff] }
 0x4da   : > { %6074 = vmatpush1.bf16.msra.mxu1 %v6073_v17  ;;  %6174 = vmatpush1.bf16.msra.mxu0 %v6173_v12  ;;  %v3682_v17 = vld [vmem:[%s11493_s12 + $0x440] sm:$0xff]  ;;  %v6093_v12 = vpack.c.bf16 %v3665_v29, %v3658_v26  ;;  %v3729_v22 = vld [vmem:[%s11493_s12 + $0x5b8] sm:$0xff]  ;;  %v3736_v24 = vld [vmem:[%s11493_s12 + $0x5f0] sm:$0xff]  ;;  %v6209_v26 = vpack.c.bf16 %v3723_v1, %v3716_v19 }
 0x4db   : > { %6076 = vmatprep.subr.bf16.mxu1 %v6075_v34  ;;  %6176 = vmatprep.subr.bf16.mxu0 %v6175_v44  ;;  %v3679_v34 = vld [vmem:[%s11493_s12 + $0x428] sm:$0xff]  ;;  %v6095_v44 = vpack.c.bf16 %v3680_v32, %v3673_v60  ;;  %v6195_v28 = vpack.c.bf16 %v3682_v17, %v3675_v20  ;;  %v3714_v5 = vld [vmem:[%s11493_s12 + $0x540] sm:$0xff]  ;;  %v3728_v29 = vld [vmem:[%s11493_s12 + $0x5b0] sm:$0xff] }
 0x4dc   : > { %v3731_v41 = vld [vmem:[%s11493_s12 + $0x5c8] sm:$0xff]  ;;  %v3730_v4 = vld [vmem:[%s11493_s12 + $0x5c0] sm:$0xff]  ;;  %v3737_v60 = vld [vmem:[%s11493_s12 + $0x5f8] sm:$0xff] }
 0x4dd   : > { %v3743_v32 = vld [vmem:[%s11493_s12 + $0x628] sm:$0xff]  ;;  %v3750_v20 = vld [vmem:[%s11493_s12 + $0x660] sm:$0xff]  ;;  %v3745_v17 = vld [vmem:[%s11493_s12 + $0x638] sm:$0xff] }
 0x4de   : > { %6078 = vmatpush1.bf16.msra.mxu1 %v6077_v61  ;;  %6178 = vmatpush1.bf16.msra.mxu0 %v6177_v39  ;;  %v3696_v61 = vld [vmem:[%s11493_s12 + $0x4b0] sm:$0xff]  ;;  %v6097_v39 = vpack.c.bf16 %v3679_v34, %v3672_v33  ;;  %v6213_v33 = vpack.c.bf16 %v3737_v60, %v3730_v4  ;;  %v3742_v34 = vld [vmem:[%s11493_s12 + $0x620] sm:$0xff]  ;;  %v3749_v35 = vld [vmem:[%s11493_s12 + $0x658] sm:$0xff] }
 0x4df   : > { %6080 = vmatprep.subr.bf16.mxu1 %v6079_v43  ;;  %6180 = vmatprep.subr.bf16.mxu0 %v6179_v45  ;;  %v3693_v43 = vld [vmem:[%s11493_s12 + $0x498] sm:$0xff]  ;;  %v6099_v45 = vpack.c.bf16 %v3694_v38, %v3687_v37  ;;  %v6199_v15 = vpack.c.bf16 %v3696_v61, %v3689_v48  ;;  %v3744_v23 = vld [vmem:[%s11493_s12 + $0x630] sm:$0xff]  ;;  %v3751_v37 = vld [vmem:[%s11493_s12 + $0x668] sm:$0xff]  ;;  %v6117_v38 = vpack.c.bf16 %v3749_v35, %v3742_v34 }
 0x4e0   : > { %v6217_v48 = vpack.c.bf16 %v3751_v37, %v3744_v23  ;;  %v3757_v61 = vld [vmem:[%s11493_s12 + $0x698] sm:$0xff]  ;;  %v3792_v1 = vld [vmem:[%s11493_s12 + $0x7b0] sm:$0xff] }
 0x4e1   : > { %v3808_v35 = vld [vmem:[%s11493_s12 + $0x830] sm:$0xff] }
 0x4e2   : > { %6082 = vmatpush1.bf16.msra.mxu1 %v6081_v59  ;;  %6182 = vmatpush1.bf16.msra.mxu0 %v6181_v36  ;;  %v3710_v59 = vld [vmem:[%s11493_s12 + $0x520] sm:$0xff]  ;;  %v6101_v36 = vpack.c.bf16 %v3693_v43, %v3686_v42 }
 0x4e3   : > { %6084 = vmatprep.subr.bf16.mxu1 %v6083_v62  ;;  %6184 = vmatprep.subr.bf16.mxu0 %v6183_v0  ;;  %v3707_v62 = vld [vmem:[%s11493_s12 + $0x508] sm:$0xff]  ;;  %v6103_v0 = vpack.c.bf16 %v3708_v57, %v3701_v50  ;;  %v6203_v6 = vpack.c.bf16 %v3710_v59, %v3703_v58  ;;  %v3766_v43 = vld [vmem:[%s11493_s12 + $0x6e0] sm:$0xff]  ;;  %v3765_v57 = vld [vmem:[%s11493_s12 + $0x6d8] sm:$0xff] }
 0x4e4   : > { %v3758_v50 = vld [vmem:[%s11493_s12 + $0x6a0] sm:$0xff]  ;;  %v3771_v59 = vld [vmem:[%s11493_s12 + $0x708] sm:$0xff] }
 0x4e5   : > { %v6221_v58 = vpack.c.bf16 %v3765_v57, %v3758_v50  ;;  %v3800_v50 = vld [vmem:[%s11493_s12 + $0x7f0] sm:$0xff]  ;;  %v3807_v57 = vld [vmem:[%s11493_s12 + $0x828] sm:$0xff] }
 0x4e6   : > { %6086 = vmatpush1.bf16.msra.mxu1 %v6085_v2  ;;  %6186 = vmatpush1.bf16.msra.mxu0 %v6185_v14  ;;  %v3724_v2 = vld [vmem:[%s11493_s12 + $0x590] sm:$0xff]  ;;  %v6105_v14 = vpack.c.bf16 %v3707_v62, %v3700_v8 }
 0x4e7   : > { %6088 = vmatprep.subr.bf16.mxu1 %v6087_v63  ;;  %6188 = vmatprep.subr.bf16.mxu0 %v6187_v3  ;;  %v3721_v63 = vld [vmem:[%s11493_s12 + $0x578] sm:$0xff]  ;;  %v6107_v3 = vpack.c.bf16 %v3722_v11, %v3715_v10  ;;  %v6207_v18 = vpack.c.bf16 %v3724_v2, %v3717_v56  ;;  %v3780_v62 = vld [vmem:[%s11493_s12 + $0x750] sm:$0xff]  ;;  %v3770_v56 = vld [vmem:[%s11493_s12 + $0x700] sm:$0xff] }
 0x4e8   : > { %v3777_v2 = vld [vmem:[%s11493_s12 + $0x738] sm:$0xff] }
 0x4ea   : > { %6090 = vmatpush1.bf16.msra.mxu1 %v6089_v53  ;;  %6190 = vmatpush1.bf16.msra.mxu0 %v6189_v25  ;;  %v3738_v53 = vld [vmem:[%s11493_s12 + $0x600] sm:$0xff]  ;;  %v6109_v25 = vpack.c.bf16 %v3721_v63, %v3714_v5  ;;  %v3772_v63 = vld [vmem:[%s11493_s12 + $0x710] sm:$0xff] }
 0x4eb   : > { %6092 = vmatprep.subr.bf16.mxu1 %v6091_v13  ;;  %6192 = vmatprep.subr.bf16.mxu0 %v6191_v30  ;;  %v3735_v13 = vld [vmem:[%s11493_s12 + $0x5e8] sm:$0xff]  ;;  %v6111_v30 = vpack.c.bf16 %v3736_v24, %v3729_v22  ;;  %v6211_v31 = vpack.c.bf16 %v3738_v53, %v3731_v41  ;;  %v3794_v24 = vld [vmem:[%s11493_s12 + $0x7c0] sm:$0xff] }
 0x4ec   : > { %v3787_v22 = vld [vmem:[%s11493_s12 + $0x788] sm:$0xff] }
 0x4ee   : > { %6094 = vmatpush1.bf16.msra.mxu1 %v6093_v12  ;;  %6194 = vmatpush1.bf16.msra.mxu0 %v6193_v21  ;;  %v3752_v12 = vld [vmem:[%s11493_s12 + $0x670] sm:$0xff]  ;;  %v6113_v21 = vpack.c.bf16 %v3735_v13, %v3728_v29 }
 0x4ef   : > { %6096 = vmatprep.subr.bf16.mxu1 %v6095_v44  ;;  %6196 = vmatprep.subr.bf16.mxu0 %v6195_v28  ;;  %v6115_v44 = vpack.c.bf16 %v3750_v20, %v3743_v32  ;;  %v6215_v28 = vpack.c.bf16 %v3752_v12, %v3745_v17  ;;  %v3784_v13 = vld [vmem:[%s11493_s12 + $0x770] sm:$0xff]  ;;  %v6227_v17 = vpack.c.bf16 %v3794_v24, %v3787_v22  ;;  %v3786_v12 = vld [vmem:[%s11493_s12 + $0x780] sm:$0xff]  ;;  %v3819_v24 = vld [vmem:[%s11493_s12 + $0x888] sm:$0xff] }
 0x4f2   : > { %6098 = vmatpush1.bf16.msra.mxu1 %v6097_v39  ;;  %6198 = vmatpush1.bf16.msra.mxu0 %v6197_v40  ;;  %v3764_v39 = vld [vmem:[%s11493_s12 + $0x6d0] sm:$0xff]  ;;  %v3759_v40 = vld [vmem:[%s11493_s12 + $0x6a8] sm:$0xff] }
 0x4f3   : > { %6100 = vmatprep.subr.bf16.mxu1 %v6099_v45  ;;  %6200 = vmatprep.subr.bf16.mxu0 %v6199_v15  ;;  %v6119_v42 = vpack.c.bf16 %v3764_v39, %v3757_v61  ;;  %v3756_v45 = vld [vmem:[%s11493_s12 + $0x690] sm:$0xff]  ;;  %v3763_v15 = vld [vmem:[%s11493_s12 + $0x6c8] sm:$0xff]  ;;  %v6219_v46 = vpack.c.bf16 %v3766_v43, %v3759_v40  ;;  %v3798_v39 = vld [vmem:[%s11493_s12 + $0x7e0] sm:$0xff] }
 0x4f4   : > { %v6121_v47 = vpack.c.bf16 %v3763_v15, %v3756_v45  ;;  %v3805_v40 = vld [vmem:[%s11493_s12 + $0x818] sm:$0xff] }
 0x4f6   : > { %6102 = vmatpush1.bf16.msra.mxu1 %v6101_v36  ;;  %6202 = vmatpush1.bf16.msra.mxu0 %v6201_v49  ;;  %v3778_v36 = vld [vmem:[%s11493_s12 + $0x740] sm:$0xff]  ;;  %v3773_v49 = vld [vmem:[%s11493_s12 + $0x718] sm:$0xff] }
 0x4f7   : > { %6104 = vmatprep.subr.bf16.mxu1 %v6103_v0  ;;  %6204 = vmatprep.subr.bf16.mxu0 %v6203_v6  ;;  %v6123_v8 = vpack.c.bf16 %v3778_v36, %v3771_v59  ;;  %v6223_v0 = vpack.c.bf16 %v3780_v62, %v3773_v49  ;;  %v10522_v6 = vld [vmem:[%s11492_s11] sm:$0xf]  ;;  %v3820_v36 = vld [vmem:[%s11493_s12 + $0x890] sm:$0xff]  ;;  %v3815_v49 = vld [vmem:[%s11493_s12 + $0x868] sm:$0xff] }
 0x4f8   : > { %v10526_v55 = vrot.slane %v10522_v6, %v8611_v52  ;;  %v10530_v9 = vrot.slane %v10522_v6, %v8619_v54  ;;  %v10638_v62 = vrot.slane %v10522_v6, %v8690_v27 }
 0x4fa   : > { %6106 = vmatpush1.bf16.msra.mxu1 %v6105_v14  ;;  %6206 = vmatpush1.bf16.msra.mxu0 %v6205_v16 }
 0x4fb   : > { %6108 = vmatprep.subr.bf16.mxu1 %v6107_v3  ;;  %6208 = vmatprep.subr.bf16.mxu0 %v6207_v18  ;;  %v3779_v3 = vld [vmem:[%s11493_s12 + $0x748] sm:$0xff]  ;;  %v3785_v18 = vld [vmem:[%s11493_s12 + $0x778] sm:$0xff] }
 0x4fc   : > { %v6225_v29 = vpack.c.bf16 %v3779_v3, %v3772_v63  ;;  %v6127_v20 = vpack.c.bf16 %v3792_v1, %v3785_v18 }
 0x4fe   : > { %6110 = vmatpush1.bf16.msra.mxu1 %v6109_v25  ;;  %6210 = vmatpush1.bf16.msra.mxu0 %v6209_v26  ;;  %v6125_v26 = vpack.c.bf16 %v3777_v2, %v3770_v56  ;;  %v6133_v2 = vpack.c.bf16 %v3805_v40, %v3798_v39 }
 0x4ff   : > { %6112 = vmatprep.subr.bf16.mxu1 %v6111_v30  ;;  %6212 = vmatprep.subr.bf16.mxu0 %v6211_v31  ;;  %v3791_v30 = vld [vmem:[%s11493_s12 + $0x7a8] sm:$0xff] }
 0x502   : > { %6114 = vmatpush1.bf16.msra.mxu1 %v6113_v21  ;;  %6214 = vmatpush1.bf16.msra.mxu0 %v6213_v33  ;;  %v3793_v21 = vld [vmem:[%s11493_s12 + $0x7b8] sm:$0xff]  ;;  %v3799_v33 = vld [vmem:[%s11493_s12 + $0x7e8] sm:$0xff] }
 0x503   : > { %6116 = vmatprep.subr.bf16.mxu1 %v6115_v44  ;;  %6216 = vmatprep.subr.bf16.mxu0 %v6215_v28  ;;  %v3806_v44 = vld [vmem:[%s11493_s12 + $0x820] sm:$0xff]  ;;  %v3801_v28 = vld [vmem:[%s11493_s12 + $0x7f8] sm:$0xff]  ;;  %v6229_v61 = vpack.c.bf16 %v3793_v21, %v3786_v12 }
 0x504   : > { %v3833_v12 = vld [vmem:[%s11493_s12 + $0x8f8] sm:$0xff] }
 0x506   : > { %6118 = vmatpush1.bf16.msra.mxu1 %v6117_v38  ;;  %6218 = vmatpush1.bf16.msra.mxu0 %v6217_v48  ;;  %v6129_v48 = vpack.c.bf16 %v3791_v30, %v3784_v13  ;;  %v3834_v30 = vld [vmem:[%s11493_s12 + $0x900] sm:$0xff] }
 0x507   : > { %6120 = vmatprep.subr.bf16.mxu1 %v6119_v42  ;;  %6220 = vmatprep.subr.bf16.mxu0 %v6219_v46  ;;  %v6131_v46 = vpack.c.bf16 %v3806_v44, %v3799_v33  ;;  %v3828_v33 = vld [vmem:[%s11493_s12 + $0x8d0] sm:$0xff]  ;;  %v3841_v44 = vld [vmem:[%s11493_s12 + $0x938] sm:$0xff] }
 0x50a   : > { %6122 = vmatpush1.bf16.msra.mxu1 %v6121_v47  ;;  %6222 = vmatpush1.bf16.msra.mxu0 %v6221_v58  ;;  %v6231_v47 = vpack.c.bf16 %v3808_v35, %v3801_v28  ;;  %v3813_v58 = vld [vmem:[%s11493_s12 + $0x858] sm:$0xff] }
 0x50b   : > { %6124 = vmatprep.subr.bf16.mxu1 %v6123_v8  ;;  %6224 = vmatprep.subr.bf16.mxu0 %v6223_v0  ;;  %v3822_v8 = vld [vmem:[%s11493_s12 + $0x8a0] sm:$0xff]  ;;  %v6135_v1 = vpack.c.bf16 %v3820_v36, %v3813_v58  ;;  %v3849_v58 = vld [vmem:[%s11493_s12 + $0x978] sm:$0xff] }
 0x50c   : > { %v6235_v22 = vpack.c.bf16 %v3822_v8, %v3815_v49  ;;  %v3862_v36 = vld [vmem:[%s11493_s12 + $0x9e0] sm:$0xff]  ;;  %v3857_v49 = vld [vmem:[%s11493_s12 + $0x9b8] sm:$0xff]  ;;  %v3864_v8 = vld [vmem:[%s11493_s12 + $0x9f0] sm:$0xff] }
 0x59f   : > { %v3329_v10 = vpop.f32.mrb[32].mxu1  ;;  %v10532_v11 = vpop.f32.mrb[24].mxu0 }
 0x5a0   : > { %v6458_v14 = vadd.f32 %v3329_v10, %v10526_v55  ;;  %v3331_v16 = vpop.f32.mrb[33].mxu1  ;;  %v10541_v5 = vpop.f32.mrb[25].mxu0 }
 0x5a1   : > { %v6459_v19 = vadd.f32 %v3331_v16, %v10530_v9  ;;  %v3812_v16 = vld [vmem:[%s11493_s12 + $0x850] sm:$0xff]  ;;  %v6467_v13 = vadd.f32 %v10541_v5, %v10638_v62 }
 0x5a2   : > { %v10572_v31 = vmax.f32 %v6458_v14, 0.0  ;;  %v6233_v14 = vpack.c.bf16 %v3807_v57, %v3800_v50  ;;  %v6137_v5 = vpack.c.bf16 %v3819_v24, %v3812_v16  ;;  %v3842_v57 = vld [vmem:[%s11493_s12 + $0x940] sm:$0xff]  ;;  %v3861_v16 = vld [vmem:[%s11493_s12 + $0x9d8] sm:$0xff] }
 0x5a3   : > { %v10562_v41 = vmax.f32 %v6459_v19, 0.0  ;;  %v3335_v53 = vpop.f32.mrb[34].mxu1  ;;  %v10564_v25 = vpop.f32.mrb[26].mxu0  ;;  %v10712_v39 = vmax.f32 %v6467_v13, 0.0  ;;  %v3869_v24 = vld [vmem:[%s11493_s12 + $0xa18] sm:$0xff] }
 0x5a4   : > { %v6460_v4 = vadd.f32 %v3335_v53, %v10526_v55  ;;  %v3337_v60 = vpop.f32.mrb[35].mxu1  ;;  %v10575_v32 = vpop.f32.mrb[27].mxu0  ;;  %v3814_v53 = vld [vmem:[%s11493_s12 + $0x860] sm:$0xff] }
 0x5a5   : > { %v6461_v34 = vadd.f32 %v3337_v60, %v10530_v9  ;;  %4009 = vmatprep.mubr.f32.mxu1 %v10562_v41  ;;  %4187 = vmatprep.mubr.f32.mxu0 %v10562_v41 }
 0x5a6   : > { %4010 = vmatmul.mubr.f32.vlgmr.msra.gmra.mrb[40].mxu1 %v10572_v31  ;;  %4188 = vmatmul.mubr.f32.vlgmr.msra.gmra.mrb[32].mxu0 %v10572_v31  ;;  %v10610_v42 = vmax.f32 %v6460_v4, 0.0  ;;  %v3836_v4 = vld [vmem:[%s11493_s12 + $0x910] sm:$0xff] }
 0x5a7   : > { %v10600_v23 = vmax.f32 %v6461_v34, 0.0  ;;  %6126 = vmatpush1.bf16.msra.mxu1 %v6125_v26  ;;  %6226 = vmatpush1.bf16.msra.mxu0 %v6225_v29  ;;  %v3341_v37 = vpop.f32.mrb[36].mxu1  ;;  %v10602_v38 = vpop.f32.mrb[28].mxu0  ;;  %v3821_v26 = vld [vmem:[%s11493_s12 + $0x898] sm:$0xff]  ;;  %v3827_v29 = vld [vmem:[%s11493_s12 + $0x8c8] sm:$0xff] }
 0x5a8   : > { %v6462_v43 = vadd.f32 %v3341_v37, %v10526_v55  ;;  %v3343_v45 = vpop.f32.mrb[37].mxu1  ;;  %v10613_v15 = vpop.f32.mrb[29].mxu0  ;;  %6128 = vmatprep.subr.bf16.mxu1 %v6127_v20  ;;  %6228 = vmatprep.subr.bf16.mxu0 %v6227_v17  ;;  %v6237_v20 = vpack.c.bf16 %v3821_v26, %v3814_v53  ;;  %v3826_v17 = vld [vmem:[%s11493_s12 + $0x8c0] sm:$0xff]  ;;  %v3835_v34 = vld [vmem:[%s11493_s12 + $0x908] sm:$0xff]  ;;  %v6139_v28 = vpack.c.bf16 %v3834_v30, %v3827_v29  ;;  %v3848_v37 = vld [vmem:[%s11493_s12 + $0x970] sm:$0xff] }
 0x5a9   : > { %v6463_v59 = vadd.f32 %v3343_v45, %v10530_v9  ;;  %4015 = vmatprep.mubr.f32.mxu1 %v10600_v23  ;;  %4193 = vmatprep.mubr.f32.mxu0 %v10600_v23  ;;  %v6141_v40 = vpack.c.bf16 %v3833_v12, %v3826_v17  ;;  %v3840_v45 = vld [vmem:[%s11493_s12 + $0x930] sm:$0xff]  ;;  %v3871_v26 = vld [vmem:[%s11493_s12 + $0xa28] sm:$0xff]  ;;  %v3877_v17 = vld [vmem:[%s11493_s12 + $0xa58] sm:$0xff] }
 0x5aa   : > { %4016 = vmatmul.mubr.f32.gmra.mrb[42].mxu1 %v10610_v42  ;;  %4194 = vmatmul.mubr.f32.gmra.mrb[34].mxu0 %v10610_v42  ;;  %v10649_v63 = vmax.f32 %v6462_v43, 0.0  ;;  %v6241_v43 = vpack.c.bf16 %v3835_v34, %v3828_v33  ;;  %v3876_v53 = vld [vmem:[%s11493_s12 + $0xa50] sm:$0xff]  ;;  %v3883_v12 = vld [vmem:[%s11493_s12 + $0xa88] sm:$0xff]  ;;  %v3890_v33 = vld [vmem:[%s11493_s12 + $0xac0] sm:$0xff] }
 0x5ab   : > { %v10642_v0 = vmax.f32 %v6463_v59, 0.0  ;;  %6130 = vmatpush1.bf16.msra.mxu1 %v6129_v48  ;;  %6230 = vmatpush1.bf16.msra.mxu0 %v6229_v61  ;;  %v3347_v10 = vpop.f32.mrb[38].mxu1  ;;  %v10644_v56 = vpop.f32.mrb[30].mxu0  ;;  %v3843_v48 = vld [vmem:[%s11493_s12 + $0x948] sm:$0xff]  ;;  %v3850_v61 = vld [vmem:[%s11493_s12 + $0x980] sm:$0xff]  ;;  %v3868_v30 = vld [vmem:[%s11493_s12 + $0xa10] sm:$0xff] }
 0x5ac   : > { %v6464_v3 = vadd.f32 %v3347_v10, %v10526_v55  ;;  %v3349_v18 = vpop.f32.mrb[39].mxu1  ;;  %v10652_v19 = vpop.f32.mrb[31].mxu0  ;;  %6132 = vmatprep.subr.bf16.mxu1 %v6131_v46  ;;  %6232 = vmatprep.subr.bf16.mxu0 %v6231_v47  ;;  %v3847_v46 = vld [vmem:[%s11493_s12 + $0x968] sm:$0xff]  ;;  %v6143_v47 = vpack.c.bf16 %v3848_v37, %v3841_v44  ;;  %v6243_v50 = vpack.c.bf16 %v3850_v61, %v3843_v48  ;;  %v3885_v34 = vld [vmem:[%s11493_s12 + $0xa98] sm:$0xff]  ;;  %v3892_v44 = vld [vmem:[%s11493_s12 + $0xad0] sm:$0xff] }
 0x5ad   : > { %v6465_v55 = vadd.f32 %v3349_v18, %v10530_v9  ;;  %4021 = vmatprep.mubr.f32.mxu1 %v10642_v0  ;;  %4199 = vmatprep.mubr.f32.mxu0 %v10642_v0  ;;  %v3829_v9 = vld [vmem:[%s11493_s12 + $0x8d8] sm:$0xff]  ;;  %v3855_v59 = vld [vmem:[%s11493_s12 + $0x9a8] sm:$0xff]  ;;  %v6145_v10 = vpack.c.bf16 %v3847_v46, %v3840_v45  ;;  %v6247_v18 = vpack.c.bf16 %v3864_v8, %v3857_v49  ;;  %v3882_v37 = vld [vmem:[%s11493_s12 + $0xa80] sm:$0xff] }
 0x5ae   : > { %4022 = vmatmul.mubr.f32.gmra.mrb[44].mxu1 %v10649_v63  ;;  %4200 = vmatmul.mubr.f32.gmra.mrb[36].mxu0 %v10649_v63  ;;  %v10690_v21 = vmax.f32 %v6464_v3, 0.0  ;;  %v6239_v35 = vpack.c.bf16 %v3836_v4, %v3829_v9  ;;  %v6147_v3 = vpack.c.bf16 %v3862_v36, %v3855_v59  ;;  %v3875_v9 = vld [vmem:[%s11493_s12 + $0xa48] sm:$0xff]  ;;  %v6151_v4 = vpack.c.bf16 %v3876_v53, %v3869_v24  ;;  %v3889_v48 = vld [vmem:[%s11493_s12 + $0xab8] sm:$0xff]  ;;  %v3884_v45 = vld [vmem:[%s11493_s12 + $0xa90] sm:$0xff] }
 0x5af   : > { %v10682_v60 = vmax.f32 %v6465_v55, 0.0  ;;  %6134 = vmatpush1.bf16.msra.mxu1 %v6133_v2  ;;  %6234 = vmatpush1.bf16.msra.mxu0 %v6233_v14  ;;  %v6245_v2 = vpack.c.bf16 %v3849_v58, %v3842_v57  ;;  %v3854_v14 = vld [vmem:[%s11493_s12 + $0x9a0] sm:$0xff]  ;;  %v10800_v61 = vrot.slane %v10522_v6, %v8839_v7  ;;  %v3891_v46 = vld [vmem:[%s11493_s12 + $0xac8] sm:$0xff]  ;;  %v6157_v58 = vpack.c.bf16 %v3889_v48, %v3882_v37  ;;  %v3585_v37 = vld [vmem:[%s11493_s12 + $0x138] sm:$0xff] }
 0x5b0   : > { %6136 = vmatprep.subr.bf16.mxu1 %v6135_v1  ;;  %6236 = vmatprep.subr.bf16.mxu0 %v6235_v22  ;;  %v3856_v1 = vld [vmem:[%s11493_s12 + $0x9b0] sm:$0xff]  ;;  %v3863_v22 = vld [vmem:[%s11493_s12 + $0x9e8] sm:$0xff]  ;;  %v3878_v55 = vld [vmem:[%s11493_s12 + $0xa60] sm:$0xff]  ;;  %v6149_v29 = vpack.c.bf16 %v3861_v16, %v3854_v14  ;;  %v6257_v59 = vpack.c.bf16 %v3891_v46, %v3884_v45  ;;  %v6469_v14 = vadd.f32 %v10575_v32, %v10638_v62 }
 0x5b1   : > { %4027 = vmatprep.mubr.f32.mxu1 %v10682_v60  ;;  %4205 = vmatprep.mubr.f32.mxu0 %v10682_v60  ;;  %v6249_v13 = vpack.c.bf16 %v3863_v22, %v3856_v1  ;;  %v3558_v6 = vld [vmem:[%s11493_s12 + $0x60] sm:$0xff]  ;;  %v3671_v57 = vld [vmem:[%s11493_s12 + $0x3e8] sm:$0xff]  ;;  %v6466_v36 = vadd.f32 %v10532_v11, %v10800_v61  ;;  %v3552_v16 = vld [vmem:[%s11493_s12 + $0x30] sm:$0xff]  ;;  %v6468_v24 = vadd.f32 %v10564_v25, %v10800_v61 }
 0x5b2   : > { %4028 = vmatmul.mubr.f32.gmra.mrb[46].mxu1 %v10690_v21  ;;  %4206 = vmatmul.mubr.f32.gmra.mrb[38].mxu0 %v10690_v21  ;;  %v3559_v11 = vld [vmem:[%s11493_s12 + $0x68] sm:$0xff]  ;;  %v3678_v32 = vld [vmem:[%s11493_s12 + $0x420] sm:$0xff]  ;;  %v3685_v1 = vld [vmem:[%s11493_s12 + $0x458] sm:$0xff] }
 0x5b3   : > { %6138 = vmatpush1.bf16.msra.mxu1 %v6137_v5  ;;  %6238 = vmatpush1.bf16.msra.mxu0 %v6237_v20  ;;  %v6251_v5 = vpack.c.bf16 %v3878_v55, %v3871_v26  ;;  %v3870_v20 = vld [vmem:[%s11493_s12 + $0xa20] sm:$0xff]  ;;  %v10848_v22 = vmax.f32 %v6466_v36, 0.0  ;;  %v6361_v26 = vpack.c.bf16 %v3559_v11, %v3552_v16  ;;  %v3564_v55 = vld [vmem:[%s11493_s12 + $0x90] sm:$0xff]  ;;  %v3587_v46 = vld [vmem:[%s11493_s12 + $0x148] sm:$0xff] }
 0x5b4   : > { %5009 = vmatprep.mubr.msk.f32.mxu1 %vm979_vm0, %v10712_v39  ;;  %5013 = vmatprep.mubr.msk.f32.mxu0 %vm979_vm0, %v10712_v39  ;;  %v3566_v25 = vld [vmem:[%s11493_s12 + $0xa0] sm:$0xff]  ;;  %v3580_v45 = vld [vmem:[%s11493_s12 + $0x110] sm:$0xff] }
 0x5b5   : > { %6140 = vmatprep.subr.bf16.mxu1 %v6139_v28  ;;  %6240 = vmatprep.subr.bf16.mxu0 %v6239_v35  ;;  %v6153_v28 = vpack.c.bf16 %v3875_v9, %v3868_v30  ;;  %v6253_v35 = vpack.c.bf16 %v3877_v17, %v3870_v20  ;;  %v6471_v30 = vadd.f32 %v10613_v15, %v10638_v62  ;;  %v3579_v20 = vld [vmem:[%s11493_s12 + $0x108] sm:$0xff]  ;;  %v3586_v15 = vld [vmem:[%s11493_s12 + $0x140] sm:$0xff]  ;;  %v3692_v17 = vld [vmem:[%s11493_s12 + $0x490] sm:$0xff] }
 0x5b6   : > { %v3592_v36 = vld [vmem:[%s11493_s12 + $0x170] sm:$0xff]  ;;  %v3614_v16 = vld [vmem:[%s11493_s12 + $0x220] sm:$0xff] }
 0x5b7   : > { %6142 = vmatpush1.bf16.msra.mxu1 %v6141_v40  ;;  %6242 = vmatpush1.bf16.msra.mxu0 %v6241_v43  ;;  %v6155_v40 = vpack.c.bf16 %v3890_v33, %v3883_v12  ;;  %v6255_v43 = vpack.c.bf16 %v3892_v44, %v3885_v34  ;;  %v3699_v12 = vld [vmem:[%s11493_s12 + $0x4c8] sm:$0xff]  ;;  %v10886_v33 = vmax.f32 %v6468_v24, 0.0  ;;  %v6470_v34 = vadd.f32 %v10602_v38, %v10800_v61  ;;  %v3720_v11 = vld [vmem:[%s11493_s12 + $0x570] sm:$0xff]  ;;  %v3606_v24 = vld [vmem:[%s11493_s12 + $0x1e0] sm:$0xff] }
 0x5b8   : > { %6144 = vmatprep.subr.bf16.mxu1 %v6143_v47  ;;  %6244 = vmatprep.subr.bf16.mxu0 %v6243_v50  ;;  %v3551_v47 = vld [vmem:[%s11493_s12 + $0x28] sm:$0xff]  ;;  %v3664_v50 = vld [vmem:[%s11493_s12 + $0x3b0] sm:$0xff]  ;;  %v10896_v48 = vmax.f32 %v6471_v30, 0.0  ;;  %v6267_v38 = vpack.c.bf16 %v3586_v15, %v3579_v20 }
 0x5b9   : > { %v6259_v49 = vpack.c.bf16 %v3558_v6, %v3551_v47  ;;  %v6359_v8 = vpack.c.bf16 %v3671_v57, %v3664_v50  ;;  %v3593_v47 = vld [vmem:[%s11493_s12 + $0x178] sm:$0xff]  ;;  %v10924_v50 = vmax.f32 %v6470_v34, 0.0  ;;  %v6472_v57 = vadd.f32 %v10644_v56, %v10800_v61  ;;  %v3594_v56 = vld [vmem:[%s11493_s12 + $0x180] sm:$0xff]  ;;  %v3615_v30 = vld [vmem:[%s11493_s12 + $0x228] sm:$0xff] }
 0x5ba   : > { %v3713_v6 = vld [vmem:[%s11493_s12 + $0x538] sm:$0xff] }
 0x5bb   : > { %6146 = vmatpush1.bf16.msra.mxu1 %v6145_v10  ;;  %6246 = vmatpush1.bf16.msra.mxu0 %v6245_v2  ;;  %v3550_v10 = vld [vmem:[%s11493_s12 + $0x20] sm:$0xff]  ;;  %v3557_v2 = vld [vmem:[%s11493_s12 + $0x58] sm:$0xff] }
 0x5bc   : > { %6148 = vmatprep.subr.bf16.mxu1 %v6147_v3  ;;  %6248 = vmatprep.subr.bf16.mxu0 %v6247_v18  ;;  %v3565_v3 = vld [vmem:[%s11493_s12 + $0x98] sm:$0xff]  ;;  %v3572_v18 = vld [vmem:[%s11493_s12 + $0xd0] sm:$0xff]  ;;  %v6261_v53 = vpack.c.bf16 %v3557_v2, %v3550_v10 }
 0x5bd   : > { %v6263_v9 = vpack.c.bf16 %v3572_v18, %v3565_v3  ;;  %v3601_v61 = vld [vmem:[%s11493_s12 + $0x1b8] sm:$0xff]  ;;  %v3727_v3 = vld [vmem:[%s11493_s12 + $0x5a8] sm:$0xff]  ;;  %v10960_v18 = vmax.f32 %v6472_v57, 0.0 }
 0x5be   : > { %v3643_v57 = vld [vmem:[%s11493_s12 + $0x308] sm:$0xff] }
 0x5bf   : > { %6150 = vmatpush1.bf16.msra.mxu1 %v6149_v29  ;;  %6250 = vmatpush1.bf16.msra.mxu0 %v6249_v13  ;;  %v3571_v29 = vld [vmem:[%s11493_s12 + $0xc8] sm:$0xff]  ;;  %v10858_v13 = vmax.f32 %v6469_v14, 0.0 }
 0x5c0   : > { %6152 = vmatprep.subr.bf16.mxu1 %v6151_v4  ;;  %6252 = vmatprep.subr.bf16.mxu0 %v6251_v5  ;;  %v6363_v4 = vpack.c.bf16 %v3685_v1, %v3678_v32  ;;  %v3573_v5 = vld [vmem:[%s11493_s12 + $0xd8] sm:$0xff]  ;;  %v6265_v44 = vpack.c.bf16 %v3571_v29, %v3564_v55  ;;  %v3607_v14 = vld [vmem:[%s11493_s12 + $0x1e8] sm:$0xff]  ;;  %v6373_v1 = vpack.c.bf16 %v3601_v61, %v3594_v56  ;;  %v3608_v29 = vld [vmem:[%s11493_s12 + $0x1f0] sm:$0xff] }
 0x5c1   : > { %v6375_v55 = vpack.c.bf16 %v3727_v3, %v3720_v11  ;;  %v6377_v15 = vpack.c.bf16 %v3615_v30, %v3608_v29  ;;  %v3648_v56 = vld [vmem:[%s11493_s12 + $0x330] sm:$0xff]  ;;  %v3650_v11 = vld [vmem:[%s11493_s12 + $0x340] sm:$0xff]  ;;  %v3657_v3 = vld [vmem:[%s11493_s12 + $0x378] sm:$0xff] }
 0x5c2   : > { %v3669_v29 = vld [vmem:[%s11493_s12 + $0x3d8] sm:$0xff]  ;;  %v3776_v30 = vld [vmem:[%s11493_s12 + $0x730] sm:$0xff] }
 0x5c3   : > { %6154 = vmatpush1.bf16.msra.mxu1 %v6153_v28  ;;  %6254 = vmatpush1.bf16.msra.mxu0 %v6253_v35  ;;  %v6365_v28 = vpack.c.bf16 %v3573_v5, %v3566_v25  ;;  %v3578_v35 = vld [vmem:[%s11493_s12 + $0x100] sm:$0xff]  ;;  %v3741_v5 = vld [vmem:[%s11493_s12 + $0x618] sm:$0xff] }
 0x5c4   : > { %6156 = vmatprep.subr.bf16.mxu1 %v6155_v40  ;;  %6256 = vmatprep.subr.bf16.mxu0 %v6255_v43  ;;  %v6473_v40 = vadd.f32 %v10652_v19, %v10638_v62  ;;  %v6367_v43 = vpack.c.bf16 %v3699_v12, %v3692_v17  ;;  %v3600_v62 = vld [vmem:[%s11493_s12 + $0x1b0] sm:$0xff]  ;;  %v3706_v19 = vld [vmem:[%s11493_s12 + $0x500] sm:$0xff]  ;;  %v3627_v12 = vld [vmem:[%s11493_s12 + $0x288] sm:$0xff] }
 0x5c5   : > { %v6271_v10 = vpack.c.bf16 %v3600_v62, %v3593_v47  ;;  %v6371_v2 = vpack.c.bf16 %v3713_v6, %v3706_v19  ;;  %v3734_v25 = vld [vmem:[%s11493_s12 + $0x5e0] sm:$0xff]  ;;  %v3620_v17 = vld [vmem:[%s11493_s12 + $0x250] sm:$0xff]  ;;  %v3641_v47 = vld [vmem:[%s11493_s12 + $0x2f8] sm:$0xff] }
 0x5c6   : > { %v3636_v6 = vld [vmem:[%s11493_s12 + $0x2d0] sm:$0xff] }
 0x5c7   : > { %6158 = vmatpush1.bf16.msra.mxu1 %v6157_v58  ;;  %6258 = vmatpush1.bf16.msra.mxu0 %v6257_v59  ;;  %v6269_v58 = vpack.c.bf16 %v3585_v37, %v3578_v35  ;;  %v6369_v59 = vpack.c.bf16 %v3587_v46, %v3580_v45  ;;  %v3635_v35 = vld [vmem:[%s11493_s12 + $0x2c8] sm:$0xff]  ;;  %v3642_v37 = vld [vmem:[%s11493_s12 + $0x300] sm:$0xff] }
 0x5c8   : > { %6260 = vmatprep.subr.bf16.mxu1 %v6259_v49  ;;  %6360 = vmatprep.subr.bf16.mxu0 %v6359_v8  ;;  %v3599_v49 = vld [vmem:[%s11493_s12 + $0x1a8] sm:$0xff]  ;;  %v10934_v8 = vmax.f32 %v6473_v40, 0.0  ;;  %v3748_v40 = vld [vmem:[%s11493_s12 + $0x650] sm:$0xff]  ;;  %v3634_v46 = vld [vmem:[%s11493_s12 + $0x2c0] sm:$0xff]  ;;  %v6283_v62 = vpack.c.bf16 %v3642_v37, %v3635_v35 }
 0x5c9   : > { %v6273_v32 = vpack.c.bf16 %v3599_v49, %v3592_v36  ;;  %v3762_v36 = vld [vmem:[%s11493_s12 + $0x6c0] sm:$0xff]  ;;  %v3769_v49 = vld [vmem:[%s11493_s12 + $0x6f8] sm:$0xff] }
 0x5ca   : > { %4099 = vmatmul.mubr.f32.vlgmr.msra.gmra.mrb[40].mxu1 %v10848_v22  ;;  %4277 = vmatmul.mubr.f32.vlgmr.msra.gmra.mrb[32].mxu0 %v10848_v22  ;;  %v3698_v35 = vld [vmem:[%s11493_s12 + $0x4c0] sm:$0xff] }
 0x5cb   : > { %5010 = vmatprep.mubr.msk.f32.mxu1 %vm979_vm0, %v10858_v13  ;;  %5014 = vmatprep.mubr.msk.f32.mxu0 %vm979_vm0, %v10858_v13 }
 0x5cc   : > { %6262 = vmatpush1.bf16.msra.mxu1 %v6261_v53  ;;  %6362 = vmatpush3.bf16.msra.mxu0 %v6361_v26  ;;  %v3613_v53 = vld [vmem:[%s11493_s12 + $0x218] sm:$0xff]  ;;  %v6275_v26 = vpack.c.bf16 %v3614_v16, %v3607_v14  ;;  %v6387_v14 = vpack.c.bf16 %v3769_v49, %v3762_v36  ;;  %v3655_v16 = vld [vmem:[%s11493_s12 + $0x368] sm:$0xff]  ;;  %v3818_v49 = vld [vmem:[%s11493_s12 + $0x880] sm:$0xff] }
 0x5cd   : > { %6264 = vmatprep.subr.bf16.mxu1 %v6263_v9  ;;  %6364 = vmatprep.subr.bf16.mxu0 %v6363_v4  ;;  %v3621_v9 = vld [vmem:[%s11493_s12 + $0x258] sm:$0xff]  ;;  %v3628_v4 = vld [vmem:[%s11493_s12 + $0x290] sm:$0xff]  ;;  %v6277_v20 = vpack.c.bf16 %v3613_v53, %v3606_v24  ;;  %v6289_v24 = vpack.c.bf16 %v3655_v16, %v3648_v56  ;;  %v6389_v53 = vpack.c.bf16 %v3657_v3, %v3650_v11  ;;  %v3711_v36 = vld [vmem:[%s11493_s12 + $0x528] sm:$0xff] }
 0x5ce   : > { %4105 = vmatmul.mubr.f32.gmra.mrb[42].mxu1 %v10886_v33  ;;  %4283 = vmatmul.mubr.f32.gmra.mrb[34].mxu0 %v10886_v33  ;;  %v6279_v34 = vpack.c.bf16 %v3628_v4, %v3621_v9  ;;  %v3783_v9 = vld [vmem:[%s11493_s12 + $0x768] sm:$0xff]  ;;  %v3677_v4 = vld [vmem:[%s11493_s12 + $0x418] sm:$0xff]  ;;  %v3726_v56 = vld [vmem:[%s11493_s12 + $0x5a0] sm:$0xff] }
 0x5cf   : > { %5011 = vmatprep.mubr.msk.f32.mxu1 %vm979_vm0, %v10896_v48  ;;  %5015 = vmatprep.mubr.msk.f32.mxu0 %vm979_vm0, %v10896_v48  ;;  %v3718_v11 = vld [vmem:[%s11493_s12 + $0x560] sm:$0xff]  ;;  %v3725_v3 = vld [vmem:[%s11493_s12 + $0x598] sm:$0xff] }
 0x5d0   : > { %6266 = vmatpush1.bf16.msra.mxu1 %v6265_v44  ;;  %6366 = vmatpush3.bf16.msra.mxu0 %v6365_v28  ;;  %v6379_v44 = vpack.c.bf16 %v3741_v5, %v3734_v25  ;;  %v3629_v28 = vld [vmem:[%s11493_s12 + $0x298] sm:$0xff]  ;;  %v3684_v25 = vld [vmem:[%s11493_s12 + $0x450] sm:$0xff] }
 0x5d1   : > { %6268 = vmatprep.subr.bf16.mxu1 %v6267_v38  ;;  %6368 = vmatprep.subr.bf16.mxu0 %v6367_v43  ;;  %v3755_v38 = vld [vmem:[%s11493_s12 + $0x688] sm:$0xff]  ;;  %v6281_v43 = vpack.c.bf16 %v3627_v12, %v3620_v17  ;;  %v6295_v17 = vpack.c.bf16 %v3684_v25, %v3677_v4  ;;  %v3676_v12 = vld [vmem:[%s11493_s12 + $0x410] sm:$0xff]  ;;  %v3846_v4 = vld [vmem:[%s11493_s12 + $0x960] sm:$0xff] }
 0x5d2   : > { %4111 = vmatmul.mubr.f32.gmra.mrb[44].mxu1 %v10924_v50  ;;  %4289 = vmatmul.mubr.f32.gmra.mrb[36].mxu0 %v10924_v50  ;;  %v6383_v19 = vpack.c.bf16 %v3755_v38, %v3748_v40  ;;  %v3853_v25 = vld [vmem:[%s11493_s12 + $0x998] sm:$0xff] }
 0x5d3   : > { %5012 = vmatprep.mubr.msk.f32.mxu1 %vm979_vm0, %v10934_v8  ;;  %5016 = vmatprep.mubr.msk.f32.mxu0 %vm979_vm0, %v10934_v8 }
 0x5d4   : > { %6270 = vmatpush1.bf16.msra.mxu1 %v6269_v58  ;;  %6370 = vmatpush3.bf16.msra.mxu0 %v6369_v59  ;;  %v3649_v58 = vld [vmem:[%s11493_s12 + $0x338] sm:$0xff]  ;;  %v3656_v59 = vld [vmem:[%s11493_s12 + $0x370] sm:$0xff] }
 0x5d5   : > { %6272 = vmatprep.subr.bf16.mxu1 %v6271_v10  ;;  %6372 = vmatprep.subr.bf16.mxu0 %v6371_v2  ;;  %v6285_v10 = vpack.c.bf16 %v3641_v47, %v3634_v46  ;;  %v6385_v2 = vpack.c.bf16 %v3643_v57, %v3636_v6  ;;  %v6287_v61 = vpack.c.bf16 %v3656_v59, %v3649_v58  ;;  %v3804_v46 = vld [vmem:[%s11493_s12 + $0x810] sm:$0xff]  ;;  %v3811_v47 = vld [vmem:[%s11493_s12 + $0x848] sm:$0xff] }
 0x5d6   : > { %4117 = vmatmul.mubr.f32.gmra.mrb[46].mxu1 %v10960_v18  ;;  %4295 = vmatmul.mubr.f32.gmra.mrb[38].mxu0 %v10960_v18  ;;  %v6398_v57 = vpack.c.bf16 %v3811_v47, %v3804_v46  ;;  %v3704_v59 = vld [vmem:[%s11493_s12 + $0x4f0] sm:$0xff]  ;;  %v3767_v47 = vld [vmem:[%s11493_s12 + $0x6e8] sm:$0xff] }
 0x5d7   : > { %4365 = vmatprep.mubr.f32.mxu1 %v10562_v41  ;;  %4543 = vmatprep.mubr.f32.mxu0 %v10562_v41  ;;  %v3622_v41 = vld [vmem:[%s11493_s12 + $0x260] sm:$0xff]  ;;  %v3760_v46 = vld [vmem:[%s11493_s12 + $0x6b0] sm:$0xff] }
 0x5d8   : > { %6274 = vmatpush1.bf16.msra.mxu1 %v6273_v32  ;;  %6374 = vmatpush3.bf16.msra.mxu0 %v6373_v1  ;;  %v6381_v45 = vpack.c.bf16 %v3629_v28, %v3622_v41  ;;  %v3663_v32 = vld [vmem:[%s11493_s12 + $0x3a8] sm:$0xff]  ;;  %v3670_v1 = vld [vmem:[%s11493_s12 + $0x3e0] sm:$0xff]  ;;  %v3797_v41 = vld [vmem:[%s11493_s12 + $0x7d8] sm:$0xff] }
 0x5d9   : > { %6276 = vmatprep.subr.bf16.mxu1 %v6275_v26  ;;  %6376 = vmatprep.subr.bf16.mxu0 %v6375_v55  ;;  %v6291_v26 = vpack.c.bf16 %v3670_v1, %v3663_v32  ;;  %v3662_v55 = vld [vmem:[%s11493_s12 + $0x3a0] sm:$0xff]  ;;  %v3691_v28 = vld [vmem:[%s11493_s12 + $0x488] sm:$0xff]  ;;  %v3832_v32 = vld [vmem:[%s11493_s12 + $0x8f0] sm:$0xff] }
 0x5da   : > { %v6293_v5 = vpack.c.bf16 %v3669_v29, %v3662_v55  ;;  %v6299_v38 = vpack.c.bf16 %v3698_v35, %v3691_v28  ;;  %v3839_v1 = vld [vmem:[%s11493_s12 + $0x928] sm:$0xff]  ;;  %v3860_v28 = vld [vmem:[%s11493_s12 + $0x9d0] sm:$0xff] }
 0x5db   : > { %v6404_v55 = vpack.c.bf16 %v3839_v1, %v3832_v32  ;;  %v3867_v35 = vld [vmem:[%s11493_s12 + $0xa08] sm:$0xff]  ;;  %v3788_v32 = vld [vmem:[%s11493_s12 + $0x790] sm:$0xff] }
 0x5dc   : > { %6278 = vmatpush1.bf16.msra.mxu1 %v6277_v20  ;;  %6378 = vmatpush3.bf16.msra.mxu0 %v6377_v15  ;;  %v6841_v20 = vmov 0.0|0.0   ;;  %v6392_v15 = vpack.c.bf16 %v3783_v9, %v3776_v30  ;;  %v3732_v30 = vld [vmem:[%s11493_s12 + $0x5d0] sm:$0xff]  ;;  %v3739_v9 = vld [vmem:[%s11493_s12 + $0x608] sm:$0xff] }
 0x5dd   : > { %6280 = vmatprep.subr.bf16.mxu1 %v6279_v34  ;;  %6380 = vmatprep.subr.bf16.mxu0 %v6379_v44  ;;  %v3683_v34 = vld [vmem:[%s11493_s12 + $0x448] sm:$0xff]  ;;  %v3790_v44 = vld [vmem:[%s11493_s12 + $0x7a0] sm:$0xff] }
 0x5de   : > { %v6297_v37 = vpack.c.bf16 %v3683_v34, %v3676_v12  ;;  %v6395_v40 = vpack.c.bf16 %v3797_v41, %v3790_v44  ;;  %v6407_v12 = vpack.c.bf16 %v3853_v25, %v3846_v4  ;;  %v3746_v44 = vld [vmem:[%s11493_s12 + $0x640] sm:$0xff]  ;;  %v3753_v41 = vld [vmem:[%s11493_s12 + $0x678] sm:$0xff]  ;;  %v3795_v1 = vld [vmem:[%s11493_s12 + $0x7c8] sm:$0xff] }
 0x5df   : > { %v3823_v4 = vld [vmem:[%s11493_s12 + $0x8a8] sm:$0xff]  ;;  %v3838_v25 = vld [vmem:[%s11493_s12 + $0x920] sm:$0xff] }
 0x5e0   : > { %6282 = vmatpush1.bf16.msra.mxu1 %v6281_v43  ;;  %6382 = vmatpush3.bf16.msra.mxu0 %v6381_v45  ;;  %v3690_v43 = vld [vmem:[%s11493_s12 + $0x480] sm:$0xff]  ;;  %v3697_v45 = vld [vmem:[%s11493_s12 + $0x4b8] sm:$0xff] }
 0x5e1   : > { %6284 = vmatprep.subr.bf16.mxu1 %v6283_v62  ;;  %6384 = vmatprep.subr.bf16.mxu0 %v6383_v19  ;;  %v3705_v62 = vld [vmem:[%s11493_s12 + $0x4f8] sm:$0xff]  ;;  %v3712_v19 = vld [vmem:[%s11493_s12 + $0x530] sm:$0xff]  ;;  %v6301_v6 = vpack.c.bf16 %v3697_v45, %v3690_v43  ;;  %v6410_v43 = vpack.c.bf16 %v3867_v35, %v3860_v28  ;;  %v3859_v28 = vld [vmem:[%s11493_s12 + $0x9c8] sm:$0xff] }
 0x5e2   : > { %v6303_v58 = vpack.c.bf16 %v3712_v19, %v3705_v62  ;;  %v3874_v62 = vld [vmem:[%s11493_s12 + $0xa40] sm:$0xff]  ;;  %v3881_v19 = vld [vmem:[%s11493_s12 + $0xa78] sm:$0xff] }
 0x5e4   : > { %6286 = vmatpush1.bf16.msra.mxu1 %v6285_v10  ;;  %6386 = vmatpush3.bf16.msra.mxu0 %v6385_v2  ;;  %v3825_v10 = vld [vmem:[%s11493_s12 + $0x8b8] sm:$0xff]  ;;  %v3719_v2 = vld [vmem:[%s11493_s12 + $0x568] sm:$0xff] }
 0x5e5   : > { %6288 = vmatprep.subr.bf16.mxu1 %v6287_v61  ;;  %6388 = vmatprep.subr.bf16.mxu0 %v6387_v14  ;;  %v6305_v61 = vpack.c.bf16 %v3711_v36, %v3704_v59  ;;  %v6401_v14 = vpack.c.bf16 %v3825_v10, %v3818_v49  ;;  %v6307_v16 = vpack.c.bf16 %v3726_v56, %v3719_v2  ;;  %v3774_v49 = vld [vmem:[%s11493_s12 + $0x720] sm:$0xff]  ;;  %v3781_v10 = vld [vmem:[%s11493_s12 + $0x758] sm:$0xff]  ;;  %v3888_v2 = vld [vmem:[%s11493_s12 + $0xab0] sm:$0xff] }
 0x5e6   : > { %v6413_v59 = vpack.c.bf16 %v3881_v19, %v3874_v62  ;;  %v3895_v56 = vld [vmem:[%s11493_s12 + $0xae8] sm:$0xff]  ;;  %v3872_v62 = vld [vmem:[%s11493_s12 + $0xa30] sm:$0xff] }
 0x5e7   : > { %v3879_v19 = vld [vmem:[%s11493_s12 + $0xa68] sm:$0xff] }
 0x5e8   : > { %6290 = vmatpush1.bf16.msra.mxu1 %v6289_v24  ;;  %6390 = vmatpush3.bf16.msra.mxu0 %v6389_v53  ;;  %v3733_v24 = vld [vmem:[%s11493_s12 + $0x5d8] sm:$0xff]  ;;  %v3740_v53 = vld [vmem:[%s11493_s12 + $0x610] sm:$0xff] }
 0x5e9   : > { %6292 = vmatprep.subr.bf16.mxu1 %v6291_v26  ;;  %6391 = vmatprep.subr.bf16.mxu0 %v6841_v20  ;;  %v6309_v26 = vpack.c.bf16 %v3725_v3, %v3718_v11  ;;  %v6311_v29 = vpack.c.bf16 %v3740_v53, %v3733_v24  ;;  %v6416_v11 = vpack.c.bf16 %v3895_v56, %v3888_v2  ;;  %v3803_v24 = vld [vmem:[%s11493_s12 + $0x808] sm:$0xff]  ;;  %v3810_v53 = vld [vmem:[%s11493_s12 + $0x840] sm:$0xff] }
 0x5ea   : > { %v11358_v2 = vld [vmem:[%s11494_s13] sm:$0x7f] }
 0x5eb   : > { %4544 = vmatmul.mubr.f32.vlgmr.msra.gmra.mrb[40].mxu0 %v10572_v31 }
 0x5ec   : > { %6294 = vmatpush1.bf16.msra.mxu1 %v6293_v5  ;;  %4548 = vmatprep.mubr.f32.mxu0 %v10600_v23  ;;  %v3747_v5 = vld [vmem:[%s11493_s12 + $0x648] sm:$0xff] }
 0x5ed   : > { %6393 = vmatpush1.bf16.msra.mxu0 %v6392_v15  ;;  %6296 = vmatprep.subr.bf16.mxu1 %v6295_v17  ;;  %v3754_v15 = vld [vmem:[%s11493_s12 + $0x680] sm:$0xff]  ;;  %v6313_v17 = vpack.c.bf16 %v3739_v9, %v3732_v30 }
 0x5ee   : > { %6394 = vmatprep.subr.bf16.mxu0 %v6841_v20  ;;  %v6315_v34 = vpack.c.bf16 %v3754_v15, %v3747_v5 }
 0x5ef   : > { %4549 = vmatmul.mubr.f32.gmra.mrb[42].mxu0 %v10610_v42 }
 0x5f0   : > { %6298 = vmatpush1.bf16.msra.mxu1 %v6297_v37  ;;  %4553 = vmatprep.mubr.f32.mxu0 %v10642_v0  ;;  %v3761_v37 = vld [vmem:[%s11493_s12 + $0x6b8] sm:$0xff] }
 0x5f1   : > { %6396 = vmatpush1.bf16.msra.mxu0 %v6395_v40  ;;  %6300 = vmatprep.subr.bf16.mxu1 %v6299_v38  ;;  %v3768_v40 = vld [vmem:[%s11493_s12 + $0x6f0] sm:$0xff]  ;;  %v6317_v38 = vpack.c.bf16 %v3753_v41, %v3746_v44  ;;  %v3851_v41 = vld [vmem:[%s11493_s12 + $0x988] sm:$0xff] }
 0x5f2   : > { %6397 = vmatprep.subr.bf16.mxu0 %v6841_v20  ;;  %v6319_v45 = vpack.c.bf16 %v3768_v40, %v3761_v37  ;;  %v3844_v44 = vld [vmem:[%s11493_s12 + $0x950] sm:$0xff]  ;;  %v3858_v40 = vld [vmem:[%s11493_s12 + $0x9c0] sm:$0xff] }
 0x5f3   : > { %4554 = vmatmul.mubr.f32.gmra.mrb[44].mxu0 %v10649_v63  ;;  %v6345_v35 = vpack.c.bf16 %v3851_v41, %v3844_v44 }
 0x5f4   : > { %6302 = vmatpush1.bf16.msra.mxu1 %v6301_v6  ;;  %4558 = vmatprep.mubr.f32.mxu0 %v10682_v60  ;;  %v3775_v6 = vld [vmem:[%s11493_s12 + $0x728] sm:$0xff] }
 0x5f5   : > { %6399 = vmatpush1.bf16.msra.mxu0 %v6398_v57  ;;  %6304 = vmatprep.subr.bf16.mxu1 %v6303_v58  ;;  %v3782_v57 = vld [vmem:[%s11493_s12 + $0x760] sm:$0xff]  ;;  %v6321_v58 = vpack.c.bf16 %v3767_v47, %v3760_v46 }
 0x5f6   : > { %6400 = vmatprep.subr.bf16.mxu0 %v6841_v20  ;;  %v6323_v36 = vpack.c.bf16 %v3782_v57, %v3775_v6  ;;  %v3887_v6 = vld [vmem:[%s11493_s12 + $0xaa8] sm:$0xff]  ;;  %v3894_v57 = vld [vmem:[%s11493_s12 + $0xae0] sm:$0xff] }
 0x5f7   : > { %4559 = vmatmul.mubr.f32.gmra.mrb[46].mxu0 %v10690_v21 }
 0x5f8   : > { %6306 = vmatpush1.bf16.msra.mxu1 %v6305_v61  ;;  %5021 = vmatprep.mubr.msk.f32.mxu0 %vm979_vm0, %v10712_v39  ;;  %v3789_v61 = vld [vmem:[%s11493_s12 + $0x798] sm:$0xff] }
 0x5f9   : > { %6402 = vmatpush1.bf16.msra.mxu0 %v6401_v14  ;;  %6308 = vmatprep.subr.bf16.mxu1 %v6307_v16  ;;  %v3796_v14 = vld [vmem:[%s11493_s12 + $0x7d0] sm:$0xff]  ;;  %v6325_v16 = vpack.c.bf16 %v3781_v10, %v3774_v49  ;;  %v3893_v49 = vld [vmem:[%s11493_s12 + $0xad8] sm:$0xff] }
 0x5fa   : > { %6403 = vmatprep.subr.bf16.mxu0 %v6841_v20  ;;  %v6327_v3 = vpack.c.bf16 %v3796_v14, %v3789_v61 }
 0x5fc   : > { %6310 = vmatpush1.bf16.msra.mxu1 %v6309_v26  ;;  %v6331_v26 = vpack.c.bf16 %v3810_v53, %v3803_v24 }
 0x5fd   : > { %6405 = vmatpush1.bf16.msra.mxu0 %v6404_v55  ;;  %6312 = vmatprep.subr.bf16.mxu1 %v6311_v29  ;;  %v3802_v55 = vld [vmem:[%s11493_s12 + $0x800] sm:$0xff]  ;;  %v3817_v29 = vld [vmem:[%s11493_s12 + $0x878] sm:$0xff] }
 0x5fe   : > { %6406 = vmatprep.subr.bf16.mxu0 %v6841_v20 }
 0x600   : > { %6314 = vmatpush1.bf16.msra.mxu1 %v6313_v17  ;;  %v3837_v17 = vld [vmem:[%s11493_s12 + $0x918] sm:$0xff] }
 0x601   : > { %6408 = vmatpush1.bf16.msra.mxu0 %v6407_v12  ;;  %6316 = vmatprep.subr.bf16.mxu1 %v6315_v34  ;;  %v3852_v12 = vld [vmem:[%s11493_s12 + $0x990] sm:$0xff] }
 0x602   : > { %6409 = vmatprep.subr.bf16.mxu0 %v6841_v20 }
 0x604   : > { %6318 = vmatpush1.bf16.msra.mxu1 %v6317_v38  ;;  %v3865_v38 = vld [vmem:[%s11493_s12 + $0x9f8] sm:$0xff] }
 0x605   : > { %6411 = vmatpush1.bf16.msra.mxu0 %v6410_v43  ;;  %6320 = vmatprep.subr.bf16.mxu1 %v6319_v45  ;;  %v3873_v43 = vld [vmem:[%s11493_s12 + $0xa38] sm:$0xff]  ;;  %v3880_v45 = vld [vmem:[%s11493_s12 + $0xa70] sm:$0xff]  ;;  %v6349_v46 = vpack.c.bf16 %v3865_v38, %v3858_v40 }
 0x606   : > { %6412 = vmatprep.subr.bf16.mxu0 %v6841_v20  ;;  %v6351_v47 = vpack.c.bf16 %v3880_v45, %v3873_v43 }
 0x608   : > { %6322 = vmatpush1.bf16.msra.mxu1 %v6321_v58  ;;  %v6353_v58 = vpack.c.bf16 %v3879_v19, %v3872_v62 }
 0x609   : > { %6414 = vmatpush1.bf16.msra.mxu0 %v6413_v59  ;;  %6324 = vmatprep.subr.bf16.mxu1 %v6323_v36  ;;  %v6355_v59 = vpack.c.bf16 %v3894_v57, %v3887_v6  ;;  %v3886_v36 = vld [vmem:[%s11493_s12 + $0xaa0] sm:$0xff] }
 0x60a   : > { %6415 = vmatprep.subr.bf16.mxu0 %v6841_v20  ;;  %v6329_v20 = vpack.c.bf16 %v3795_v1, %v3788_v32  ;;  %v6357_v10 = vpack.c.bf16 %v3893_v49, %v3886_v36 }
 0x60b   : > { %4366 = vmatmul.mubr.f32.vlgmr.msra.gmra.mrb[48].mxu1 %v10572_v31  ;;  %v3809_v31 = vld [vmem:[%s11493_s12 + $0x838] sm:$0xff] }
 0x60c   : > { %4371 = vmatprep.mubr.f32.mxu1 %v10600_v23  ;;  %6326 = vmatpush1.bf16.msra.mxu1 %v6325_v16  ;;  %v3824_v23 = vld [vmem:[%s11493_s12 + $0x8b0] sm:$0xff]  ;;  %v6333_v30 = vpack.c.bf16 %v3809_v31, %v3802_v55 }
 0x60d   : > { %6417 = vmatpush1.bf16.msra.mxu0 %v6416_v11  ;;  %6328 = vmatprep.subr.bf16.mxu1 %v6327_v3  ;;  %v6335_v9 = vpack.c.bf16 %v3824_v23, %v3817_v29 }
 0x60f   : > { %4372 = vmatmul.mubr.f32.gmra.mrb[50].mxu1 %v10610_v42  ;;  %v3816_v42 = vld [vmem:[%s11493_s12 + $0x870] sm:$0xff] }
 0x610   : > { %4629 = vmatmul.mubr.f32.vlgmr.msra.gmra.mrb[48].mxu0 %v10848_v22  ;;  %4377 = vmatprep.mubr.f32.mxu1 %v10642_v0  ;;  %v3831_v0 = vld [vmem:[%s11493_s12 + $0x8e8] sm:$0xff]  ;;  %v6337_v5 = vpack.c.bf16 %v3823_v4, %v3816_v42 }
 0x611   : > { %6330 = vmatpush1.bf16.msra.mxu1 %v6329_v20  ;;  %5022 = vmatprep.mubr.msk.f32.mxu0 %vm979_vm0, %v10858_v13  ;;  %v6339_v15 = vpack.c.bf16 %v3838_v25, %v3831_v0 }
 0x612   : > { %6332 = vmatprep.subr.bf16.mxu1 %v6331_v26 }
 0x613   : > { %4378 = vmatmul.mubr.f32.gmra.mrb[52].mxu1 %v10649_v63  ;;  %v3830_v63 = vld [vmem:[%s11493_s12 + $0x8e0] sm:$0xff] }
 0x614   : > { %4634 = vmatmul.mubr.f32.gmra.mrb[50].mxu0 %v10886_v33  ;;  %4383 = vmatprep.mubr.f32.mxu1 %v10682_v60  ;;  %v3845_v60 = vld [vmem:[%s11493_s12 + $0x958] sm:$0xff]  ;;  %v6341_v34 = vpack.c.bf16 %v3837_v17, %v3830_v63 }
 0x615   : > { %6334 = vmatpush1.bf16.msra.mxu1 %v6333_v30  ;;  %5023 = vmatprep.mubr.msk.f32.mxu0 %vm979_vm0, %v10896_v48 }
 0x616   : > { %6336 = vmatprep.subr.bf16.mxu1 %v6335_v9 }
 0x617   : > { %4384 = vmatmul.mubr.f32.gmra.mrb[54].mxu1 %v10690_v21  ;;  %v6343_v21 = vpack.c.bf16 %v3852_v12, %v3845_v60 }
 0x618   : > { %4639 = vmatmul.mubr.f32.gmra.mrb[52].mxu0 %v10924_v50  ;;  %5017 = vmatprep.mubr.msk.f32.mxu1 %vm979_vm0, %v10712_v39  ;;  %v3866_v39 = vld [vmem:[%s11493_s12 + $0xa00] sm:$0xff] }
 0x619   : > { %6338 = vmatpush1.bf16.msra.mxu1 %v6337_v5  ;;  %5024 = vmatprep.mubr.msk.f32.mxu0 %vm979_vm0, %v10934_v8  ;;  %v6347_v37 = vpack.c.bf16 %v3866_v39, %v3859_v28 }
 0x61a   : > { %6340 = vmatprep.subr.bf16.mxu1 %v6339_v15 }
 0x61c   : > { %4644 = vmatmul.mubr.f32.gmra.mrb[54].mxu0 %v10960_v18 }
 0x61d   : > { %6342 = vmatpush1.bf16.msra.mxu1 %v6341_v34 }
 0x61e   : > { %6344 = vmatprep.subr.bf16.mxu1 %v6343_v21 }
 0x621   : > { %6346 = vmatpush1.bf16.msra.mxu1 %v6345_v35 }
 0x622   : > { %6348 = vmatprep.subr.bf16.mxu1 %v6347_v37 }
 0x625   : > { %6350 = vmatpush1.bf16.msra.mxu1 %v6349_v46 }
 0x626   : > { %6352 = vmatprep.subr.bf16.mxu1 %v6351_v47 }
 0x629   : > { %6354 = vmatpush1.bf16.msra.mxu1 %v6353_v58 }
 0x62a   : > { %6356 = vmatprep.subr.bf16.mxu1 %v6355_v59 }
 0x62d   : > { %6358 = vmatpush1.bf16.msra.mxu1 %v6357_v10 }
 0x630   : > { %4455 = vmatmul.mubr.f32.vlgmr.msra.gmra.mrb[48].mxu1 %v10848_v22  ;;  %v3901_v22 = vrot.slane %v11358_v2, %v8611_v52 }
 0x631   : > { %5018 = vmatprep.mubr.msk.f32.mxu1 %vm979_vm0, %v10858_v13  ;;  %v11364_v13 = vrot.slane %v11358_v2, %v8839_v7 }
 0x634   : > { %4461 = vmatmul.mubr.f32.gmra.mrb[50].mxu1 %v10886_v33  ;;  %v11368_v33 = vrot.slane %v11358_v2, %v8619_v54 }
 0x635   : > { %5019 = vmatprep.mubr.msk.f32.mxu1 %vm979_vm0, %v10896_v48  ;;  %v11372_v48 = vrot.slane %v11358_v2, %v8690_v27 }
 0x638   : > { %4467 = vmatmul.mubr.f32.gmra.mrb[52].mxu1 %v10924_v50 }
 0x639   : > { %5020 = vmatprep.mubr.msk.f32.mxu1 %vm979_vm0, %v10934_v8 }
 0x63c   : > { %4473 = vmatmul.mubr.f32.gmra.mrb[54].mxu1 %v10960_v18 }
 0x69d   : > { %v4100_v50 = vpop.f32.mrb[40].mxu1  ;;  %v4278_v8 = vpop.f32.mrb[32].mxu0 }
 0x69e   : > { %v6474_v18 = vadd.f32 %v4100_v50, %v3901_v22  ;;  %v6482_v56 = vadd.f32 %v4278_v8, %v11364_v13  ;;  %v4102_v61 = vpop.f32.mrb[41].mxu1  ;;  %v4280_v14 = vpop.f32.mrb[33].mxu0 }
 0x69f   : > { %v6475_v52 = vadd.f32 %v4102_v61, %v11368_v33  ;;  %v6483_v7 = vadd.f32 %v4280_v14, %v11372_v48 }
 0x6a0   : > { %v5025_v16 = vmul.f32 -1.442695, %v6474_v18  ;;  %v5027_v11 = vmul.f32 -1.442695, %v6482_v56 }
 0x6a1   : > { %v5026_v3 = vmul.f32 -1.442695, %v6475_v52  ;;  %v5028_v54 = vmul.f32 -1.442695, %v6483_v7  ;;  %v4106_v32 = vpop.f32.mrb[42].mxu1  ;;  %v4284_v1 = vpop.f32.mrb[34].mxu0 }
 0x6a2   : > { %6664 = vpow2.f32 %v5025_v16  ;;  %v6476_v27 = vadd.f32 %v4106_v32, %v3901_v22  ;;  %v6484_v24 = vadd.f32 %v4284_v1, %v11364_v13  ;;  %v4108_v53 = vpop.f32.mrb[43].mxu1  ;;  %v4286_v20 = vpop.f32.mrb[35].mxu0 }
 0x6a3   : > { %6666 = vpow2.f32 %v5027_v11  ;;  %v6477_v26 = vadd.f32 %v4108_v53, %v11368_v33  ;;  %v6485_v55 = vadd.f32 %v4286_v20, %v11372_v48 }
 0x6a4   : > { %6668 = vpow2.f32 %v5026_v3  ;;  %v5032_v31 = vmul.f32 -1.442695, %v6476_v27  ;;  %v5034_v29 = vmul.f32 -1.442695, %v6484_v24 }
 0x6a5   : > { %6670 = vpow2.f32 %v5028_v54  ;;  %v5033_v23 = vmul.f32 -1.442695, %v6477_v26  ;;  %v5035_v30 = vmul.f32 -1.442695, %v6485_v55  ;;  %v4112_v9 = vpop.f32.mrb[44].mxu1  ;;  %v4290_v42 = vpop.f32.mrb[36].mxu0 }
 0x6a6   : > { %6672 = vpow2.f32 %v5032_v31  ;;  %v6478_v4 = vadd.f32 %v4112_v9, %v3901_v22  ;;  %v6486_v0 = vadd.f32 %v4290_v42, %v11364_v13  ;;  %v4114_v25 = vpop.f32.mrb[45].mxu1  ;;  %v4292_v5 = vpop.f32.mrb[37].mxu0 }
 0x6a7   : > { %6674 = vpow2.f32 %v5034_v29  ;;  %v6479_v15 = vadd.f32 %v4114_v25, %v11368_v33  ;;  %v6487_v63 = vadd.f32 %v4292_v5, %v11372_v48 }
 0x6a8   : > { %6676 = vpow2.f32 %v5033_v23  ;;  %v5039_v17 = vmul.f32 -1.442695, %v6478_v4  ;;  %v5041_v60 = vmul.f32 -1.442695, %v6486_v0 }
 0x6a9   : > { %6678 = vpow2.f32 %v5035_v30  ;;  %v5040_v12 = vmul.f32 -1.442695, %v6479_v15  ;;  %v5042_v34 = vmul.f32 -1.442695, %v6487_v63  ;;  %v4118_v21 = vpop.f32.mrb[46].mxu1  ;;  %v4296_v44 = vpop.f32.mrb[38].mxu0 }
 0x6aa   : > { %6680 = vpow2.f32 %v5039_v17  ;;  %v6480_v41 = vadd.f32 %v4118_v21, %v3901_v22  ;;  %v4120_v28 = vpop.f32.mrb[47].mxu1  ;;  %v4298_v39 = vpop.f32.mrb[39].mxu0  ;;  %v6488_v50 = vadd.f32 %v4296_v44, %v11364_v13 }
 0x6ab   : > { %6682 = vpow2.f32 %v5041_v60  ;;  %v6481_v56 = vadd.f32 %v4120_v28, %v11368_v33  ;;  %v6489_v52 = vadd.f32 %v4298_v39, %v11372_v48 }
 0x6ac   : > { %v6665_v35 = vpop.eup %6664  ;;  %6684 = vpow2.f32 %v5040_v12  ;;  %v5046_v37 = vmul.f32 -1.442695, %v6480_v41  ;;  %v5048_v54 = vmul.f32 -1.442695, %v6488_v50 }
 0x6ad   : > { %v6667_v40 = vpop.eup %6666  ;;  %v4733_v38 = vadd.f32 1.0, %v6665_v35  ;;  %6686 = vpow2.f32 %v5042_v34  ;;  %v5047_v1 = vmul.f32 -1.442695, %v6481_v56  ;;  %v5049_v33 = vmul.f32 -1.442695, %v6489_v52 }
 0x6ae   : > { %v6669_v43 = vpop.eup %6668  ;;  %v4735_v45 = vadd.f32 1.0, %v6667_v40  ;;  %6688 = vpow2.f32 %v5046_v37 }
 0x6af   : > { %v6671_v46 = vpop.eup %6670  ;;  %6690 = vrcp.f32 %v4733_v38  ;;  %v4734_v47 = vadd.f32 1.0, %v6669_v43 }
 0x6b0   : > { %v6673_v62 = vpop.eup %6672  ;;  %6692 = vrcp.f32 %v4735_v45  ;;  %v4736_v19 = vadd.f32 1.0, %v6671_v46  ;;  %v3924_v45 = vsub.s32 6, %v8608_v51 }
 0x6b1   : > { %v6675_v6 = vpop.eup %6674  ;;  %6694 = vrcp.f32 %v4734_v47  ;;  %v4740_v57 = vadd.f32 1.0, %v6673_v62 }
 0x6b2   : > { %v6677_v58 = vpop.eup %6676  ;;  %6696 = vrcp.f32 %v4736_v19  ;;  %v4742_v59 = vadd.f32 1.0, %v6675_v6  ;;  %v3925_v46 = vrot.slane %v11358_v2, %v3924_v45 }
 0x6b3   : > { %v6679_v36 = vpop.eup %6678  ;;  %6698 = vrcp.f32 %v4740_v57  ;;  %v4741_v49 = vadd.f32 1.0, %v6677_v58 }
 0x6b4   : > { %v6681_v10 = vpop.eup %6680  ;;  %6700 = vrcp.f32 %v4742_v59  ;;  %v4743_v22 = vadd.f32 1.0, %v6679_v36 }
 0x6b5   : > { %v6683_v8 = vpop.eup %6682  ;;  %6702 = vrcp.f32 %v4741_v49  ;;  %v4747_v18 = vadd.f32 1.0, %v6681_v10 }
 0x6b6   : > { %v6685_v61 = vpop.eup %6684  ;;  %6704 = vrcp.f32 %v4743_v22  ;;  %v4749_v14 = vadd.f32 1.0, %v6683_v8 }
 0x6b7   : > { %v6687_v7 = vpop.eup %6686  ;;  %6706 = vrcp.f32 %v4747_v18  ;;  %v4748_v16 = vadd.f32 1.0, %v6685_v61 }
 0x6b8   : > { %v6689_v11 = vpop.eup %6688  ;;  %6708 = vrcp.f32 %v4749_v14  ;;  %v4750_v3 = vadd.f32 1.0, %v6687_v7 }
 0x6b9   : > { %v6691_v32 = vpop.eup %6690  ;;  %6710 = vrcp.f32 %v4748_v16  ;;  %v4754_v13 = vadd.f32 1.0, %v6689_v11 }
 0x6ba   : > { %v6693_v27 = vpop.eup %6692  ;;  %4817 = vst [vmem:[%s11389_s20] sm:$0xff] %v6691_v32  ;;  %6712 = vrcp.f32 %v4750_v3 }
 0x6bb   : > { %v6695_v48 = vpop.eup %6694  ;;  %4819 = vst [vmem:[%s11389_s20 + $0x10] sm:$0xff] %v6693_v27  ;;  %6714 = vrcp.f32 %v4754_v13  ;;  %v3916_v27 = vsub.s32 4, %v8608_v51 }
 0x6bc   : > { %v6697_v24 = vpop.eup %6696  ;;  %4818 = vst [vmem:[%s11389_s20 + $0x8] sm:$0xff] %v6695_v48  ;;  %6716 = vpow2.f32 %v5048_v54 }
 0x6bd   : > { %v6699_v53 = vpop.eup %6698  ;;  %4820 = vst [vmem:[%s11389_s20 + $0x18] sm:$0xff] %v6697_v24  ;;  %6718 = vpow2.f32 %v5047_v1 }
 0x6be   : > { %v6701_v20 = vpop.eup %6700  ;;  %4824 = vst [vmem:[%s11389_s20 + $0x38] sm:$0xff] %v6699_v53  ;;  %6720 = vpow2.f32 %v5049_v33  ;;  %v5091_v26 = vpop.f32.mrb[40].mxu0  ;;  %v3920_v33 = vsub.s32 5, %v8608_v51 }
 0x6bf   : > { %v6703_v55 = vpop.eup %6702  ;;  %4826 = vst [vmem:[%s11389_s20 + $0x48] sm:$0xff] %v6701_v20  ;;  %v5092_v31 = vpop.f32.mrb[41].mxu0  ;;  %v3917_v20 = vrot.slane %v11358_v2, %v3916_v27 }
 0x6c0   : > { %v6705_v29 = vpop.eup %6704  ;;  %4825 = vst [vmem:[%s11389_s20 + $0x40] sm:$0xff] %v6703_v55  ;;  %v5093_v23 = vadd.f32 %v5092_v31, %v5091_v26  ;;  %v3921_v26 = vrot.slane %v11358_v2, %v3920_v33 }
 0x6c1   : > { %v6707_v30 = vpop.eup %6706  ;;  %4827 = vst [vmem:[%s11389_s20 + $0x50] sm:$0xff] %v6705_v29 }
 0x6c2   : > { %v6709_v9 = vpop.eup %6708  ;;  %4831 = vst [vmem:[%s11389_s20 + $0x70] sm:$0xff] %v6707_v30  ;;  %v5094_v42 = vpop.f32.mrb[42].mxu0  ;;  %v4546_v47 = vadd.f32 %v5093_v23, %v3925_v46 }
 0x6c3   : > { %v6711_v4 = vpop.eup %6710  ;;  %4833 = vst [vmem:[%s11389_s20 + $0x80] sm:$0xff] %v6709_v9  ;;  %v5095_v0 = vpop.f32.mrb[43].mxu0 }
 0x6c4   : > { %v6713_v25 = vpop.eup %6712  ;;  %4832 = vst [vmem:[%s11389_s20 + $0x78] sm:$0xff] %v6711_v4  ;;  %v5096_v5 = vadd.f32 %v5095_v0, %v5094_v42 }
 0x6c5   : > { %v6715_v15 = vpop.eup %6714  ;;  %4834 = vst [vmem:[%s11389_s20 + $0x88] sm:$0xff] %v6713_v25 }
 0x6c6   : > { %v6717_v63 = vpop.eup %6716  ;;  %4838 = vst [vmem:[%s11389_s20 + $0xa8] sm:$0xff] %v6715_v15  ;;  %v5097_v17 = vpop.f32.mrb[44].mxu0  ;;  %v4551_v58 = vadd.f32 %v5096_v5, %v3925_v46 }
 0x6c7   : > { %v6719_v60 = vpop.eup %6718  ;;  %v4756_v12 = vadd.f32 1.0, %v6717_v63  ;;  %v5098_v34 = vpop.f32.mrb[45].mxu0 }
 0x6c8   : > { %v6721_v21 = vpop.eup %6720  ;;  %v4755_v44 = vadd.f32 1.0, %v6719_v60  ;;  %v5099_v41 = vadd.f32 %v5098_v34, %v5097_v17 }
 0x6c9   : > { %6722 = vrcp.f32 %v4756_v12  ;;  %v4757_v28 = vadd.f32 1.0, %v6721_v21 }
 0x6ca   : > { %6724 = vrcp.f32 %v4755_v44  ;;  %v5100_v39 = vpop.f32.mrb[46].mxu0  ;;  %v4556_v22 = vadd.f32 %v5099_v41, %v3925_v46 }
 0x6cb   : > { %6726 = vrcp.f32 %v4757_v28  ;;  %v5101_v35 = vpop.f32.mrb[47].mxu0 }
 0x6cc   : > { %v5102_v37 = vadd.f32 %v5101_v35, %v5100_v39 }
 0x6ce   : > { %v4561_v61 = vadd.f32 %v5102_v37, %v3925_v46 }
 0x6d3   : > { %v6723_v40 = vpop.eup %6722 }
 0x6d4   : > { %v6725_v38 = vpop.eup %6724  ;;  %4840 = vst [vmem:[%s11389_s20 + $0xb8] sm:$0xff] %v6723_v40 }
 0x6d5   : > { %v6727_v43 = vpop.eup %6726  ;;  %4839 = vst [vmem:[%s11389_s20 + $0xb0] sm:$0xff] %v6725_v38 }
 0x6d6   : > { %4841 = vst [vmem:[%s11389_s20 + $0xc0] sm:$0xff] %v6727_v43 }
 0x6e3   : > { %v4630_v62 = vpop.f32.mrb[48].mxu0 }
 0x6e4   : > { %v4631_v19 = vadd.f32 %v4630_v62, %v4546_v47  ;;  %v4632_v6 = vpop.f32.mrb[49].mxu0 }
 0x6e6   : > { %v5031_v57 = vmul.f32 -1.442695, %v4631_v19 }
 0x6e7   : > { %v4635_v59 = vpop.f32.mrb[50].mxu0 }
 0x6e8   : > { %6728 = vpow2.f32 %v5031_v57  ;;  %v4636_v36 = vadd.f32 %v4635_v59, %v4551_v58  ;;  %v4637_v49 = vpop.f32.mrb[51].mxu0 }
 0x6ea   : > { %v5038_v10 = vmul.f32 -1.442695, %v4636_v36 }
 0x6eb   : > { %v4640_v50 = vpop.f32.mrb[52].mxu0 }
 0x6ec   : > { %6730 = vpow2.f32 %v5038_v10  ;;  %v4641_v8 = vadd.f32 %v4640_v50, %v4556_v22  ;;  %v4642_v18 = vpop.f32.mrb[53].mxu0 }
 0x6ee   : > { %v5045_v56 = vmul.f32 -1.442695, %v4641_v8 }
 0x6ef   : > { %v4645_v14 = vpop.f32.mrb[54].mxu0 }
 0x6f0   : > { %6732 = vpow2.f32 %v5045_v56  ;;  %v4646_v52 = vadd.f32 %v4645_v14, %v4561_v61  ;;  %v4647_v7 = vpop.f32.mrb[55].mxu0 }
 0x6f2   : > { %v6729_v16 = vpop.eup %6728  ;;  %v5052_v11 = vmul.f32 -1.442695, %v4646_v52 }
 0x6f3   : > { %v4739_v3 = vadd.f32 1.0, %v6729_v16 }
 0x6f4   : > { %6734 = vpow2.f32 %v5052_v11 }
 0x6f5   : > { %6736 = vrcp.f32 %v4739_v3 }
 0x6f6   : > { %v6731_v54 = vpop.eup %6730 }
 0x6f7   : > { %v4746_v32 = vadd.f32 1.0, %v6731_v54 }
 0x6f9   : > { %6738 = vrcp.f32 %v4746_v32 }
 0x6fa   : > { %v6733_v13 = vpop.eup %6732 }
 0x6fb   : > { %v4753_v1 = vadd.f32 1.0, %v6733_v13 }
 0x6fd   : > { %6740 = vrcp.f32 %v4753_v1 }
 0x6fe   : > { %v6735_v48 = vpop.eup %6734 }
 0x6ff   : > { %v6737_v24 = vpop.eup %6736  ;;  %v4760_v53 = vadd.f32 1.0, %v6735_v48 }
 0x700   : > { %4823 = vst.msk [vmem:[%s11389_s20 + $0x30] sm:$0xff] %vm979_vm0, %v6737_v24 }
 0x701   : > { %6742 = vrcp.f32 %v4760_v53 }
 0x703   : > { %v6739_v55 = vpop.eup %6738  ;;  %v4456_v31 = vpop.f32.mrb[48].mxu1 }
 0x704   : > { %4830 = vst.msk [vmem:[%s11389_s20 + $0x68] sm:$0xff] %vm979_vm0, %v6739_v55  ;;  %v6490_v29 = vadd.f32 %v4456_v31, %v3917_v20  ;;  %v4458_v23 = vpop.f32.mrb[49].mxu1 }
 0x705   : > { %v6491_v30 = vadd.f32 %v4458_v23, %v3921_v26 }
 0x706   : > { %v5029_v51 = vmul.f32 -1.442695, %v6490_v29 }
 0x707   : > { %v6741_v9 = vpop.eup %6740  ;;  %v5030_v42 = vmul.f32 -1.442695, %v6491_v30  ;;  %v4462_v4 = vpop.f32.mrb[50].mxu1 }
 0x708   : > { %4837 = vst.msk [vmem:[%s11389_s20 + $0xa0] sm:$0xff] %vm979_vm0, %v6741_v9  ;;  %6744 = vpow2.f32 %v5029_v51  ;;  %v6492_v0 = vadd.f32 %v4462_v4, %v3917_v20  ;;  %v4464_v25 = vpop.f32.mrb[51].mxu1 }
 0x709   : > { %6746 = vpow2.f32 %v5030_v42  ;;  %v6493_v5 = vadd.f32 %v4464_v25, %v3921_v26 }
 0x70a   : > { %v5036_v2 = vmul.f32 -1.442695, %v6492_v0 }
 0x70b   : > { %v6743_v15 = vpop.eup %6742  ;;  %v5037_v63 = vmul.f32 -1.442695, %v6493_v5  ;;  %v4468_v17 = vpop.f32.mrb[52].mxu1 }
 0x70c   : > { %4844 = vst.msk [vmem:[%s11389_s20 + $0xd8] sm:$0xff] %vm979_vm0, %v6743_v15  ;;  %6748 = vpow2.f32 %v5036_v2  ;;  %v6494_v60 = vadd.f32 %v4468_v17, %v3917_v20  ;;  %v4470_v12 = vpop.f32.mrb[53].mxu1 }
 0x70d   : > { %6750 = vpow2.f32 %v5037_v63  ;;  %v6495_v34 = vadd.f32 %v4470_v12, %v3921_v26 }
 0x70e   : > { %v5043_v21 = vmul.f32 -1.442695, %v6494_v60 }
 0x70f   : > { %v5044_v44 = vmul.f32 -1.442695, %v6495_v34  ;;  %v4474_v41 = vpop.f32.mrb[54].mxu1 }
 0x710   : > { %6752 = vpow2.f32 %v5043_v21  ;;  %v6496_v28 = vadd.f32 %v4474_v41, %v3917_v20  ;;  %v4476_v39 = vpop.f32.mrb[55].mxu1 }
 0x711   : > { %6754 = vpow2.f32 %v5044_v44  ;;  %v6497_v35 = vadd.f32 %v4476_v39, %v3921_v26 }
 0x712   : > { %v6745_v37 = vpop.eup %6744  ;;  %v5050_v40 = vmul.f32 -1.442695, %v6496_v28 }
 0x713   : > { %v6747_v38 = vpop.eup %6746  ;;  %v4737_v43 = vadd.f32 1.0, %v6745_v37  ;;  %v5051_v45 = vmul.f32 -1.442695, %v6497_v35 }
 0x714   : > { %v4738_v46 = vadd.f32 1.0, %v6747_v38  ;;  %6756 = vpow2.f32 %v5050_v40 }
 0x715   : > { %6758 = vrcp.f32 %v4737_v43 }
 0x716   : > { %v6749_v47 = vpop.eup %6748  ;;  %6760 = vrcp.f32 %v4738_v46 }
 0x717   : > { %v6751_v62 = vpop.eup %6750  ;;  %v4744_v19 = vadd.f32 1.0, %v6749_v47  ;;  %6762 = vpow2.f32 %v5051_v45 }
 0x718   : > { %v4745_v6 = vadd.f32 1.0, %v6751_v62 }
 0x719   : > { %6764 = vrcp.f32 %v4744_v19 }
 0x71a   : > { %v6753_v57 = vpop.eup %6752  ;;  %6766 = vrcp.f32 %v4745_v6 }
 0x71b   : > { %v6755_v58 = vpop.eup %6754  ;;  %v4751_v59 = vadd.f32 1.0, %v6753_v57 }
 0x71c   : > { %v4752_v36 = vadd.f32 1.0, %v6755_v58 }
 0x71d   : > { %6768 = vrcp.f32 %v4751_v59 }
 0x71e   : > { %v6757_v49 = vpop.eup %6756  ;;  %6770 = vrcp.f32 %v4752_v36 }
 0x71f   : > { %v6759_v10 = vpop.eup %6758  ;;  %v4758_v22 = vadd.f32 1.0, %v6757_v49 }
 0x720   : > { %v6761_v50 = vpop.eup %6760  ;;  %4821 = vst [vmem:[%s11389_s20 + $0x20] sm:$0xff] %v6759_v10 }
 0x721   : > { %v6763_v8 = vpop.eup %6762  ;;  %4822 = vst [vmem:[%s11389_s20 + $0x28] sm:$0xff] %v6761_v50  ;;  %6772 = vrcp.f32 %v4758_v22 }
 0x722   : > { %v4759_v18 = vadd.f32 1.0, %v6763_v8 }
 0x723   : > { %v6765_v56 = vpop.eup %6764 }
 0x724   : > { %v6767_v61 = vpop.eup %6766  ;;  %4828 = vst [vmem:[%s11389_s20 + $0x58] sm:$0xff] %v6765_v56  ;;  %6774 = vrcp.f32 %v4759_v18 }
 0x725   : > { %4829 = vst [vmem:[%s11389_s20 + $0x60] sm:$0xff] %v6767_v61 }
 0x727   : > { %v6769_v14 = vpop.eup %6768 }
 0x728   : > { %v6771_v52 = vpop.eup %6770  ;;  %4835 = vst [vmem:[%s11389_s20 + $0x90] sm:$0xff] %v6769_v14 }
 0x729   : > { %4836 = vst [vmem:[%s11389_s20 + $0x98] sm:$0xff] %v6771_v52 }
 0x72b   : > { %v6773_v7 = vpop.eup %6772 }
 0x72c   : > { %4842 = vst [vmem:[%s11389_s20 + $0xc8] sm:$0xff] %v6773_v7 }
 0x72e   : > { %v6775_v16 = vpop.eup %6774 }
 0x72f   : > { %4843 = vst [vmem:[%s11389_s20 + $0xd0] sm:$0xff] %v6775_v16 }
 0x730   : > { %6789 = shalt.err (!%p6786_p3)
}
 0x731   : > { %s6790_s24 = scalar_lea.hbm %s11435_s14, 3584  ;;  %s6794_s30 = scalar_lea.hbm %s11518_s26, 7168 }
 0x732   : > { %p6791_p4 = scmp.ne.s32.totalorder %s11435_s14, %s6790_s24  ;;  %p6795_p9 = scmp.lt.u32.totalorder %s11435_s14, %s11518_s26 }
 0x733   : > { %p6796_p10 = scmp.lt.u32.totalorder %s6794_s30, %s6790_s24  ;;  %p6798_p12 = scmp.lt.u32.totalorder %s6790_s24, %s11435_s14 }
 0x734   : > { %p6792_p7 = pnand %p6791_p4, %p6963_p5 }
 0x735   : > { %p6797_p11 = por %p6796_p10, %p6795_p9 }
 0x736   : > { %p6793_p8 = pneg %p6792_p7 }
 0x737   : > { %p6799_p13 = por %p6798_p12, %p6797_p11 }
 0x739   : > { %p6800_p0 = pnand %p6799_p13, %p6793_p8 }
 0x73b   : > { %6803 = shalt.err (!%p6800_p0)
}
 0x73c   : > { %s6843_s16 = smov 896   ;;  %s6844_s22 = smov 56  }
 0x73d   : > { %6613 = dma.vmem_to_hbm [thread:$0]  (%p6963_p5), %s11430_s21, 3584, %s11435_s14, %s11440_s28, %s6843_s16, %s6843_s16, %s6844_s22  }
 0x73e PF: > { %s11519_s25 = sld [smem:[#allocation7_spill]]  ;;  %s11520_s27 = sld [smem:[#allocation5_spill]] }
 0x744   : > { %p6619_p1 = scmp.ge.s32.totalorder %s11519_s25, 2  ;;  %s4885_s20 = sand.u32 1, %s11520_s27  }
 0x745   : > { %s4886_s24 = scalar_lea.sflag [#allocation3], %s4885_s20 }
 0x746   : > { %p6616_p2 = pnand %p6619_p1, %p6967_p6 }
 0x748   : > { %6821 = dma.done.wait (!%p6616_p2), %s4886_s24, 3584  }
 0x749   : > { %6823 = vsyncadd (!%p6616_p2), %s4886_s24, 4294963712  ;;  %s11522_s21 = sld [smem:[#allocation8_spill]]  ;;  %s11523_s30 = sld [smem:[#allocation6_spill]] }
 0x74a   : > { %s11524_s20 = sld [smem:[#allocation9_spill]]  ;;  %s11525_s18 = smov %s6830_s19 }
 0x74f   : > { %p26_p3 = scmp.ge.s32.totalorder %s11522_s21, 4   ;;  %s11526_s19 = smov %s11523_s30 }
 0x751   :  { %28 = sbr.rel (!%p26_p3) target bundleno = 5 (0x5), region = 126 }
 0x758   :  { %4900 = vsyncpa [#allocation3], 1 }
 0x759   :  { %4902 = vsyncpa [#allocation3 + $0x1], 1 }

</bundles_post_ra>
